<compile_context>
chip_gen: v7x
topology: tpu7x:2x2x1
jax: 0.10.0
libtpu: 0.0.40
codegen_flags: <defaults>
</compile_context>

<pallas_src>
import functools

import jax
import jax.numpy as jnp
from jax.experimental import pallas as pl
from jax.experimental.pallas import tpu as pltpu

EPS = 1e-5
LANE = 128
_VMEM_LIMIT = 32 * 1024 * 1024  # safe on v5e/v6e (128 MiB) and v7x (64 MiB)


def _rup(c, m=LANE):
    return ((c + m - 1) // m) * m


def _pad_last(x, target):
    pad = target - x.shape[-1]
    if pad == 0:
        return x
    cfg = [(0, 0)] * (x.ndim - 1) + [(0, pad)]
    return jnp.pad(x, cfg)


# ----------------------------------------------------------------------------
# Fused conv-block kernel
#   y = [relu(x*pre_s + pre_t)] --K-tap conv--> (*W + b) [relu] [+ (pooled) res]
# ----------------------------------------------------------------------------
def _conv_block_kernel(*refs, K, stride, pad_left, valid_len,
                       pre_bn, post_relu, res_mode, pool_s):
    it = iter(refs)
    x_ref = next(it)          # (Lp, Cin)   length-padded, channel-padded input
    w_ref = next(it)          # (K, Cin, Cout)
    b_ref = next(it)          # (1, Cout)
    if pre_bn:
        s_ref = next(it)      # (1, Cin)
        t_ref = next(it)      # (1, Cin)
    if res_mode is not None:
        r_ref = next(it)      # (Lout, Cout) or (Lout*pool_s, Cout)
    o_ref = next(it)          # (Lout, Cout)

    lout, cout = o_ref.shape
    cin = x_ref.shape[1]

    if pre_bn:
        # Hoisted out of the tap loop (broadcasts are not CSE'd by JAX).
        scale = s_ref[...]
        shift = t_ref[...]
        base = jax.lax.broadcasted_iota(jnp.int32, (lout, cin), 0) * stride

    def tap(ref, start, size, step):
        if step == 1:
            return ref[pl.ds(start, size), :]
        return ref[pl.ds(start, size, stride=step), :]

    acc = jnp.zeros((lout, cout), jnp.float32)
    for k in range(K):  # K is small & static -> unrolled tap accumulation on the MXU
        xk = tap(x_ref, k, lout, stride)
        if pre_bn:
            xk = jnp.maximum(xk * scale + shift, 0.0)
            pos = base + k
            # Padded positions must contribute exactly zero (conv zero padding
            # happens *after* bn1+relu1 in the reference module).
            xk = jnp.where((pos >= pad_left) & (pos < pad_left + valid_len), xk, 0.0)
        acc = acc + jnp.dot(xk, w_ref[k], preferred_element_type=jnp.float32)

    y = acc + b_ref[...]
    if post_relu:
        y = jnp.maximum(y, 0.0)

    if res_mode == "add":
        y = y + r_ref[...]
    elif res_mode == "pool_add":
        # Same-pad max-pool (kernel == stride == pool_s) of the shortcut, fused.
        m = tap(r_ref, 0, lout, pool_s)
        for j in range(1, pool_s):
            m = jnp.maximum(m, tap(r_ref, j, lout, pool_s))
        y = y + m

    o_ref[...] = y.astype(o_ref.dtype)


def conv_block(x, w, b, *, stride, pre_bn=None, post_relu=False,
               residual=None, pool_s=1):
    """Fused Conv1dPadSame with optional pre-BN/ReLU, folded post-BN (already in
    w/b), ReLU epilogue and residual add (+ fused same-pad max-pool).

    x: (N, L, Cin_p);  w: (K, Cin_p, Cout_p);  b: (Cout_p,)
    residual: (N, Lout, Cout_p) or (N, Lout*pool_s, Cout_p) when pooling.
    """
    N, L, cin = x.shape
    K, _, cout = w.shape
    lout = -(-L // stride)
    pad = max(0, (lout - 1) * stride + K - L)
    pad_l = pad // 2
    xp = jnp.pad(x, ((0, 0), (pad_l, pad - pad_l), (0, 0)))
    lp = L + pad

    inputs = [xp, w, b.reshape(1, cout)]
    in_specs = [
        pl.BlockSpec((None, lp, cin), lambda n: (n, 0, 0)),
        pl.BlockSpec((K, cin, cout), lambda n: (0, 0, 0)),
        pl.BlockSpec((1, cout), lambda n: (0, 0)),
    ]
    if pre_bn is not None:
        s, t = pre_bn
        inputs.append(s.reshape(1, cin))
        in_specs.append(pl.BlockSpec((1, cin), lambda n: (0, 0)))
        inputs.append(t.reshape(1, cin))
        in_specs.append(pl.BlockSpec((1, cin), lambda n: (0, 0)))

    res_mode = None
    if residual is not None:
        res_mode = "add" if pool_s == 1 else "pool_add"
        lr = residual.shape[1]
        inputs.append(residual)
        in_specs.append(pl.BlockSpec((None, lr, cout), lambda n: (n, 0, 0)))

    kern = functools.partial(
        _conv_block_kernel, K=K, stride=stride, pad_left=pad_l, valid_len=L,
        pre_bn=pre_bn is not None, post_relu=post_relu,
        res_mode=res_mode, pool_s=pool_s)

    return pl.pallas_call(
        kern,
        out_shape=jax.ShapeDtypeStruct((N, lout, cout), jnp.float32),
        grid=(N,),
        in_specs=in_specs,
        out_specs=pl.BlockSpec((None, lout, cout), lambda n: (n, 0, 0)),
        compiler_params=pltpu.CompilerParams(
            dimension_semantics=("parallel",),
            vmem_limit_bytes=_VMEM_LIMIT),
    )(*inputs)


# ----------------------------------------------------------------------------
# Fused head kernel: BN + ReLU + mean(L) + Linear + sigmoid + Linear + softmax
# ----------------------------------------------------------------------------
def _head_kernel(x_ref, s_ref, t_ref, w1_ref, b1_ref, w2_ref, b2_ref, o_ref,
                 *, n_classes, inv_len):
    h = jnp.maximum(x_ref[...] * s_ref[...] + t_ref[...], 0.0)       # (L, C)
    feat = jnp.sum(h, axis=0, keepdims=True) * inv_len               # mean -> (1, C)
    f = jnp.dot(feat, w1_ref[...], preferred_element_type=jnp.float32) + b1_ref[...]
    f = jax.nn.sigmoid(f)                                            # (1, F)
    logits = jnp.dot(f, w2_ref[...], preferred_element_type=jnp.float32) + b2_ref[...]
    lane = jax.lax.broadcasted_iota(jnp.int32, logits.shape, 1)
    logits = jnp.where(lane < n_classes, logits, -1e30)              # mask padded classes
    logits = logits - jnp.max(logits, axis=-1, keepdims=True)
    e = jnp.exp(logits)
    o_ref[...] = (e / jnp.sum(e, axis=-1, keepdims=True)).astype(o_ref.dtype)


def head(x, bn_scale, bn_shift, w1, b1, w2, b2, n_classes):
    N, L, c = x.shape
    f = w1.shape[1]
    cls_p = w2.shape[1]
    kern = functools.partial(_head_kernel, n_classes=n_classes, inv_len=1.0 / L)
    out = pl.pallas_call(
        kern,
        out_shape=jax.ShapeDtypeStruct((N, 1, cls_p), jnp.float32),
        grid=(N,),
        in_specs=[
            pl.BlockSpec((None, L, c), lambda n: (n, 0, 0)),
            pl.BlockSpec((1, c), lambda n: (0, 0)),
            pl.BlockSpec((1, c), lambda n: (0, 0)),
            pl.BlockSpec((c, f), lambda n: (0, 0)),
            pl.BlockSpec((1, f), lambda n: (0, 0)),
            pl.BlockSpec((f, cls_p), lambda n: (0, 0)),
            pl.BlockSpec((1, cls_p), lambda n: (0, 0)),
        ],
        out_specs=pl.BlockSpec((None, 1, cls_p), lambda n: (n, 0, 0)),
        compiler_params=pltpu.CompilerParams(
            dimension_semantics=("parallel",),
            vmem_limit_bytes=_VMEM_LIMIT),
    )(x, bn_scale.reshape(1, c), bn_shift.reshape(1, c),
      w1, b1.reshape(1, f), w2, b2.reshape(1, cls_p))
    return out[:, 0, :n_classes]


# ----------------------------------------------------------------------------
# Trace-time parameter prep: BN folding + zero-padding to 128 lanes
# (params are closed-over constants under jit -> folded at compile time)
# ----------------------------------------------------------------------------
def _bn_fold(bn):
    scale = bn["gamma"] / jnp.sqrt(bn["var"] + EPS)
    shift = bn["beta"] - bn["mean"] * scale
    return scale, shift


def _prep_conv(conv, bn, cin_p, cout_p):
    w, b = conv["w"], conv["b"]
    if bn is not None:  # fold eval-mode BN that follows the conv into w/b
        scale, shift = _bn_fold(bn)
        w = w * scale[None, None, :]
        b = b * scale + shift
    K, cin, cout = w.shape
    wp = jnp.zeros((K, cin_p, cout_p), jnp.float32).at[:, :cin, :cout].set(w)
    bp = jnp.zeros((cout_p,), jnp.float32).at[:cout].set(b)
    return wp, bp


def _prep_bn(bn, c_p):
    scale, shift = _bn_fold(bn)
    c = scale.shape[0]
    sp = jnp.zeros((c_p,), jnp.float32).at[:c].set(scale)
    tp = jnp.zeros((c_p,), jnp.float32).at[:c].set(shift)
    return sp, tp


# ----------------------------------------------------------------------------
# Parameter initialization (deterministic, synthetic)
# ----------------------------------------------------------------------------
def _conv_init(key, cin, cout, k):
    k1, k2 = jax.random.split(key)
    return {"w": 0.1 * jax.random.normal(k1, (k, cin, cout), jnp.float32),
            "b": 0.1 * jax.random.normal(k2, (cout,), jnp.float32)}


def _bn_init(key, c):
    k1, k2, k3, k4 = jax.random.split(key, 4)
    return {"gamma": 1.0 + 0.1 * jax.random.normal(k1, (c,), jnp.float32),
            "beta": 0.1 * jax.random.normal(k2, (c,), jnp.float32),
            "mean": 0.1 * jax.random.normal(k3, (c,), jnp.float32),
            "var": 0.5 + 0.5 * jnp.abs(jax.random.normal(k4, (c,), jnp.float32))}


def _linear_init(key, cin, cout):
    k1, k2 = jax.random.split(key)
    return {"w": 0.1 * jax.random.normal(k1, (cin, cout), jnp.float32),
            "b": 0.1 * jax.random.normal(k2, (cout,), jnp.float32)}


def init_resnet_params(key, in_channels, base_filters, kernel_size, stride,
                       n_block, n_classes=4, downsample_gap=2,
                       increasefilter_gap=4, num_features=32):
    keys = iter(jax.random.split(key, 4 * n_block + 8))
    params = {
        "first_conv": _conv_init(next(keys), in_channels, base_filters, kernel_size),
        "first_bn": _bn_init(next(keys), base_filters),
        "blocks": [],
    }
    out_channels = base_filters
    for i_block in range(n_block):
        is_first = (i_block == 0)
        downsample = (i_block % downsample_gap == 1)
        if is_first:
            b_in = base_filters
            b_out = b_in
        else:
            b_in = int(base_filters * 2 ** ((i_block - 1) // increasefilter_gap))
            if i_block % increasefilter_gap == 0 and i_block != 0:
                b_out = b_in * 2
            else:
                b_out = b_in
        b_stride = stride if downsample else 1
        params["blocks"].append({
            "is_first": is_first, "downsample": downsample,
            "in_ch": b_in, "out_ch": b_out, "stride": b_stride,
            "bn1": _bn_init(next(keys), b_in),
            "conv1": _conv_init(next(keys), b_in, b_out, kernel_size),
            "bn2": _bn_init(next(keys), b_out),
            "conv2": _conv_init(next(keys), b_out, b_out, kernel_size),
        })
        out_channels = b_out
    params["feature_bn"] = _bn_init(next(keys), out_channels)
    params["feature_layer"] = _linear_init(next(keys), out_channels, num_features)
    params["final_dense"] = _linear_init(next(keys), num_features, n_classes)
    return params


# ----------------------------------------------------------------------------
# Forward pass (mirrors ResNet.forward / get_features, eval mode)
# ----------------------------------------------------------------------------
def resnet_forward(params, x_ncl):
    N, c_in, L = x_ncl.shape
    max_c = max([c_in, params["first_conv"]["w"].shape[2]] +
                [b["out_ch"] for b in params["blocks"]])
    CP = _rup(max_c)  # single lane-dense channel width carried through the net

    x = jnp.transpose(x_ncl, (0, 2, 1)).astype(jnp.float32)  # (N, L, C) channels-last
    x = _pad_last(x, CP)

    # first conv + folded first BN + ReLU, one fused kernel
    w, b = _prep_conv(params["first_conv"], params["first_bn"], CP, CP)
    out = conv_block(x, w, b, stride=1, post_relu=True)

    for blk in params["blocks"]:
        in_ch, out_ch = blk["in_ch"], blk["out_ch"]
        shortcut = out

        # conv1: [bn1+relu1 prologue (non-first)] + conv + folded bn2 + relu2
        pre = None if blk["is_first"] else _prep_bn(blk["bn1"], CP)
        w1, b1 = _prep_conv(blk["conv1"], blk["bn2"], CP, CP)
        y = conv_block(out, w1, b1, stride=blk["stride"], pre_bn=pre, post_relu=True)

        # shortcut path (max-pool is fused into the conv2 kernel epilogue)
        pool_s = blk["stride"] if blk["downsample"] else 1
        if out_ch != in_ch:  # channel zero-pad split left/right (not hit in test cfg)
            ch1 = (out_ch - in_ch) // 2
            shortcut = jnp.pad(shortcut[..., :in_ch],
                               ((0, 0), (0, 0), (ch1, CP - in_ch - ch1)))
        if pool_s > 1:  # same-pad layout for the fused max-pool (constant 0 pad)
            lin = shortcut.shape[1]
            p_out = -(-lin // pool_s)
            p_pad = pool_s - 1
            p_l = p_pad // 2
            shortcut = jnp.pad(shortcut,
                               ((0, 0), (p_l, p_pad - p_l), (0, 0)))[:, :p_out * pool_s, :]

        # conv2 + residual add (+ fused shortcut max-pool), dropout = identity
        w2, b2 = _prep_conv(blk["conv2"], None, CP, CP)
        out = conv_block(y, w2, b2, stride=1, residual=shortcut, pool_s=pool_s)

    # head: feature_bn + relu + mean(L) + linear + sigmoid + linear + softmax
    fs, ft = _prep_bn(params["feature_bn"], CP)
    fl, fd = params["feature_layer"], params["final_dense"]
    FP, CLSP = _rup(fl["w"].shape[1]), _rup(fd["w"].shape[1])
    w1 = jnp.zeros((CP, FP), jnp.float32).at[:fl["w"].shape[0], :fl["w"].shape[1]].set(fl["w"])
    b1 = jnp.zeros((FP,), jnp.float32).at[:fl["b"].shape[0]].set(fl["b"])
    w2 = jnp.zeros((FP, CLSP), jnp.float32).at[:fd["w"].shape[0], :fd["w"].shape[1]].set(fd["w"])
    b2 = jnp.zeros((CLSP,), jnp.float32).at[:fd["b"].shape[0]].set(fd["b"])
    return head(out, fs, ft, w1, b1, w2, b2, n_classes=fd["w"].shape[1])


if __name__ == "__main__":
    key = jax.random.PRNGKey(0)
    kx, kp = jax.random.split(key)

    # Small config: in_channels=4, base_filters=8, kernel_size=3, stride=2,
    # groups=1, n_block=4, n_classes=4, num_features=32; input (2, 4, 16).
    N, C_IN, L = 2, 4, 16
    x = jax.random.normal(kx, (N, C_IN, L), jnp.float32)
    params = init_resnet_params(kp, in_channels=C_IN, base_filters=8, kernel_size=3,
                                stride=2, n_block=4, n_classes=4, num_features=32)

    out = jax.jit(lambda xx: resnet_forward(params, xx))(x)
    out = jax.block_until_ready(out)

    assert out.shape == (N, 4), out.shape
    assert bool(jnp.all(jnp.isfinite(out)))
    assert bool(jnp.allclose(jnp.sum(out, axis=1), 1.0, atol=1e-4))
    print("KERNEL_OK")
</pallas_src>

<mosaic_0001>
module attributes {stable_mosaic.version = 11 : i64} {
  func.func @_conv_block_kernel(%arg0: i32, %arg1: memref<1x18x128xf32, #tpu.memory_space<vmem>>, %arg2: memref<3x128x128xf32, #tpu.memory_space<vmem>>, %arg3: memref<1x128xf32, #tpu.memory_space<vmem>>, %arg4: memref<1x16x128xf32, #tpu.memory_space<vmem>>) attributes {dimension_semantics = [#tpu.dimension_semantics<parallel>], iteration_bounds = array<i64: 2>, scalar_prefetch = 0 : i64, scratch_operands = 0 : i64, tpu.core_type = #tpu.core_type<tc>, window_params = [{transform_indices = @transform_0, window_bounds = array<i64: 1, 18, 128>}, {pipeline_mode = #tpu.pipeline_mode<synchronous>, transform_indices = @transform_1, window_bounds = array<i64: 3, 128, 128>}, {pipeline_mode = #tpu.pipeline_mode<synchronous>, transform_indices = @transform_2, window_bounds = array<i64: 1, 128>}, {transform_indices = @transform_3, window_bounds = array<i64: 1, 16, 128>}]} {
    %cst = arith.constant 0.000000e+00 : f32
    %0 = vector.broadcast %cst : f32 to vector<16x128xf32>
    %c0 = arith.constant 0 : index
    %c0_0 = arith.constant 0 : index
    %c0_1 = arith.constant 0 : index
    %1 = vector.load %arg1[%c0, %c0_0, %c0_1] : memref<1x18x128xf32, #tpu.memory_space<vmem>>, vector<1x16x128xf32>
    %2 = vector.shape_cast %1 : vector<1x16x128xf32> to vector<16x128xf32>
    %c0_2 = arith.constant 0 : index
    %c0_3 = arith.constant 0 : index
    %c0_4 = arith.constant 0 : index
    %3 = vector.load %arg2[%c0_2, %c0_3, %c0_4] : memref<3x128x128xf32, #tpu.memory_space<vmem>>, vector<1x128x128xf32>
    %4 = vector.shape_cast %3 : vector<1x128x128xf32> to vector<128x128xf32>
    %cst_5 = arith.constant dense<0.000000e+00> : vector<16x128xf32>
    %5 = tpu.matmul %2, %4, %cst_5 {dimension_numbers = #tpu.dot_dimension_numbers<[1], [0], [0], [1], [0, 0, 1, 1], [], []>} : vector<16x128xf32>, vector<128x128xf32>, vector<16x128xf32> -> vector<16x128xf32>
    %6 = arith.addf %0, %5 : vector<16x128xf32>
    %c0_6 = arith.constant 0 : index
    %c1 = arith.constant 1 : index
    %c0_7 = arith.constant 0 : index
    %7 = vector.load %arg1[%c0_6, %c1, %c0_7] : memref<1x18x128xf32, #tpu.memory_space<vmem>>, vector<1x16x128xf32>
    %8 = vector.shape_cast %7 : vector<1x16x128xf32> to vector<16x128xf32>
    %c1_8 = arith.constant 1 : index
    %c0_9 = arith.constant 0 : index
    %c0_10 = arith.constant 0 : index
    %9 = vector.load %arg2[%c1_8, %c0_9, %c0_10] : memref<3x128x128xf32, #tpu.memory_space<vmem>>, vector<1x128x128xf32>
    %10 = vector.shape_cast %9 : vector<1x128x128xf32> to vector<128x128xf32>
    %cst_11 = arith.constant dense<0.000000e+00> : vector<16x128xf32>
    %11 = tpu.matmul %8, %10, %cst_11 {dimension_numbers = #tpu.dot_dimension_numbers<[1], [0], [0], [1], [0, 0, 1, 1], [], []>} : vector<16x128xf32>, vector<128x128xf32>, vector<16x128xf32> -> vector<16x128xf32>
    %12 = arith.addf %6, %11 : vector<16x128xf32>
    %c0_12 = arith.constant 0 : index
    %c2 = arith.constant 2 : index
    %c0_13 = arith.constant 0 : index
    %13 = vector.load %arg1[%c0_12, %c2, %c0_13] : memref<1x18x128xf32, #tpu.memory_space<vmem>>, vector<1x16x128xf32>
    %14 = vector.shape_cast %13 : vector<1x16x128xf32> to vector<16x128xf32>
    %c2_14 = arith.constant 2 : index
    %c0_15 = arith.constant 0 : index
    %c0_16 = arith.constant 0 : index
    %15 = vector.load %arg2[%c2_14, %c0_15, %c0_16] : memref<3x128x128xf32, #tpu.memory_space<vmem>>, vector<1x128x128xf32>
    %16 = vector.shape_cast %15 : vector<1x128x128xf32> to vector<128x128xf32>
    %cst_17 = arith.constant dense<0.000000e+00> : vector<16x128xf32>
    %17 = tpu.matmul %14, %16, %cst_17 {dimension_numbers = #tpu.dot_dimension_numbers<[1], [0], [0], [1], [0, 0, 1, 1], [], []>} : vector<16x128xf32>, vector<128x128xf32>, vector<16x128xf32> -> vector<16x128xf32>
    %18 = arith.addf %12, %17 : vector<16x128xf32>
    %c0_18 = arith.constant 0 : index
    %c0_19 = arith.constant 0 : index
    %19 = vector.load %arg3[%c0_18, %c0_19] : memref<1x128xf32, #tpu.memory_space<vmem>>, vector<1x128xf32>
    %20 = vector.broadcast %19 : vector<1x128xf32> to vector<16x128xf32>
    %21 = arith.addf %18, %20 : vector<16x128xf32>
    %cst_20 = arith.constant 0.000000e+00 : f32
    %22 = vector.broadcast %cst_20 : f32 to vector<16x128xf32>
    %23 = arith.maximumf %21, %22 : vector<16x128xf32>
    %c0_21 = arith.constant 0 : index
    %c0_22 = arith.constant 0 : index
    %c0_23 = arith.constant 0 : index
    %24 = vector.load %arg4[%c0_21, %c0_22, %c0_23] : memref<1x16x128xf32, #tpu.memory_space<vmem>>, vector<1x16x128xf32>
    %25 = vector.shape_cast %24 : vector<1x16x128xf32> to vector<16x128xf32>
    %26 = vector.shape_cast %23 : vector<16x128xf32> to vector<1x16x128xf32>
    tpu.vector_store %arg4[%c0_21, %c0_22, %c0_23], %26 {strides = array<i32>} : memref<1x16x128xf32, #tpu.memory_space<vmem>>, vector<1x16x128xf32>,
    return
  }
  func.func @transform_0(%arg0: i32) -> (i32, i32, i32) {
    %c0_i32 = arith.constant 0 : i32
    %c0_i32_0 = arith.constant 0 : i32
    %c0_i32_1 = arith.constant 0 : i32
    return %arg0, %c0_i32, %c0_i32_0 : i32, i32, i32
  }
  func.func @transform_1(%arg0: i32) -> (i32, i32, i32) {
    %c0_i32 = arith.constant 0 : i32
    %c0_i32_0 = arith.constant 0 : i32
    %c0_i32_1 = arith.constant 0 : i32
    %c0_i32_2 = arith.constant 0 : i32
    return %c0_i32, %c0_i32_0, %c0_i32_1 : i32, i32, i32
  }
  func.func @transform_2(%arg0: i32) -> (i32, i32) {
    %c0_i32 = arith.constant 0 : i32
    %c0_i32_0 = arith.constant 0 : i32
    %c0_i32_1 = arith.constant 0 : i32
    return %c0_i32, %c0_i32_0 : i32, i32
  }
  func.func @transform_3(%arg0: i32) -> (i32, i32, i32) {
    %c0_i32 = arith.constant 0 : i32
    %c0_i32_0 = arith.constant 0 : i32
    %c0_i32_1 = arith.constant 0 : i32
    return %arg0, %c0_i32, %c0_i32_0 : i32, i32, i32
  }
}

module attributes {stable_mosaic.version = 11 : i64} {
  func.func @_conv_block_kernel(%arg0: i32, %arg1: memref<1x18x128xf32, #tpu.memory_space<vmem>>, %arg2: memref<3x128x128xf32, #tpu.memory_space<vmem>>, %arg3: memref<1x128xf32, #tpu.memory_space<vmem>>, %arg4: memref<1x16x128xf32, #tpu.memory_space<vmem>>) attributes {dimension_semantics = [#tpu.dimension_semantics<parallel>], iteration_bounds = array<i64: 2>, scalar_prefetch = 0 : i64, scratch_operands = 0 : i64, tpu.core_type = #tpu.core_type<tc>, window_params = [{transform_indices = @transform_0, window_bounds = array<i64: 1, 18, 128>}, {pipeline_mode = #tpu.pipeline_mode<synchronous>, transform_indices = @transform_1, window_bounds = array<i64: 3, 128, 128>}, {pipeline_mode = #tpu.pipeline_mode<synchronous>, transform_indices = @transform_2, window_bounds = array<i64: 1, 128>}, {transform_indices = @transform_3, window_bounds = array<i64: 1, 16, 128>}]} {
    %cst = arith.constant 0.000000e+00 : f32
    %0 = vector.broadcast %cst : f32 to vector<16x128xf32>
    %c0 = arith.constant 0 : index
    %c0_0 = arith.constant 0 : index
    %c0_1 = arith.constant 0 : index
    %1 = vector.load %arg1[%c0, %c0_0, %c0_1] : memref<1x18x128xf32, #tpu.memory_space<vmem>>, vector<1x16x128xf32>
    %2 = vector.shape_cast %1 : vector<1x16x128xf32> to vector<16x128xf32>
    %c0_2 = arith.constant 0 : index
    %c0_3 = arith.constant 0 : index
    %c0_4 = arith.constant 0 : index
    %3 = vector.load %arg2[%c0_2, %c0_3, %c0_4] : memref<3x128x128xf32, #tpu.memory_space<vmem>>, vector<1x128x128xf32>
    %4 = vector.shape_cast %3 : vector<1x128x128xf32> to vector<128x128xf32>
    %cst_5 = arith.constant dense<0.000000e+00> : vector<16x128xf32>
    %5 = tpu.matmul %2, %4, %cst_5 {dimension_numbers = #tpu.dot_dimension_numbers<[1], [0], [0], [1], [0, 0, 1, 1], [], []>} : vector<16x128xf32>, vector<128x128xf32>, vector<16x128xf32> -> vector<16x128xf32>
    %6 = arith.addf %0, %5 : vector<16x128xf32>
    %c0_6 = arith.constant 0 : index
    %c1 = arith.constant 1 : index
    %c0_7 = arith.constant 0 : index
    %7 = vector.load %arg1[%c0_6, %c1, %c0_7] : memref<1x18x128xf32, #tpu.memory_space<vmem>>, vector<1x16x128xf32>
    %8 = vector.shape_cast %7 : vector<1x16x128xf32> to vector<16x128xf32>
    %c1_8 = arith.constant 1 : index
    %c0_9 = arith.constant 0 : index
    %c0_10 = arith.constant 0 : index
    %9 = vector.load %arg2[%c1_8, %c0_9, %c0_10] : memref<3x128x128xf32, #tpu.memory_space<vmem>>, vector<1x128x128xf32>
    %10 = vector.shape_cast %9 : vector<1x128x128xf32> to vector<128x128xf32>
    %cst_11 = arith.constant dense<0.000000e+00> : vector<16x128xf32>
    %11 = tpu.matmul %8, %10, %cst_11 {dimension_numbers = #tpu.dot_dimension_numbers<[1], [0], [0], [1], [0, 0, 1, 1], [], []>} : vector<16x128xf32>, vector<128x128xf32>, vector<16x128xf32> -> vector<16x128xf32>
    %12 = arith.addf %6, %11 : vector<16x128xf32>
    %c0_12 = arith.constant 0 : index
    %c2 = arith.constant 2 : index
    %c0_13 = arith.constant 0 : index
    %13 = vector.load %arg1[%c0_12, %c2, %c0_13] : memref<1x18x128xf32, #tpu.memory_space<vmem>>, vector<1x16x128xf32>
    %14 = vector.shape_cast %13 : vector<1x16x128xf32> to vector<16x128xf32>
    %c2_14 = arith.constant 2 : index
    %c0_15 = arith.constant 0 : index
    %c0_16 = arith.constant 0 : index
    %15 = vector.load %arg2[%c2_14, %c0_15, %c0_16] : memref<3x128x128xf32, #tpu.memory_space<vmem>>, vector<1x128x128xf32>
    %16 = vector.shape_cast %15 : vector<1x128x128xf32> to vector<128x128xf32>
    %cst_17 = arith.constant dense<0.000000e+00> : vector<16x128xf32>
    %17 = tpu.matmul %14, %16, %cst_17 {dimension_numbers = #tpu.dot_dimension_numbers<[1], [0], [0], [1], [0, 0, 1, 1], [], []>} : vector<16x128xf32>, vector<128x128xf32>, vector<16x128xf32> -> vector<16x128xf32>
    %18 = arith.addf %12, %17 : vector<16x128xf32>
    %c0_18 = arith.constant 0 : index
    %c0_19 = arith.constant 0 : index
    %19 = vector.load %arg3[%c0_18, %c0_19] : memref<1x128xf32, #tpu.memory_space<vmem>>, vector<1x128xf32>
    %20 = vector.broadcast %19 : vector<1x128xf32> to vector<16x128xf32>
    %21 = arith.addf %18, %20 : vector<16x128xf32>
    %cst_20 = arith.constant 0.000000e+00 : f32
    %22 = vector.broadcast %cst_20 : f32 to vector<16x128xf32>
    %23 = arith.maximumf %21, %22 : vector<16x128xf32>
    %c0_21 = arith.constant 0 : index
    %c0_22 = arith.constant 0 : index
    %c0_23 = arith.constant 0 : index
    %24 = vector.load %arg4[%c0_21, %c0_22, %c0_23] : memref<1x16x128xf32, #tpu.memory_space<vmem>>, vector<1x16x128xf32>
    %25 = vector.shape_cast %24 : vector<1x16x128xf32> to vector<16x128xf32>
    %26 = vector.shape_cast %23 : vector<16x128xf32> to vector<1x16x128xf32>
    tpu.vector_store %arg4[%c0_21, %c0_22, %c0_23], %26 {strides = array<i32>} : memref<1x16x128xf32, #tpu.memory_space<vmem>>, vector<1x16x128xf32>,
    return
  }
  func.func @transform_0(%arg0: i32) -> (i32, i32, i32) {
    %c0_i32 = arith.constant 0 : i32
    %c0_i32_0 = arith.constant 0 : i32
    %c0_i32_1 = arith.constant 0 : i32
    return %arg0, %c0_i32, %c0_i32_0 : i32, i32, i32
  }
  func.func @transform_1(%arg0: i32) -> (i32, i32, i32) {
    %c0_i32 = arith.constant 0 : i32
    %c0_i32_0 = arith.constant 0 : i32
    %c0_i32_1 = arith.constant 0 : i32
    %c0_i32_2 = arith.constant 0 : i32
    return %c0_i32, %c0_i32_0, %c0_i32_1 : i32, i32, i32
  }
  func.func @transform_2(%arg0: i32) -> (i32, i32) {
    %c0_i32 = arith.constant 0 : i32
    %c0_i32_0 = arith.constant 0 : i32
    %c0_i32_1 = arith.constant 0 : i32
    return %c0_i32, %c0_i32_0 : i32, i32
  }
  func.func @transform_3(%arg0: i32) -> (i32, i32, i32) {
    %c0_i32 = arith.constant 0 : i32
    %c0_i32_0 = arith.constant 0 : i32
    %c0_i32_1 = arith.constant 0 : i32
    return %arg0, %c0_i32, %c0_i32_0 : i32, i32, i32
  }
}

module attributes {stable_mosaic.version = 11 : i64} {
  func.func @_conv_block_kernel(%arg0: i32, %arg1: memref<1x17x128xf32, #tpu.memory_space<vmem>>, %arg2: memref<3x128x128xf32, #tpu.memory_space<vmem>>, %arg3: memref<1x128xf32, #tpu.memory_space<vmem>>, %arg4: memref<1x128xf32, #tpu.memory_space<vmem>>, %arg5: memref<1x128xf32, #tpu.memory_space<vmem>>, %arg6: memref<1x8x128xf32, #tpu.memory_space<vmem>>) attributes {dimension_semantics = [#tpu.dimension_semantics<parallel>], iteration_bounds = array<i64: 2>, scalar_prefetch = 0 : i64, scratch_operands = 0 : i64, tpu.core_type = #tpu.core_type<tc>, window_params = [{transform_indices = @transform_0, window_bounds = array<i64: 1, 17, 128>}, {pipeline_mode = #tpu.pipeline_mode<synchronous>, transform_indices = @transform_1, window_bounds = array<i64: 3, 128, 128>}, {pipeline_mode = #tpu.pipeline_mode<synchronous>, transform_indices = @transform_2, window_bounds = array<i64: 1, 128>}, {pipeline_mode = #tpu.pipeline_mode<synchronous>, transform_indices = @transform_3, window_bounds = array<i64: 1, 128>}, {pipeline_mode = #tpu.pipeline_mode<synchronous>, transform_indices = @transform_4, window_bounds = array<i64: 1, 128>}, {transform_indices = @transform_5, window_bounds = array<i64: 1, 8, 128>}]} {
    %c0 = arith.constant 0 : index
    %c0_0 = arith.constant 0 : index
    %0 = vector.load %arg4[%c0, %c0_0] : memref<1x128xf32, #tpu.memory_space<vmem>>, vector<1x128xf32>
    %c0_1 = arith.constant 0 : index
    %c0_2 = arith.constant 0 : index
    %1 = vector.load %arg5[%c0_1, %c0_2] : memref<1x128xf32, #tpu.memory_space<vmem>>, vector<1x128xf32>
    %2 = tpu.iota {dimensions = array<i32: 0>} : vector<8x128xi32>
    %c2_i32 = arith.constant 2 : i32
    %3 = vector.broadcast %c2_i32 : i32 to vector<8x128xi32>
    %4 = arith.muli %2, %3 : vector<8x128xi32>
    %cst = arith.constant 0.000000e+00 : f32
    %5 = vector.broadcast %cst : f32 to vector<8x128xf32>
    %c0_3 = arith.constant 0 : index
    %c0_4 = arith.constant 0 : index
    %c0_5 = arith.constant 0 : index
    %6 = tpu.strided_load %arg1[%c0_3, %c0_4, %c0_5] {strides = array<i32: 1, 2, 1>} : memref<1x17x128xf32, #tpu.memory_space<vmem>>, vector<1x8x128xf32>
    %7 = vector.shape_cast %6 : vector<1x8x128xf32> to vector<8x128xf32>
    %8 = vector.broadcast %0 : vector<1x128xf32> to vector<8x128xf32>
    %9 = arith.mulf %7, %8 : vector<8x128xf32>
    %10 = vector.broadcast %1 : vector<1x128xf32> to vector<8x128xf32>
    %11 = arith.addf %9, %10 : vector<8x128xf32>
    %cst_6 = arith.constant 0.000000e+00 : f32
    %12 = vector.broadcast %cst_6 : f32 to vector<8x128xf32>
    %13 = arith.maximumf %11, %12 : vector<8x128xf32>
    %c0_i32 = arith.constant 0 : i32
    %14 = vector.broadcast %c0_i32 : i32 to vector<8x128xi32>
    %15 = arith.addi %4, %14 : vector<8x128xi32>
    %c0_i32_7 = arith.constant 0 : i32
    %16 = vector.broadcast %c0_i32_7 : i32 to vector<8x128xi32>
    %17 = arith.cmpi sge, %15, %16 : vector<8x128xi32>
    %c16_i32 = arith.constant 16 : i32
    %18 = vector.broadcast %c16_i32 : i32 to vector<8x128xi32>
    %19 = arith.cmpi slt, %15, %18 : vector<8x128xi32>
    %20 = arith.andi %17, %19 : vector<8x128xi1>
    %cst_8 = arith.constant 0.000000e+00 : f32
    %21 = vector.broadcast %cst_8 : f32 to vector<8x128xf32>
    %22 = arith.select %20, %13, %21 : vector<8x128xi1>, vector<8x128xf32>
    %c0_9 = arith.constant 0 : index
    %c0_10 = arith.constant 0 : index
    %c0_11 = arith.constant 0 : index
    %23 = vector.load %arg2[%c0_9, %c0_10, %c0_11] : memref<3x128x128xf32, #tpu.memory_space<vmem>>, vector<1x128x128xf32>
    %24 = vector.shape_cast %23 : vector<1x128x128xf32> to vector<128x128xf32>
    %cst_12 = arith.constant dense<0.000000e+00> : vector<8x128xf32>
    %25 = tpu.matmul %22, %24, %cst_12 {dimension_numbers = #tpu.dot_dimension_numbers<[1], [0], [0], [1], [0, 0, 1, 1], [], []>} : vector<8x128xf32>, vector<128x128xf32>, vector<8x128xf32> -> vector<8x128xf32>
    %26 = arith.addf %5, %25 : vector<8x128xf32>
    %c0_13 = arith.constant 0 : index
    %c1 = arith.constant 1 : index
    %c0_14 = arith.constant 0 : index
    %27 = tpu.strided_load %arg1[%c0_13, %c1, %c0_14] {strides = array<i32: 1, 2, 1>} : memref<1x17x128xf32, #tpu.memory_space<vmem>>, vector<1x8x128xf32>
    %28 = vector.shape_cast %27 : vector<1x8x128xf32> to vector<8x128xf32>
    %29 = vector.broadcast %0 : vector<1x128xf32> to vector<8x128xf32>
    %30 = arith.mulf %28, %29 : vector<8x128xf32>
    %31 = vector.broadcast %1 : vector<1x128xf32> to vector<8x128xf32>
    %32 = arith.addf %30, %31 : vector<8x128xf32>
    %cst_15 = arith.constant 0.000000e+00 : f32
    %33 = vector.broadcast %cst_15 : f32 to vector<8x128xf32>
    %34 = arith.maximumf %32, %33 : vector<8x128xf32>
    %c1_i32 = arith.constant 1 : i32
    %35 = vector.broadcast %c1_i32 : i32 to vector<8x128xi32>
    %36 = arith.addi %4, %35 : vector<8x128xi32>
    %c0_i32_16 = arith.constant 0 : i32
    %37 = vector.broadcast %c0_i32_16 : i32 to vector<8x128xi32>
    %38 = arith.cmpi sge, %36, %37 : vector<8x128xi32>
    %c16_i32_17 = arith.constant 16 : i32
    %39 = vector.broadcast %c16_i32_17 : i32 to vector<8x128xi32>
    %40 = arith.cmpi slt, %36, %39 : vector<8x128xi32>
    %41 = arith.andi %38, %40 : vector<8x128xi1>
    %cst_18 = arith.constant 0.000000e+00 : f32
    %42 = vector.broadcast %cst_18 : f32 to vector<8x128xf32>
    %43 = arith.select %41, %34, %42 : vector<8x128xi1>, vector<8x128xf32>
    %c1_19 = arith.constant 1 : index
    %c0_20 = arith.constant 0 : index
    %c0_21 = arith.constant 0 : index
    %44 = vector.load %arg2[%c1_19, %c0_20, %c0_21] : memref<3x128x128xf32, #tpu.memory_space<vmem>>, vector<1x128x128xf32>
    %45 = vector.shape_cast %44 : vector<1x128x128xf32> to vector<128x128xf32>
    %cst_22 = arith.constant dense<0.000000e+00> : vector<8x128xf32>
    %46 = tpu.matmul %43, %45, %cst_22 {dimension_numbers = #tpu.dot_dimension_numbers<[1], [0], [0], [1], [0, 0, 1, 1], [], []>} : vector<8x128xf32>, vector<128x128xf32>, vector<8x128xf32> -> vector<8x128xf32>
    %47 = arith.addf %26, %46 : vector<8x128xf32>
    %c0_23 = arith.constant 0 : index
    %c2 = arith.constant 2 : index
    %c0_24 = arith.constant 0 : index
    %48 = tpu.strided_load %arg1[%c0_23, %c2, %c0_24] {strides = array<i32: 1, 2, 1>} : memref<1x17x128xf32, #tpu.memory_space<vmem>>, vector<1x8x128xf32>
    %49 = vector.shape_cast %48 : vector<1x8x128xf32> to vector<8x128xf32>
    %50 = vector.broadcast %0 : vector<1x128xf32> to vector<8x128xf32>
    %51 = arith.mulf %49, %50 : vector<8x128xf32>
    %52 = vector.broadcast %1 : vector<1x128xf32> to vector<8x128xf32>
    %53 = arith.addf %51, %52 : vector<8x128xf32>
    %cst_25 = arith.constant 0.000000e+00 : f32
    %54 = vector.broadcast %cst_25 : f32 to vector<8x128xf32>
    %55 = arith.maximumf %53, %54 : vector<8x128xf32>
    %c2_i32_26 = arith.constant 2 : i32
    %56 = vector.broadcast %c2_i32_26 : i32 to vector<8x128xi32>
    %57 = arith.addi %4, %56 : vector<8x128xi32>
    %c0_i32_27 = arith.constant 0 : i32
    %58 = vector.broadcast %c0_i32_27 : i32 to vector<8x128xi32>
    %59 = arith.cmpi sge, %57, %58 : vector<8x128xi32>
    %c16_i32_28 = arith.constant 16 : i32
    %60 = vector.broadcast %c16_i32_28 : i32 to vector<8x128xi32>
    %61 = arith.cmpi slt, %57, %60 : vector<8x128xi32>
    %62 = arith.andi %59, %61 : vector<8x128xi1>
    %cst_29 = arith.constant 0.000000e+00 : f32
    %63 = vector.broadcast %cst_29 : f32 to vector<8x128xf32>
    %64 = arith.select %62, %55, %63 : vector<8x128xi1>, vector<8x128xf32>
    %c2_30 = arith.constant 2 : index
    %c0_31 = arith.constant 0 : index
    %c0_32 = arith.constant 0 : index
    %65 = vector.load %arg2[%c2_30, %c0_31, %c0_32] : memref<3x128x128xf32, #tpu.memory_space<vmem>>, vector<1x128x128xf32>
    %66 = vector.shape_cast %65 : vector<1x128x128xf32> to vector<128x128xf32>
    %cst_33 = arith.constant dense<0.000000e+00> : vector<8x128xf32>
    %67 = tpu.matmul %64, %66, %cst_33 {dimension_numbers = #tpu.dot_dimension_numbers<[1], [0], [0], [1], [0, 0, 1, 1], [], []>} : vector<8x128xf32>, vector<128x128xf32>, vector<8x128xf32> -> vector<8x128xf32>
    %68 = arith.addf %47, %67 : vector<8x128xf32>
    %c0_34 = arith.constant 0 : index
    %c0_35 = arith.constant 0 : index
    %69 = vector.load %arg3[%c0_34, %c0_35] : memref<1x128xf32, #tpu.memory_space<vmem>>, vector<1x128xf32>
    %70 = vector.broadcast %69 : vector<1x128xf32> to vector<8x128xf32>
    %71 = arith.addf %68, %70 : vector<8x128xf32>
    %cst_36 = arith.constant 0.000000e+00 : f32
    %72 = vector.broadcast %cst_36 : f32 to vector<8x128xf32>
    %73 = arith.maximumf %71, %72 : vector<8x128xf32>
    %c0_37 = arith.constant 0 : index
    %c0_38 = arith.constant 0 : index
    %c0_39 = arith.constant 0 : index
    %74 = vector.load %arg6[%c0_37, %c0_38, %c0_39] : memref<1x8x128xf32, #tpu.memory_space<vmem>>, vector<1x8x128xf32>
    %75 = vector.shape_cast %74 : vector<1x8x128xf32> to vector<8x128xf32>
    %76 = vector.shape_cast %73 : vector<8x128xf32> to vector<1x8x128xf32>
    tpu.vector_store %arg6[%c0_37, %c0_38, %c0_39], %76 {strides = array<i32>} : memref<1x8x128xf32, #tpu.memory_space<vmem>>, vector<1x8x128xf32>,
    return
  }
  func.func @transform_0(%arg0: i32) -> (i32, i32, i32) {
    %c0_i32 = arith.constant 0 : i32
    %c0_i32_0 = arith.constant 0 : i32
    %c0_i32_1 = arith.constant 0 : i32
    return %arg0, %c0_i32, %c0_i32_0 : i32, i32, i32
  }
  func.func @transform_1(%arg0: i32) -> (i32, i32, i32) {
    %c0_i32 = arith.constant 0 : i32
    %c0_i32_0 = arith.constant 0 : i32
    %c0_i32_1 = arith.constant 0 : i32
    %c0_i32_2 = arith.constant 0 : i32
    return %c0_i32, %c0_i32_0, %c0_i32_1 : i32, i32, i32
  }
  func.func @transform_2(%arg0: i32) -> (i32, i32) {
    %c0_i32 = arith.constant 0 : i32
    %c0_i32_0 = arith.constant 0 : i32
    %c0_i32_1 = arith.constant 0 : i32
    return %c0_i32, %c0_i32_0 : i32, i32
  }
  func.func @transform_3(%arg0: i32) -> (i32, i32) {
    %c0_i32 = arith.constant 0 : i32
    %c0_i32_0 = arith.constant 0 : i32
    %c0_i32_1 = arith.constant 0 : i32
    return %c0_i32, %c0_i32_0 : i32, i32
  }
  func.func @transform_4(%arg0: i32) -> (i32, i32) {
    %c0_i32 = arith.constant 0 : i32
    %c0_i32_0 = arith.constant 0 : i32
    %c0_i32_1 = arith.constant 0 : i32
    return %c0_i32, %c0_i32_0 : i32, i32
  }
  func.func @transform_5(%arg0: i32) -> (i32, i32, i32) {
    %c0_i32 = arith.constant 0 : i32
    %c0_i32_0 = arith.constant 0 : i32
    %c0_i32_1 = arith.constant 0 : i32
    return %arg0, %c0_i32, %c0_i32_0 : i32, i32, i32
  }
}

module attributes {stable_mosaic.version = 11 : i64} {
  func.func @_conv_block_kernel(%arg0: i32, %arg1: memref<1x18x128xf32, #tpu.memory_space<vmem>>, %arg2: memref<3x128x128xf32, #tpu.memory_space<vmem>>, %arg3: memref<1x128xf32, #tpu.memory_space<vmem>>, %arg4: memref<1x16x128xf32, #tpu.memory_space<vmem>>, %arg5: memref<1x16x128xf32, #tpu.memory_space<vmem>>) attributes {dimension_semantics = [#tpu.dimension_semantics<parallel>], iteration_bounds = array<i64: 2>, scalar_prefetch = 0 : i64, scratch_operands = 0 : i64, tpu.core_type = #tpu.core_type<tc>, window_params = [{transform_indices = @transform_0, window_bounds = array<i64: 1, 18, 128>}, {pipeline_mode = #tpu.pipeline_mode<synchronous>, transform_indices = @transform_1, window_bounds = array<i64: 3, 128, 128>}, {pipeline_mode = #tpu.pipeline_mode<synchronous>, transform_indices = @transform_2, window_bounds = array<i64: 1, 128>}, {transform_indices = @transform_3, window_bounds = array<i64: 1, 16, 128>}, {transform_indices = @transform_4, window_bounds = array<i64: 1, 16, 128>}]} {
    %cst = arith.constant 0.000000e+00 : f32
    %0 = vector.broadcast %cst : f32 to vector<16x128xf32>
    %c0 = arith.constant 0 : index
    %c0_0 = arith.constant 0 : index
    %c0_1 = arith.constant 0 : index
    %1 = vector.load %arg1[%c0, %c0_0, %c0_1] : memref<1x18x128xf32, #tpu.memory_space<vmem>>, vector<1x16x128xf32>
    %2 = vector.shape_cast %1 : vector<1x16x128xf32> to vector<16x128xf32>
    %c0_2 = arith.constant 0 : index
    %c0_3 = arith.constant 0 : index
    %c0_4 = arith.constant 0 : index
    %3 = vector.load %arg2[%c0_2, %c0_3, %c0_4] : memref<3x128x128xf32, #tpu.memory_space<vmem>>, vector<1x128x128xf32>
    %4 = vector.shape_cast %3 : vector<1x128x128xf32> to vector<128x128xf32>
    %cst_5 = arith.constant dense<0.000000e+00> : vector<16x128xf32>
    %5 = tpu.matmul %2, %4, %cst_5 {dimension_numbers = #tpu.dot_dimension_numbers<[1], [0], [0], [1], [0, 0, 1, 1], [], []>} : vector<16x128xf32>, vector<128x128xf32>, vector<16x128xf32> -> vector<16x128xf32>
    %6 = arith.addf %0, %5 : vector<16x128xf32>
    %c0_6 = arith.constant 0 : index
    %c1 = arith.constant 1 : index
    %c0_7 = arith.constant 0 : index
    %7 = vector.load %arg1[%c0_6, %c1, %c0_7] : memref<1x18x128xf32, #tpu.memory_space<vmem>>, vector<1x16x128xf32>
    %8 = vector.shape_cast %7 : vector<1x16x128xf32> to vector<16x128xf32>
    %c1_8 = arith.constant 1 : index
    %c0_9 = arith.constant 0 : index
    %c0_10 = arith.constant 0 : index
    %9 = vector.load %arg2[%c1_8, %c0_9, %c0_10] : memref<3x128x128xf32, #tpu.memory_space<vmem>>, vector<1x128x128xf32>
    %10 = vector.shape_cast %9 : vector<1x128x128xf32> to vector<128x128xf32>
    %cst_11 = arith.constant dense<0.000000e+00> : vector<16x128xf32>
    %11 = tpu.matmul %8, %10, %cst_11 {dimension_numbers = #tpu.dot_dimension_numbers<[1], [0], [0], [1], [0, 0, 1, 1], [], []>} : vector<16x128xf32>, vector<128x128xf32>, vector<16x128xf32> -> vector<16x128xf32>
    %12 = arith.addf %6, %11 : vector<16x128xf32>
    %c0_12 = arith.constant 0 : index
    %c2 = arith.constant 2 : index
    %c0_13 = arith.constant 0 : index
    %13 = vector.load %arg1[%c0_12, %c2, %c0_13] : memref<1x18x128xf32, #tpu.memory_space<vmem>>, vector<1x16x128xf32>
    %14 = vector.shape_cast %13 : vector<1x16x128xf32> to vector<16x128xf32>
    %c2_14 = arith.constant 2 : index
    %c0_15 = arith.constant 0 : index
    %c0_16 = arith.constant 0 : index
    %15 = vector.load %arg2[%c2_14, %c0_15, %c0_16] : memref<3x128x128xf32, #tpu.memory_space<vmem>>, vector<1x128x128xf32>
    %16 = vector.shape_cast %15 : vector<1x128x128xf32> to vector<128x128xf32>
    %cst_17 = arith.constant dense<0.000000e+00> : vector<16x128xf32>
    %17 = tpu.matmul %14, %16, %cst_17 {dimension_numbers = #tpu.dot_dimension_numbers<[1], [0], [0], [1], [0, 0, 1, 1], [], []>} : vector<16x128xf32>, vector<128x128xf32>, vector<16x128xf32> -> vector<16x128xf32>
    %18 = arith.addf %12, %17 : vector<16x128xf32>
    %c0_18 = arith.constant 0 : index
    %c0_19 = arith.constant 0 : index
    %19 = vector.load %arg3[%c0_18, %c0_19] : memref<1x128xf32, #tpu.memory_space<vmem>>, vector<1x128xf32>
    %20 = vector.broadcast %19 : vector<1x128xf32> to vector<16x128xf32>
    %21 = arith.addf %18, %20 : vector<16x128xf32>
    %c0_20 = arith.constant 0 : index
    %c0_21 = arith.constant 0 : index
    %c0_22 = arith.constant 0 : index
    %22 = vector.load %arg4[%c0_20, %c0_21, %c0_22] : memref<1x16x128xf32, #tpu.memory_space<vmem>>, vector<1x16x128xf32>
    %23 = vector.shape_cast %22 : vector<1x16x128xf32> to vector<16x128xf32>
    %24 = arith.addf %21, %23 : vector<16x128xf32>
    %c0_23 = arith.constant 0 : index
    %c0_24 = arith.constant 0 : index
    %c0_25 = arith.constant 0 : index
    %25 = vector.load %arg5[%c0_23, %c0_24, %c0_25] : memref<1x16x128xf32, #tpu.memory_space<vmem>>, vector<1x16x128xf32>
    %26 = vector.shape_cast %25 : vector<1x16x128xf32> to vector<16x128xf32>
    %27 = vector.shape_cast %24 : vector<16x128xf32> to vector<1x16x128xf32>
    tpu.vector_store %arg5[%c0_23, %c0_24, %c0_25], %27 {strides = array<i32>} : memref<1x16x128xf32, #tpu.memory_space<vmem>>, vector<1x16x128xf32>,
    return
  }
  func.func @transform_0(%arg0: i32) -> (i32, i32, i32) {
    %c0_i32 = arith.constant 0 : i32
    %c0_i32_0 = arith.constant 0 : i32
    %c0_i32_1 = arith.constant 0 : i32
    return %arg0, %c0_i32, %c0_i32_0 : i32, i32, i32
  }
  func.func @transform_1(%arg0: i32) -> (i32, i32, i32) {
    %c0_i32 = arith.constant 0 : i32
    %c0_i32_0 = arith.constant 0 : i32
    %c0_i32_1 = arith.constant 0 : i32
    %c0_i32_2 = arith.constant 0 : i32
    return %c0_i32, %c0_i32_0, %c0_i32_1 : i32, i32, i32
  }
  func.func @transform_2(%arg0: i32) -> (i32, i32) {
    %c0_i32 = arith.constant 0 : i32
    %c0_i32_0 = arith.constant 0 : i32
    %c0_i32_1 = arith.constant 0 : i32
    return %c0_i32, %c0_i32_0 : i32, i32
  }
  func.func @transform_3(%arg0: i32) -> (i32, i32, i32) {
    %c0_i32 = arith.constant 0 : i32
    %c0_i32_0 = arith.constant 0 : i32
    %c0_i32_1 = arith.constant 0 : i32
    return %arg0, %c0_i32, %c0_i32_0 : i32, i32, i32
  }
  func.func @transform_4(%arg0: i32) -> (i32, i32, i32) {
    %c0_i32 = arith.constant 0 : i32
    %c0_i32_0 = arith.constant 0 : i32
    %c0_i32_1 = arith.constant 0 : i32
    return %arg0, %c0_i32, %c0_i32_0 : i32, i32, i32
  }
}

module attributes {stable_mosaic.version = 11 : i64} {
  func.func @_conv_block_kernel(%arg0: i32, %arg1: memref<1x10x128xf32, #tpu.memory_space<vmem>>, %arg2: memref<3x128x128xf32, #tpu.memory_space<vmem>>, %arg3: memref<1x128xf32, #tpu.memory_space<vmem>>, %arg4: memref<1x128xf32, #tpu.memory_space<vmem>>, %arg5: memref<1x128xf32, #tpu.memory_space<vmem>>, %arg6: memref<1x8x128xf32, #tpu.memory_space<vmem>>) attributes {dimension_semantics = [#tpu.dimension_semantics<parallel>], iteration_bounds = array<i64: 2>, scalar_prefetch = 0 : i64, scratch_operands = 0 : i64, tpu.core_type = #tpu.core_type<tc>, window_params = [{transform_indices = @transform_0, window_bounds = array<i64: 1, 10, 128>}, {pipeline_mode = #tpu.pipeline_mode<synchronous>, transform_indices = @transform_1, window_bounds = array<i64: 3, 128, 128>}, {pipeline_mode = #tpu.pipeline_mode<synchronous>, transform_indices = @transform_2, window_bounds = array<i64: 1, 128>}, {pipeline_mode = #tpu.pipeline_mode<synchronous>, transform_indices = @transform_3, window_bounds = array<i64: 1, 128>}, {pipeline_mode = #tpu.pipeline_mode<synchronous>, transform_indices = @transform_4, window_bounds = array<i64: 1, 128>}, {transform_indices = @transform_5, window_bounds = array<i64: 1, 8, 128>}]} {
    %c0 = arith.constant 0 : index
    %c0_0 = arith.constant 0 : index
    %0 = vector.load %arg4[%c0, %c0_0] : memref<1x128xf32, #tpu.memory_space<vmem>>, vector<1x128xf32>
    %c0_1 = arith.constant 0 : index
    %c0_2 = arith.constant 0 : index
    %1 = vector.load %arg5[%c0_1, %c0_2] : memref<1x128xf32, #tpu.memory_space<vmem>>, vector<1x128xf32>
    %2 = tpu.iota {dimensions = array<i32: 0>} : vector<8x128xi32>
    %c1_i32 = arith.constant 1 : i32
    %3 = vector.broadcast %c1_i32 : i32 to vector<8x128xi32>
    %4 = arith.muli %2, %3 : vector<8x128xi32>
    %cst = arith.constant 0.000000e+00 : f32
    %5 = vector.broadcast %cst : f32 to vector<8x128xf32>
    %c0_3 = arith.constant 0 : index
    %c0_4 = arith.constant 0 : index
    %c0_5 = arith.constant 0 : index
    %6 = vector.load %arg1[%c0_3, %c0_4, %c0_5] : memref<1x10x128xf32, #tpu.memory_space<vmem>>, vector<1x8x128xf32>
    %7 = vector.shape_cast %6 : vector<1x8x128xf32> to vector<8x128xf32>
    %8 = vector.broadcast %0 : vector<1x128xf32> to vector<8x128xf32>
    %9 = arith.mulf %7, %8 : vector<8x128xf32>
    %10 = vector.broadcast %1 : vector<1x128xf32> to vector<8x128xf32>
    %11 = arith.addf %9, %10 : vector<8x128xf32>
    %cst_6 = arith.constant 0.000000e+00 : f32
    %12 = vector.broadcast %cst_6 : f32 to vector<8x128xf32>
    %13 = arith.maximumf %11, %12 : vector<8x128xf32>
    %c0_i32 = arith.constant 0 : i32
    %14 = vector.broadcast %c0_i32 : i32 to vector<8x128xi32>
    %15 = arith.addi %4, %14 : vector<8x128xi32>
    %c1_i32_7 = arith.constant 1 : i32
    %16 = vector.broadcast %c1_i32_7 : i32 to vector<8x128xi32>
    %17 = arith.cmpi sge, %15, %16 : vector<8x128xi32>
    %c9_i32 = arith.constant 9 : i32
    %18 = vector.broadcast %c9_i32 : i32 to vector<8x128xi32>
    %19 = arith.cmpi slt, %15, %18 : vector<8x128xi32>
    %20 = arith.andi %17, %19 : vector<8x128xi1>
    %cst_8 = arith.constant 0.000000e+00 : f32
    %21 = vector.broadcast %cst_8 : f32 to vector<8x128xf32>
    %22 = arith.select %20, %13, %21 : vector<8x128xi1>, vector<8x128xf32>
    %c0_9 = arith.constant 0 : index
    %c0_10 = arith.constant 0 : index
    %c0_11 = arith.constant 0 : index
    %23 = vector.load %arg2[%c0_9, %c0_10, %c0_11] : memref<3x128x128xf32, #tpu.memory_space<vmem>>, vector<1x128x128xf32>
    %24 = vector.shape_cast %23 : vector<1x128x128xf32> to vector<128x128xf32>
    %cst_12 = arith.constant dense<0.000000e+00> : vector<8x128xf32>
    %25 = tpu.matmul %22, %24, %cst_12 {dimension_numbers = #tpu.dot_dimension_numbers<[1], [0], [0], [1], [0, 0, 1, 1], [], []>} : vector<8x128xf32>, vector<128x128xf32>, vector<8x128xf32> -> vector<8x128xf32>
    %26 = arith.addf %5, %25 : vector<8x128xf32>
    %c0_13 = arith.constant 0 : index
    %c1 = arith.constant 1 : index
    %c0_14 = arith.constant 0 : index
    %27 = vector.load %arg1[%c0_13, %c1, %c0_14] : memref<1x10x128xf32, #tpu.memory_space<vmem>>, vector<1x8x128xf32>
    %28 = vector.shape_cast %27 : vector<1x8x128xf32> to vector<8x128xf32>
    %29 = vector.broadcast %0 : vector<1x128xf32> to vector<8x128xf32>
    %30 = arith.mulf %28, %29 : vector<8x128xf32>
    %31 = vector.broadcast %1 : vector<1x128xf32> to vector<8x128xf32>
    %32 = arith.addf %30, %31 : vector<8x128xf32>
    %cst_15 = arith.constant 0.000000e+00 : f32
    %33 = vector.broadcast %cst_15 : f32 to vector<8x128xf32>
    %34 = arith.maximumf %32, %33 : vector<8x128xf32>
    %c1_i32_16 = arith.constant 1 : i32
    %35 = vector.broadcast %c1_i32_16 : i32 to vector<8x128xi32>
    %36 = arith.addi %4, %35 : vector<8x128xi32>
    %c1_i32_17 = arith.constant 1 : i32
    %37 = vector.broadcast %c1_i32_17 : i32 to vector<8x128xi32>
    %38 = arith.cmpi sge, %36, %37 : vector<8x128xi32>
    %c9_i32_18 = arith.constant 9 : i32
    %39 = vector.broadcast %c9_i32_18 : i32 to vector<8x128xi32>
    %40 = arith.cmpi slt, %36, %39 : vector<8x128xi32>
    %41 = arith.andi %38, %40 : vector<8x128xi1>
    %cst_19 = arith.constant 0.000000e+00 : f32
    %42 = vector.broadcast %cst_19 : f32 to vector<8x128xf32>
    %43 = arith.select %41, %34, %42 : vector<8x128xi1>, vector<8x128xf32>
    %c1_20 = arith.constant 1 : index
    %c0_21 = arith.constant 0 : index
    %c0_22 = arith.constant 0 : index
    %44 = vector.load %arg2[%c1_20, %c0_21, %c0_22] : memref<3x128x128xf32, #tpu.memory_space<vmem>>, vector<1x128x128xf32>
    %45 = vector.shape_cast %44 : vector<1x128x128xf32> to vector<128x128xf32>
    %cst_23 = arith.constant dense<0.000000e+00> : vector<8x128xf32>
    %46 = tpu.matmul %43, %45, %cst_23 {dimension_numbers = #tpu.dot_dimension_numbers<[1], [0], [0], [1], [0, 0, 1, 1], [], []>} : vector<8x128xf32>, vector<128x128xf32>, vector<8x128xf32> -> vector<8x128xf32>
    %47 = arith.addf %26, %46 : vector<8x128xf32>
    %c0_24 = arith.constant 0 : index
    %c2 = arith.constant 2 : index
    %c0_25 = arith.constant 0 : index
    %48 = vector.load %arg1[%c0_24, %c2, %c0_25] : memref<1x10x128xf32, #tpu.memory_space<vmem>>, vector<1x8x128xf32>
    %49 = vector.shape_cast %48 : vector<1x8x128xf32> to vector<8x128xf32>
    %50 = vector.broadcast %0 : vector<1x128xf32> to vector<8x128xf32>
    %51 = arith.mulf %49, %50 : vector<8x128xf32>
    %52 = vector.broadcast %1 : vector<1x128xf32> to vector<8x128xf32>
    %53 = arith.addf %51, %52 : vector<8x128xf32>
    %cst_26 = arith.constant 0.000000e+00 : f32
    %54 = vector.broadcast %cst_26 : f32 to vector<8x128xf32>
    %55 = arith.maximumf %53, %54 : vector<8x128xf32>
    %c2_i32 = arith.constant 2 : i32
    %56 = vector.broadcast %c2_i32 : i32 to vector<8x128xi32>
    %57 = arith.addi %4, %56 : vector<8x128xi32>
    %c1_i32_27 = arith.constant 1 : i32
    %58 = vector.broadcast %c1_i32_27 : i32 to vector<8x128xi32>
    %59 = arith.cmpi sge, %57, %58 : vector<8x128xi32>
    %c9_i32_28 = arith.constant 9 : i32
    %60 = vector.broadcast %c9_i32_28 : i32 to vector<8x128xi32>
    %61 = arith.cmpi slt, %57, %60 : vector<8x128xi32>
    %62 = arith.andi %59, %61 : vector<8x128xi1>
    %cst_29 = arith.constant 0.000000e+00 : f32
    %63 = vector.broadcast %cst_29 : f32 to vector<8x128xf32>
    %64 = arith.select %62, %55, %63 : vector<8x128xi1>, vector<8x128xf32>
    %c2_30 = arith.constant 2 : index
    %c0_31 = arith.constant 0 : index
    %c0_32 = arith.constant 0 : index
    %65 = vector.load %arg2[%c2_30, %c0_31, %c0_32] : memref<3x128x128xf32, #tpu.memory_space<vmem>>, vector<1x128x128xf32>
    %66 = vector.shape_cast %65 : vector<1x128x128xf32> to vector<128x128xf32>
    %cst_33 = arith.constant dense<0.000000e+00> : vector<8x128xf32>
    %67 = tpu.matmul %64, %66, %cst_33 {dimension_numbers = #tpu.dot_dimension_numbers<[1], [0], [0], [1], [0, 0, 1, 1], [], []>} : vector<8x128xf32>, vector<128x128xf32>, vector<8x128xf32> -> vector<8x128xf32>
    %68 = arith.addf %47, %67 : vector<8x128xf32>
    %c0_34 = arith.constant 0 : index
    %c0_35 = arith.constant 0 : index
    %69 = vector.load %arg3[%c0_34, %c0_35] : memref<1x128xf32, #tpu.memory_space<vmem>>, vector<1x128xf32>
    %70 = vector.broadcast %69 : vector<1x128xf32> to vector<8x128xf32>
    %71 = arith.addf %68, %70 : vector<8x128xf32>
    %cst_36 = arith.constant 0.000000e+00 : f32
    %72 = vector.broadcast %cst_36 : f32 to vector<8x128xf32>
    %73 = arith.maximumf %71, %72 : vector<8x128xf32>
    %c0_37 = arith.constant 0 : index
    %c0_38 = arith.constant 0 : index
    %c0_39 = arith.constant 0 : index
    %74 = vector.load %arg6[%c0_37, %c0_38, %c0_39] : memref<1x8x128xf32, #tpu.memory_space<vmem>>, vector<1x8x128xf32>
    %75 = vector.shape_cast %74 : vector<1x8x128xf32> to vector<8x128xf32>
    %76 = vector.shape_cast %73 : vector<8x128xf32> to vector<1x8x128xf32>
    tpu.vector_store %arg6[%c0_37, %c0_38, %c0_39], %76 {strides = array<i32>} : memref<1x8x128xf32, #tpu.memory_space<vmem>>, vector<1x8x128xf32>,
    return
  }
  func.func @transform_0(%arg0: i32) -> (i32, i32, i32) {
    %c0_i32 = arith.constant 0 : i32
    %c0_i32_0 = arith.constant 0 : i32
    %c0_i32_1 = arith.constant 0 : i32
    return %arg0, %c0_i32, %c0_i32_0 : i32, i32, i32
  }
  func.func @transform_1(%arg0: i32) -> (i32, i32, i32) {
    %c0_i32 = arith.constant 0 : i32
    %c0_i32_0 = arith.constant 0 : i32
    %c0_i32_1 = arith.constant 0 : i32
    %c0_i32_2 = arith.constant 0 : i32
    return %c0_i32, %c0_i32_0, %c0_i32_1 : i32, i32, i32
  }
  func.func @transform_2(%arg0: i32) -> (i32, i32) {
    %c0_i32 = arith.constant 0 : i32
    %c0_i32_0 = arith.constant 0 : i32
    %c0_i32_1 = arith.constant 0 : i32
    return %c0_i32, %c0_i32_0 : i32, i32
  }
  func.func @transform_3(%arg0: i32) -> (i32, i32) {
    %c0_i32 = arith.constant 0 : i32
    %c0_i32_0 = arith.constant 0 : i32
    %c0_i32_1 = arith.constant 0 : i32
    return %c0_i32, %c0_i32_0 : i32, i32
  }
  func.func @transform_4(%arg0: i32) -> (i32, i32) {
    %c0_i32 = arith.constant 0 : i32
    %c0_i32_0 = arith.constant 0 : i32
    %c0_i32_1 = arith.constant 0 : i32
    return %c0_i32, %c0_i32_0 : i32, i32
  }
  func.func @transform_5(%arg0: i32) -> (i32, i32, i32) {
    %c0_i32 = arith.constant 0 : i32
    %c0_i32_0 = arith.constant 0 : i32
    %c0_i32_1 = arith.constant 0 : i32
    return %arg0, %c0_i32, %c0_i32_0 : i32, i32, i32
  }
}

module attributes {stable_mosaic.version = 11 : i64} {
  func.func @_conv_block_kernel(%arg0: i32, %arg1: memref<1x10x128xf32, #tpu.memory_space<vmem>>, %arg2: memref<3x128x128xf32, #tpu.memory_space<vmem>>, %arg3: memref<1x128xf32, #tpu.memory_space<vmem>>, %arg4: memref<1x16x128xf32, #tpu.memory_space<vmem>>, %arg5: memref<1x8x128xf32, #tpu.memory_space<vmem>>) attributes {dimension_semantics = [#tpu.dimension_semantics<parallel>], iteration_bounds = array<i64: 2>, scalar_prefetch = 0 : i64, scratch_operands = 0 : i64, tpu.core_type = #tpu.core_type<tc>, window_params = [{transform_indices = @transform_0, window_bounds = array<i64: 1, 10, 128>}, {pipeline_mode = #tpu.pipeline_mode<synchronous>, transform_indices = @transform_1, window_bounds = array<i64: 3, 128, 128>}, {pipeline_mode = #tpu.pipeline_mode<synchronous>, transform_indices = @transform_2, window_bounds = array<i64: 1, 128>}, {transform_indices = @transform_3, window_bounds = array<i64: 1, 16, 128>}, {transform_indices = @transform_4, window_bounds = array<i64: 1, 8, 128>}]} {
    %cst = arith.constant 0.000000e+00 : f32
    %0 = vector.broadcast %cst : f32 to vector<8x128xf32>
    %c0 = arith.constant 0 : index
    %c0_0 = arith.constant 0 : index
    %c0_1 = arith.constant 0 : index
    %1 = vector.load %arg1[%c0, %c0_0, %c0_1] : memref<1x10x128xf32, #tpu.memory_space<vmem>>, vector<1x8x128xf32>
    %2 = vector.shape_cast %1 : vector<1x8x128xf32> to vector<8x128xf32>
    %c0_2 = arith.constant 0 : index
    %c0_3 = arith.constant 0 : index
    %c0_4 = arith.constant 0 : index
    %3 = vector.load %arg2[%c0_2, %c0_3, %c0_4] : memref<3x128x128xf32, #tpu.memory_space<vmem>>, vector<1x128x128xf32>
    %4 = vector.shape_cast %3 : vector<1x128x128xf32> to vector<128x128xf32>
    %cst_5 = arith.constant dense<0.000000e+00> : vector<8x128xf32>
    %5 = tpu.matmul %2, %4, %cst_5 {dimension_numbers = #tpu.dot_dimension_numbers<[1], [0], [0], [1], [0, 0, 1, 1], [], []>} : vector<8x128xf32>, vector<128x128xf32>, vector<8x128xf32> -> vector<8x128xf32>
    %6 = arith.addf %0, %5 : vector<8x128xf32>
    %c0_6 = arith.constant 0 : index
    %c1 = arith.constant 1 : index
    %c0_7 = arith.constant 0 : index
    %7 = vector.load %arg1[%c0_6, %c1, %c0_7] : memref<1x10x128xf32, #tpu.memory_space<vmem>>, vector<1x8x128xf32>
    %8 = vector.shape_cast %7 : vector<1x8x128xf32> to vector<8x128xf32>
    %c1_8 = arith.constant 1 : index
    %c0_9 = arith.constant 0 : index
    %c0_10 = arith.constant 0 : index
    %9 = vector.load %arg2[%c1_8, %c0_9, %c0_10] : memref<3x128x128xf32, #tpu.memory_space<vmem>>, vector<1x128x128xf32>
    %10 = vector.shape_cast %9 : vector<1x128x128xf32> to vector<128x128xf32>
    %cst_11 = arith.constant dense<0.000000e+00> : vector<8x128xf32>
    %11 = tpu.matmul %8, %10, %cst_11 {dimension_numbers = #tpu.dot_dimension_numbers<[1], [0], [0], [1], [0, 0, 1, 1], [], []>} : vector<8x128xf32>, vector<128x128xf32>, vector<8x128xf32> -> vector<8x128xf32>
    %12 = arith.addf %6, %11 : vector<8x128xf32>
    %c0_12 = arith.constant 0 : index
    %c2 = arith.constant 2 : index
    %c0_13 = arith.constant 0 : index
    %13 = vector.load %arg1[%c0_12, %c2, %c0_13] : memref<1x10x128xf32, #tpu.memory_space<vmem>>, vector<1x8x128xf32>
    %14 = vector.shape_cast %13 : vector<1x8x128xf32> to vector<8x128xf32>
    %c2_14 = arith.constant 2 : index
    %c0_15 = arith.constant 0 : index
    %c0_16 = arith.constant 0 : index
    %15 = vector.load %arg2[%c2_14, %c0_15, %c0_16] : memref<3x128x128xf32, #tpu.memory_space<vmem>>, vector<1x128x128xf32>
    %16 = vector.shape_cast %15 : vector<1x128x128xf32> to vector<128x128xf32>
    %cst_17 = arith.constant dense<0.000000e+00> : vector<8x128xf32>
    %17 = tpu.matmul %14, %16, %cst_17 {dimension_numbers = #tpu.dot_dimension_numbers<[1], [0], [0], [1], [0, 0, 1, 1], [], []>} : vector<8x128xf32>, vector<128x128xf32>, vector<8x128xf32> -> vector<8x128xf32>
    %18 = arith.addf %12, %17 : vector<8x128xf32>
    %c0_18 = arith.constant 0 : index
    %c0_19 = arith.constant 0 : index
    %19 = vector.load %arg3[%c0_18, %c0_19] : memref<1x128xf32, #tpu.memory_space<vmem>>, vector<1x128xf32>
    %20 = vector.broadcast %19 : vector<1x128xf32> to vector<8x128xf32>
    %21 = arith.addf %18, %20 : vector<8x128xf32>
    %c0_20 = arith.constant 0 : index
    %c0_21 = arith.constant 0 : index
    %c0_22 = arith.constant 0 : index
    %22 = tpu.strided_load %arg4[%c0_20, %c0_21, %c0_22] {strides = array<i32: 1, 2, 1>} : memref<1x16x128xf32, #tpu.memory_space<vmem>>, vector<1x8x128xf32>
    %23 = vector.shape_cast %22 : vector<1x8x128xf32> to vector<8x128xf32>
    %c0_23 = arith.constant 0 : index
    %c1_24 = arith.constant 1 : index
    %c0_25 = arith.constant 0 : index
    %24 = tpu.strided_load %arg4[%c0_23, %c1_24, %c0_25] {strides = array<i32: 1, 2, 1>} : memref<1x16x128xf32, #tpu.memory_space<vmem>>, vector<1x8x128xf32>
    %25 = vector.shape_cast %24 : vector<1x8x128xf32> to vector<8x128xf32>
    %26 = arith.maximumf %23, %25 : vector<8x128xf32>
    %27 = arith.addf %21, %26 : vector<8x128xf32>
    %c0_26 = arith.constant 0 : index
    %c0_27 = arith.constant 0 : index
    %c0_28 = arith.constant 0 : index
    %28 = vector.load %arg5[%c0_26, %c0_27, %c0_28] : memref<1x8x128xf32, #tpu.memory_space<vmem>>, vector<1x8x128xf32>
    %29 = vector.shape_cast %28 : vector<1x8x128xf32> to vector<8x128xf32>
    %30 = vector.shape_cast %27 : vector<8x128xf32> to vector<1x8x128xf32>
    tpu.vector_store %arg5[%c0_26, %c0_27, %c0_28], %30 {strides = array<i32>} : memref<1x8x128xf32, #tpu.memory_space<vmem>>, vector<1x8x128xf32>,
    return
  }
  func.func @transform_0(%arg0: i32) -> (i32, i32, i32) {
    %c0_i32 = arith.constant 0 : i32
    %c0_i32_0 = arith.constant 0 : i32
    %c0_i32_1 = arith.constant 0 : i32
    return %arg0, %c0_i32, %c0_i32_0 : i32, i32, i32
  }
  func.func @transform_1(%arg0: i32) -> (i32, i32, i32) {
    %c0_i32 = arith.constant 0 : i32
    %c0_i32_0 = arith.constant 0 : i32
    %c0_i32_1 = arith.constant 0 : i32
    %c0_i32_2 = arith.constant 0 : i32
    return %c0_i32, %c0_i32_0, %c0_i32_1 : i32, i32, i32
  }
  func.func @transform_2(%arg0: i32) -> (i32, i32) {
    %c0_i32 = arith.constant 0 : i32
    %c0_i32_0 = arith.constant 0 : i32
    %c0_i32_1 = arith.constant 0 : i32
    return %c0_i32, %c0_i32_0 : i32, i32
  }
  func.func @transform_3(%arg0: i32) -> (i32, i32, i32) {
    %c0_i32 = arith.constant 0 : i32
    %c0_i32_0 = arith.constant 0 : i32
    %c0_i32_1 = arith.constant 0 : i32
    return %arg0, %c0_i32, %c0_i32_0 : i32, i32, i32
  }
  func.func @transform_4(%arg0: i32) -> (i32, i32, i32) {
    %c0_i32 = arith.constant 0 : i32
    %c0_i32_0 = arith.constant 0 : i32
    %c0_i32_1 = arith.constant 0 : i32
    return %arg0, %c0_i32, %c0_i32_0 : i32, i32, i32
  }
}

module attributes {stable_mosaic.version = 11 : i64} {
  func.func @_conv_block_kernel(%arg0: i32, %arg1: memref<1x9x128xf32, #tpu.memory_space<vmem>>, %arg2: memref<3x128x128xf32, #tpu.memory_space<vmem>>, %arg3: memref<1x128xf32, #tpu.memory_space<vmem>>, %arg4: memref<1x128xf32, #tpu.memory_space<vmem>>, %arg5: memref<1x128xf32, #tpu.memory_space<vmem>>, %arg6: memref<1x4x128xf32, #tpu.memory_space<vmem>>) attributes {dimension_semantics = [#tpu.dimension_semantics<parallel>], iteration_bounds = array<i64: 2>, scalar_prefetch = 0 : i64, scratch_operands = 0 : i64, tpu.core_type = #tpu.core_type<tc>, window_params = [{transform_indices = @transform_0, window_bounds = array<i64: 1, 9, 128>}, {pipeline_mode = #tpu.pipeline_mode<synchronous>, transform_indices = @transform_1, window_bounds = array<i64: 3, 128, 128>}, {pipeline_mode = #tpu.pipeline_mode<synchronous>, transform_indices = @transform_2, window_bounds = array<i64: 1, 128>}, {pipeline_mode = #tpu.pipeline_mode<synchronous>, transform_indices = @transform_3, window_bounds = array<i64: 1, 128>}, {pipeline_mode = #tpu.pipeline_mode<synchronous>, transform_indices = @transform_4, window_bounds = array<i64: 1, 128>}, {transform_indices = @transform_5, window_bounds = array<i64: 1, 4, 128>}]} {
    %c0 = arith.constant 0 : index
    %c0_0 = arith.constant 0 : index
    %0 = vector.load %arg4[%c0, %c0_0] : memref<1x128xf32, #tpu.memory_space<vmem>>, vector<1x128xf32>
    %c0_1 = arith.constant 0 : index
    %c0_2 = arith.constant 0 : index
    %1 = vector.load %arg5[%c0_1, %c0_2] : memref<1x128xf32, #tpu.memory_space<vmem>>, vector<1x128xf32>
    %2 = tpu.iota {dimensions = array<i32: 0>} : vector<4x128xi32>
    %c2_i32 = arith.constant 2 : i32
    %3 = vector.broadcast %c2_i32 : i32 to vector<4x128xi32>
    %4 = arith.muli %2, %3 : vector<4x128xi32>
    %cst = arith.constant 0.000000e+00 : f32
    %5 = vector.broadcast %cst : f32 to vector<4x128xf32>
    %c0_3 = arith.constant 0 : index
    %c0_4 = arith.constant 0 : index
    %c0_5 = arith.constant 0 : index
    %6 = tpu.strided_load %arg1[%c0_3, %c0_4, %c0_5] {strides = array<i32: 1, 2, 1>} : memref<1x9x128xf32, #tpu.memory_space<vmem>>, vector<1x4x128xf32>
    %7 = vector.shape_cast %6 : vector<1x4x128xf32> to vector<4x128xf32>
    %8 = vector.broadcast %0 : vector<1x128xf32> to vector<4x128xf32>
    %9 = arith.mulf %7, %8 : vector<4x128xf32>
    %10 = vector.broadcast %1 : vector<1x128xf32> to vector<4x128xf32>
    %11 = arith.addf %9, %10 : vector<4x128xf32>
    %cst_6 = arith.constant 0.000000e+00 : f32
    %12 = vector.broadcast %cst_6 : f32 to vector<4x128xf32>
    %13 = arith.maximumf %11, %12 : vector<4x128xf32>
    %c0_i32 = arith.constant 0 : i32
    %14 = vector.broadcast %c0_i32 : i32 to vector<4x128xi32>
    %15 = arith.addi %4, %14 : vector<4x128xi32>
    %c0_i32_7 = arith.constant 0 : i32
    %16 = vector.broadcast %c0_i32_7 : i32 to vector<4x128xi32>
    %17 = arith.cmpi sge, %15, %16 : vector<4x128xi32>
    %c8_i32 = arith.constant 8 : i32
    %18 = vector.broadcast %c8_i32 : i32 to vector<4x128xi32>
    %19 = arith.cmpi slt, %15, %18 : vector<4x128xi32>
    %20 = arith.andi %17, %19 : vector<4x128xi1>
    %cst_8 = arith.constant 0.000000e+00 : f32
    %21 = vector.broadcast %cst_8 : f32 to vector<4x128xf32>
    %22 = arith.select %20, %13, %21 : vector<4x128xi1>, vector<4x128xf32>
    %c0_9 = arith.constant 0 : index
    %c0_10 = arith.constant 0 : index
    %c0_11 = arith.constant 0 : index
    %23 = vector.load %arg2[%c0_9, %c0_10, %c0_11] : memref<3x128x128xf32, #tpu.memory_space<vmem>>, vector<1x128x128xf32>
    %24 = vector.shape_cast %23 : vector<1x128x128xf32> to vector<128x128xf32>
    %cst_12 = arith.constant dense<0.000000e+00> : vector<4x128xf32>
    %25 = tpu.matmul %22, %24, %cst_12 {dimension_numbers = #tpu.dot_dimension_numbers<[1], [0], [0], [1], [0, 0, 1, 1], [], []>} : vector<4x128xf32>, vector<128x128xf32>, vector<4x128xf32> -> vector<4x128xf32>
    %26 = arith.addf %5, %25 : vector<4x128xf32>
    %c0_13 = arith.constant 0 : index
    %c1 = arith.constant 1 : index
    %c0_14 = arith.constant 0 : index
    %27 = tpu.strided_load %arg1[%c0_13, %c1, %c0_14] {strides = array<i32: 1, 2, 1>} : memref<1x9x128xf32, #tpu.memory_space<vmem>>, vector<1x4x128xf32>
    %28 = vector.shape_cast %27 : vector<1x4x128xf32> to vector<4x128xf32>
    %29 = vector.broadcast %0 : vector<1x128xf32> to vector<4x128xf32>
    %30 = arith.mulf %28, %29 : vector<4x128xf32>
    %31 = vector.broadcast %1 : vector<1x128xf32> to vector<4x128xf32>
    %32 = arith.addf %30, %31 : vector<4x128xf32>
    %cst_15 = arith.constant 0.000000e+00 : f32
    %33 = vector.broadcast %cst_15 : f32 to vector<4x128xf32>
    %34 = arith.maximumf %32, %33 : vector<4x128xf32>
    %c1_i32 = arith.constant 1 : i32
    %35 = vector.broadcast %c1_i32 : i32 to vector<4x128xi32>
    %36 = arith.addi %4, %35 : vector<4x128xi32>
    %c0_i32_16 = arith.constant 0 : i32
    %37 = vector.broadcast %c0_i32_16 : i32 to vector<4x128xi32>
    %38 = arith.cmpi sge, %36, %37 : vector<4x128xi32>
    %c8_i32_17 = arith.constant 8 : i32
    %39 = vector.broadcast %c8_i32_17 : i32 to vector<4x128xi32>
    %40 = arith.cmpi slt, %36, %39 : vector<4x128xi32>
    %41 = arith.andi %38, %40 : vector<4x128xi1>
    %cst_18 = arith.constant 0.000000e+00 : f32
    %42 = vector.broadcast %cst_18 : f32 to vector<4x128xf32>
    %43 = arith.select %41, %34, %42 : vector<4x128xi1>, vector<4x128xf32>
    %c1_19 = arith.constant 1 : index
    %c0_20 = arith.constant 0 : index
    %c0_21 = arith.constant 0 : index
    %44 = vector.load %arg2[%c1_19, %c0_20, %c0_21] : memref<3x128x128xf32, #tpu.memory_space<vmem>>, vector<1x128x128xf32>
    %45 = vector.shape_cast %44 : vector<1x128x128xf32> to vector<128x128xf32>
    %cst_22 = arith.constant dense<0.000000e+00> : vector<4x128xf32>
    %46 = tpu.matmul %43, %45, %cst_22 {dimension_numbers = #tpu.dot_dimension_numbers<[1], [0], [0], [1], [0, 0, 1, 1], [], []>} : vector<4x128xf32>, vector<128x128xf32>, vector<4x128xf32> -> vector<4x128xf32>
    %47 = arith.addf %26, %46 : vector<4x128xf32>
    %c0_23 = arith.constant 0 : index
    %c2 = arith.constant 2 : index
    %c0_24 = arith.constant 0 : index
    %48 = tpu.strided_load %arg1[%c0_23, %c2, %c0_24] {strides = array<i32: 1, 2, 1>} : memref<1x9x128xf32, #tpu.memory_space<vmem>>, vector<1x4x128xf32>
    %49 = vector.shape_cast %48 : vector<1x4x128xf32> to vector<4x128xf32>
    %50 = vector.broadcast %0 : vector<1x128xf32> to vector<4x128xf32>
    %51 = arith.mulf %49, %50 : vector<4x128xf32>
    %52 = vector.broadcast %1 : vector<1x128xf32> to vector<4x128xf32>
    %53 = arith.addf %51, %52 : vector<4x128xf32>
    %cst_25 = arith.constant 0.000000e+00 : f32
    %54 = vector.broadcast %cst_25 : f32 to vector<4x128xf32>
    %55 = arith.maximumf %53, %54 : vector<4x128xf32>
    %c2_i32_26 = arith.constant 2 : i32
    %56 = vector.broadcast %c2_i32_26 : i32 to vector<4x128xi32>
    %57 = arith.addi %4, %56 : vector<4x128xi32>
    %c0_i32_27 = arith.constant 0 : i32
    %58 = vector.broadcast %c0_i32_27 : i32 to vector<4x128xi32>
    %59 = arith.cmpi sge, %57, %58 : vector<4x128xi32>
    %c8_i32_28 = arith.constant 8 : i32
    %60 = vector.broadcast %c8_i32_28 : i32 to vector<4x128xi32>
    %61 = arith.cmpi slt, %57, %60 : vector<4x128xi32>
    %62 = arith.andi %59, %61 : vector<4x128xi1>
    %cst_29 = arith.constant 0.000000e+00 : f32
    %63 = vector.broadcast %cst_29 : f32 to vector<4x128xf32>
    %64 = arith.select %62, %55, %63 : vector<4x128xi1>, vector<4x128xf32>
    %c2_30 = arith.constant 2 : index
    %c0_31 = arith.constant 0 : index
    %c0_32 = arith.constant 0 : index
    %65 = vector.load %arg2[%c2_30, %c0_31, %c0_32] : memref<3x128x128xf32, #tpu.memory_space<vmem>>, vector<1x128x128xf32>
    %66 = vector.shape_cast %65 : vector<1x128x128xf32> to vector<128x128xf32>
    %cst_33 = arith.constant dense<0.000000e+00> : vector<4x128xf32>
    %67 = tpu.matmul %64, %66, %cst_33 {dimension_numbers = #tpu.dot_dimension_numbers<[1], [0], [0], [1], [0, 0, 1, 1], [], []>} : vector<4x128xf32>, vector<128x128xf32>, vector<4x128xf32> -> vector<4x128xf32>
    %68 = arith.addf %47, %67 : vector<4x128xf32>
    %c0_34 = arith.constant 0 : index
    %c0_35 = arith.constant 0 : index
    %69 = vector.load %arg3[%c0_34, %c0_35] : memref<1x128xf32, #tpu.memory_space<vmem>>, vector<1x128xf32>
    %70 = vector.broadcast %69 : vector<1x128xf32> to vector<4x128xf32>
    %71 = arith.addf %68, %70 : vector<4x128xf32>
    %cst_36 = arith.constant 0.000000e+00 : f32
    %72 = vector.broadcast %cst_36 : f32 to vector<4x128xf32>
    %73 = arith.maximumf %71, %72 : vector<4x128xf32>
    %c0_37 = arith.constant 0 : index
    %c0_38 = arith.constant 0 : index
    %c0_39 = arith.constant 0 : index
    %74 = vector.load %arg6[%c0_37, %c0_38, %c0_39] : memref<1x4x128xf32, #tpu.memory_space<vmem>>, vector<1x4x128xf32>
    %75 = vector.shape_cast %74 : vector<1x4x128xf32> to vector<4x128xf32>
    %76 = vector.shape_cast %73 : vector<4x128xf32> to vector<1x4x128xf32>
    tpu.vector_store %arg6[%c0_37, %c0_38, %c0_39], %76 {strides = array<i32>} : memref<1x4x128xf32, #tpu.memory_space<vmem>>, vector<1x4x128xf32>,
    return
  }
  func.func @transform_0(%arg0: i32) -> (i32, i32, i32) {
    %c0_i32 = arith.constant 0 : i32
    %c0_i32_0 = arith.constant 0 : i32
    %c0_i32_1 = arith.constant 0 : i32
    return %arg0, %c0_i32, %c0_i32_0 : i32, i32, i32
  }
  func.func @transform_1(%arg0: i32) -> (i32, i32, i32) {
    %c0_i32 = arith.constant 0 : i32
    %c0_i32_0 = arith.constant 0 : i32
    %c0_i32_1 = arith.constant 0 : i32
    %c0_i32_2 = arith.constant 0 : i32
    return %c0_i32, %c0_i32_0, %c0_i32_1 : i32, i32, i32
  }
  func.func @transform_2(%arg0: i32) -> (i32, i32) {
    %c0_i32 = arith.constant 0 : i32
    %c0_i32_0 = arith.constant 0 : i32
    %c0_i32_1 = arith.constant 0 : i32
    return %c0_i32, %c0_i32_0 : i32, i32
  }
  func.func @transform_3(%arg0: i32) -> (i32, i32) {
    %c0_i32 = arith.constant 0 : i32
    %c0_i32_0 = arith.constant 0 : i32
    %c0_i32_1 = arith.constant 0 : i32
    return %c0_i32, %c0_i32_0 : i32, i32
  }
  func.func @transform_4(%arg0: i32) -> (i32, i32) {
    %c0_i32 = arith.constant 0 : i32
    %c0_i32_0 = arith.constant 0 : i32
    %c0_i32_1 = arith.constant 0 : i32
    return %c0_i32, %c0_i32_0 : i32, i32
  }
  func.func @transform_5(%arg0: i32) -> (i32, i32, i32) {
    %c0_i32 = arith.constant 0 : i32
    %c0_i32_0 = arith.constant 0 : i32
    %c0_i32_1 = arith.constant 0 : i32
    return %arg0, %c0_i32, %c0_i32_0 : i32, i32, i32
  }
}

module attributes {stable_mosaic.version = 11 : i64} {
  func.func @_conv_block_kernel(%arg0: i32, %arg1: memref<1x10x128xf32, #tpu.memory_space<vmem>>, %arg2: memref<3x128x128xf32, #tpu.memory_space<vmem>>, %arg3: memref<1x128xf32, #tpu.memory_space<vmem>>, %arg4: memref<1x8x128xf32, #tpu.memory_space<vmem>>, %arg5: memref<1x8x128xf32, #tpu.memory_space<vmem>>) attributes {dimension_semantics = [#tpu.dimension_semantics<parallel>], iteration_bounds = array<i64: 2>, scalar_prefetch = 0 : i64, scratch_operands = 0 : i64, tpu.core_type = #tpu.core_type<tc>, window_params = [{transform_indices = @transform_0, window_bounds = array<i64: 1, 10, 128>}, {pipeline_mode = #tpu.pipeline_mode<synchronous>, transform_indices = @transform_1, window_bounds = array<i64: 3, 128, 128>}, {pipeline_mode = #tpu.pipeline_mode<synchronous>, transform_indices = @transform_2, window_bounds = array<i64: 1, 128>}, {transform_indices = @transform_3, window_bounds = array<i64: 1, 8, 128>}, {transform_indices = @transform_4, window_bounds = array<i64: 1, 8, 128>}]} {
    %cst = arith.constant 0.000000e+00 : f32
    %0 = vector.broadcast %cst : f32 to vector<8x128xf32>
    %c0 = arith.constant 0 : index
    %c0_0 = arith.constant 0 : index
    %c0_1 = arith.constant 0 : index
    %1 = vector.load %arg1[%c0, %c0_0, %c0_1] : memref<1x10x128xf32, #tpu.memory_space<vmem>>, vector<1x8x128xf32>
    %2 = vector.shape_cast %1 : vector<1x8x128xf32> to vector<8x128xf32>
    %c0_2 = arith.constant 0 : index
    %c0_3 = arith.constant 0 : index
    %c0_4 = arith.constant 0 : index
    %3 = vector.load %arg2[%c0_2, %c0_3, %c0_4] : memref<3x128x128xf32, #tpu.memory_space<vmem>>, vector<1x128x128xf32>
    %4 = vector.shape_cast %3 : vector<1x128x128xf32> to vector<128x128xf32>
    %cst_5 = arith.constant dense<0.000000e+00> : vector<8x128xf32>
    %5 = tpu.matmul %2, %4, %cst_5 {dimension_numbers = #tpu.dot_dimension_numbers<[1], [0], [0], [1], [0, 0, 1, 1], [], []>} : vector<8x128xf32>, vector<128x128xf32>, vector<8x128xf32> -> vector<8x128xf32>
    %6 = arith.addf %0, %5 : vector<8x128xf32>
    %c0_6 = arith.constant 0 : index
    %c1 = arith.constant 1 : index
    %c0_7 = arith.constant 0 : index
    %7 = vector.load %arg1[%c0_6, %c1, %c0_7] : memref<1x10x128xf32, #tpu.memory_space<vmem>>, vector<1x8x128xf32>
    %8 = vector.shape_cast %7 : vector<1x8x128xf32> to vector<8x128xf32>
    %c1_8 = arith.constant 1 : index
    %c0_9 = arith.constant 0 : index
    %c0_10 = arith.constant 0 : index
    %9 = vector.load %arg2[%c1_8, %c0_9, %c0_10] : memref<3x128x128xf32, #tpu.memory_space<vmem>>, vector<1x128x128xf32>
    %10 = vector.shape_cast %9 : vector<1x128x128xf32> to vector<128x128xf32>
    %cst_11 = arith.constant dense<0.000000e+00> : vector<8x128xf32>
    %11 = tpu.matmul %8, %10, %cst_11 {dimension_numbers = #tpu.dot_dimension_numbers<[1], [0], [0], [1], [0, 0, 1, 1], [], []>} : vector<8x128xf32>, vector<128x128xf32>, vector<8x128xf32> -> vector<8x128xf32>
    %12 = arith.addf %6, %11 : vector<8x128xf32>
    %c0_12 = arith.constant 0 : index
    %c2 = arith.constant 2 : index
    %c0_13 = arith.constant 0 : index
    %13 = vector.load %arg1[%c0_12, %c2, %c0_13] : memref<1x10x128xf32, #tpu.memory_space<vmem>>, vector<1x8x128xf32>
    %14 = vector.shape_cast %13 : vector<1x8x128xf32> to vector<8x128xf32>
    %c2_14 = arith.constant 2 : index
    %c0_15 = arith.constant 0 : index
    %c0_16 = arith.constant 0 : index
    %15 = vector.load %arg2[%c2_14, %c0_15, %c0_16] : memref<3x128x128xf32, #tpu.memory_space<vmem>>, vector<1x128x128xf32>
    %16 = vector.shape_cast %15 : vector<1x128x128xf32> to vector<128x128xf32>
    %cst_17 = arith.constant dense<0.000000e+00> : vector<8x128xf32>
    %17 = tpu.matmul %14, %16, %cst_17 {dimension_numbers = #tpu.dot_dimension_numbers<[1], [0], [0], [1], [0, 0, 1, 1], [], []>} : vector<8x128xf32>, vector<128x128xf32>, vector<8x128xf32> -> vector<8x128xf32>
    %18 = arith.addf %12, %17 : vector<8x128xf32>
    %c0_18 = arith.constant 0 : index
    %c0_19 = arith.constant 0 : index
    %19 = vector.load %arg3[%c0_18, %c0_19] : memref<1x128xf32, #tpu.memory_space<vmem>>, vector<1x128xf32>
    %20 = vector.broadcast %19 : vector<1x128xf32> to vector<8x128xf32>
    %21 = arith.addf %18, %20 : vector<8x128xf32>
    %c0_20 = arith.constant 0 : index
    %c0_21 = arith.constant 0 : index
    %c0_22 = arith.constant 0 : index
    %22 = vector.load %arg4[%c0_20, %c0_21, %c0_22] : memref<1x8x128xf32, #tpu.memory_space<vmem>>, vector<1x8x128xf32>
    %23 = vector.shape_cast %22 : vector<1x8x128xf32> to vector<8x128xf32>
    %24 = arith.addf %21, %23 : vector<8x128xf32>
    %c0_23 = arith.constant 0 : index
    %c0_24 = arith.constant 0 : index
    %c0_25 = arith.constant 0 : index
    %25 = vector.load %arg5[%c0_23, %c0_24, %c0_25] : memref<1x8x128xf32, #tpu.memory_space<vmem>>, vector<1x8x128xf32>
    %26 = vector.shape_cast %25 : vector<1x8x128xf32> to vector<8x128xf32>
    %27 = vector.shape_cast %24 : vector<8x128xf32> to vector<1x8x128xf32>
    tpu.vector_store %arg5[%c0_23, %c0_24, %c0_25], %27 {strides = array<i32>} : memref<1x8x128xf32, #tpu.memory_space<vmem>>, vector<1x8x128xf32>,
    return
  }
  func.func @transform_0(%arg0: i32) -> (i32, i32, i32) {
    %c0_i32 = arith.constant 0 : i32
    %c0_i32_0 = arith.constant 0 : i32
    %c0_i32_1 = arith.constant 0 : i32
    return %arg0, %c0_i32, %c0_i32_0 : i32, i32, i32
  }
  func.func @transform_1(%arg0: i32) -> (i32, i32, i32) {
    %c0_i32 = arith.constant 0 : i32
    %c0_i32_0 = arith.constant 0 : i32
    %c0_i32_1 = arith.constant 0 : i32
    %c0_i32_2 = arith.constant 0 : i32
    return %c0_i32, %c0_i32_0, %c0_i32_1 : i32, i32, i32
  }
  func.func @transform_2(%arg0: i32) -> (i32, i32) {
    %c0_i32 = arith.constant 0 : i32
    %c0_i32_0 = arith.constant 0 : i32
    %c0_i32_1 = arith.constant 0 : i32
    return %c0_i32, %c0_i32_0 : i32, i32
  }
  func.func @transform_3(%arg0: i32) -> (i32, i32, i32) {
    %c0_i32 = arith.constant 0 : i32
    %c0_i32_0 = arith.constant 0 : i32
    %c0_i32_1 = arith.constant 0 : i32
    return %arg0, %c0_i32, %c0_i32_0 : i32, i32, i32
  }
  func.func @transform_4(%arg0: i32) -> (i32, i32, i32) {
    %c0_i32 = arith.constant 0 : i32
    %c0_i32_0 = arith.constant 0 : i32
    %c0_i32_1 = arith.constant 0 : i32
    return %arg0, %c0_i32, %c0_i32_0 : i32, i32, i32
  }
}

module attributes {stable_mosaic.version = 11 : i64} {
  func.func @_conv_block_kernel(%arg0: i32, %arg1: memref<1x6x128xf32, #tpu.memory_space<vmem>>, %arg2: memref<3x128x128xf32, #tpu.memory_space<vmem>>, %arg3: memref<1x128xf32, #tpu.memory_space<vmem>>, %arg4: memref<1x8x128xf32, #tpu.memory_space<vmem>>, %arg5: memref<1x4x128xf32, #tpu.memory_space<vmem>>) attributes {dimension_semantics = [#tpu.dimension_semantics<parallel>], iteration_bounds = array<i64: 2>, scalar_prefetch = 0 : i64, scratch_operands = 0 : i64, tpu.core_type = #tpu.core_type<tc>, window_params = [{transform_indices = @transform_0, window_bounds = array<i64: 1, 6, 128>}, {pipeline_mode = #tpu.pipeline_mode<synchronous>, transform_indices = @transform_1, window_bounds = array<i64: 3, 128, 128>}, {pipeline_mode = #tpu.pipeline_mode<synchronous>, transform_indices = @transform_2, window_bounds = array<i64: 1, 128>}, {transform_indices = @transform_3, window_bounds = array<i64: 1, 8, 128>}, {transform_indices = @transform_4, window_bounds = array<i64: 1, 4, 128>}]} {
    %cst = arith.constant 0.000000e+00 : f32
    %0 = vector.broadcast %cst : f32 to vector<4x128xf32>
    %c0 = arith.constant 0 : index
    %c0_0 = arith.constant 0 : index
    %c0_1 = arith.constant 0 : index
    %1 = vector.load %arg1[%c0, %c0_0, %c0_1] : memref<1x6x128xf32, #tpu.memory_space<vmem>>, vector<1x4x128xf32>
    %2 = vector.shape_cast %1 : vector<1x4x128xf32> to vector<4x128xf32>
    %c0_2 = arith.constant 0 : index
    %c0_3 = arith.constant 0 : index
    %c0_4 = arith.constant 0 : index
    %3 = vector.load %arg2[%c0_2, %c0_3, %c0_4] : memref<3x128x128xf32, #tpu.memory_space<vmem>>, vector<1x128x128xf32>
    %4 = vector.shape_cast %3 : vector<1x128x128xf32> to vector<128x128xf32>
    %cst_5 = arith.constant dense<0.000000e+00> : vector<4x128xf32>
    %5 = tpu.matmul %2, %4, %cst_5 {dimension_numbers = #tpu.dot_dimension_numbers<[1], [0], [0], [1], [0, 0, 1, 1], [], []>} : vector<4x128xf32>, vector<128x128xf32>, vector<4x128xf32> -> vector<4x128xf32>
    %6 = arith.addf %0, %5 : vector<4x128xf32>
    %c0_6 = arith.constant 0 : index
    %c1 = arith.constant 1 : index
    %c0_7 = arith.constant 0 : index
    %7 = vector.load %arg1[%c0_6, %c1, %c0_7] : memref<1x6x128xf32, #tpu.memory_space<vmem>>, vector<1x4x128xf32>
    %8 = vector.shape_cast %7 : vector<1x4x128xf32> to vector<4x128xf32>
    %c1_8 = arith.constant 1 : index
    %c0_9 = arith.constant 0 : index
    %c0_10 = arith.constant 0 : index
    %9 = vector.load %arg2[%c1_8, %c0_9, %c0_10] : memref<3x128x128xf32, #tpu.memory_space<vmem>>, vector<1x128x128xf32>
    %10 = vector.shape_cast %9 : vector<1x128x128xf32> to vector<128x128xf32>
    %cst_11 = arith.constant dense<0.000000e+00> : vector<4x128xf32>
    %11 = tpu.matmul %8, %10, %cst_11 {dimension_numbers = #tpu.dot_dimension_numbers<[1], [0], [0], [1], [0, 0, 1, 1], [], []>} : vector<4x128xf32>, vector<128x128xf32>, vector<4x128xf32> -> vector<4x128xf32>
    %12 = arith.addf %6, %11 : vector<4x128xf32>
    %c0_12 = arith.constant 0 : index
    %c2 = arith.constant 2 : index
    %c0_13 = arith.constant 0 : index
    %13 = vector.load %arg1[%c0_12, %c2, %c0_13] : memref<1x6x128xf32, #tpu.memory_space<vmem>>, vector<1x4x128xf32>
    %14 = vector.shape_cast %13 : vector<1x4x128xf32> to vector<4x128xf32>
    %c2_14 = arith.constant 2 : index
    %c0_15 = arith.constant 0 : index
    %c0_16 = arith.constant 0 : index
    %15 = vector.load %arg2[%c2_14, %c0_15, %c0_16] : memref<3x128x128xf32, #tpu.memory_space<vmem>>, vector<1x128x128xf32>
    %16 = vector.shape_cast %15 : vector<1x128x128xf32> to vector<128x128xf32>
    %cst_17 = arith.constant dense<0.000000e+00> : vector<4x128xf32>
    %17 = tpu.matmul %14, %16, %cst_17 {dimension_numbers = #tpu.dot_dimension_numbers<[1], [0], [0], [1], [0, 0, 1, 1], [], []>} : vector<4x128xf32>, vector<128x128xf32>, vector<4x128xf32> -> vector<4x128xf32>
    %18 = arith.addf %12, %17 : vector<4x128xf32>
    %c0_18 = arith.constant 0 : index
    %c0_19 = arith.constant 0 : index
    %19 = vector.load %arg3[%c0_18, %c0_19] : memref<1x128xf32, #tpu.memory_space<vmem>>, vector<1x128xf32>
    %20 = vector.broadcast %19 : vector<1x128xf32> to vector<4x128xf32>
    %21 = arith.addf %18, %20 : vector<4x128xf32>
    %c0_20 = arith.constant 0 : index
    %c0_21 = arith.constant 0 : index
    %c0_22 = arith.constant 0 : index
    %22 = tpu.strided_load %arg4[%c0_20, %c0_21, %c0_22] {strides = array<i32: 1, 2, 1>} : memref<1x8x128xf32, #tpu.memory_space<vmem>>, vector<1x4x128xf32>
    %23 = vector.shape_cast %22 : vector<1x4x128xf32> to vector<4x128xf32>
    %c0_23 = arith.constant 0 : index
    %c1_24 = arith.constant 1 : index
    %c0_25 = arith.constant 0 : index
    %24 = tpu.strided_load %arg4[%c0_23, %c1_24, %c0_25] {strides = array<i32: 1, 2, 1>} : memref<1x8x128xf32, #tpu.memory_space<vmem>>, vector<1x4x128xf32>
    %25 = vector.shape_cast %24 : vector<1x4x128xf32> to vector<4x128xf32>
    %26 = arith.maximumf %23, %25 : vector<4x128xf32>
    %27 = arith.addf %21, %26 : vector<4x128xf32>
    %c0_26 = arith.constant 0 : index
    %c0_27 = arith.constant 0 : index
    %c0_28 = arith.constant 0 : index
    %28 = vector.load %arg5[%c0_26, %c0_27, %c0_28] : memref<1x4x128xf32, #tpu.memory_space<vmem>>, vector<1x4x128xf32>
    %29 = vector.shape_cast %28 : vector<1x4x128xf32> to vector<4x128xf32>
    %30 = vector.shape_cast %27 : vector<4x128xf32> to vector<1x4x128xf32>
    tpu.vector_store %arg5[%c0_26, %c0_27, %c0_28], %30 {strides = array<i32>} : memref<1x4x128xf32, #tpu.memory_space<vmem>>, vector<1x4x128xf32>,
    return
  }
  func.func @transform_0(%arg0: i32) -> (i32, i32, i32) {
    %c0_i32 = arith.constant 0 : i32
    %c0_i32_0 = arith.constant 0 : i32
    %c0_i32_1 = arith.constant 0 : i32
    return %arg0, %c0_i32, %c0_i32_0 : i32, i32, i32
  }
  func.func @transform_1(%arg0: i32) -> (i32, i32, i32) {
    %c0_i32 = arith.constant 0 : i32
    %c0_i32_0 = arith.constant 0 : i32
    %c0_i32_1 = arith.constant 0 : i32
    %c0_i32_2 = arith.constant 0 : i32
    return %c0_i32, %c0_i32_0, %c0_i32_1 : i32, i32, i32
  }
  func.func @transform_2(%arg0: i32) -> (i32, i32) {
    %c0_i32 = arith.constant 0 : i32
    %c0_i32_0 = arith.constant 0 : i32
    %c0_i32_1 = arith.constant 0 : i32
    return %c0_i32, %c0_i32_0 : i32, i32
  }
  func.func @transform_3(%arg0: i32) -> (i32, i32, i32) {
    %c0_i32 = arith.constant 0 : i32
    %c0_i32_0 = arith.constant 0 : i32
    %c0_i32_1 = arith.constant 0 : i32
    return %arg0, %c0_i32, %c0_i32_0 : i32, i32, i32
  }
  func.func @transform_4(%arg0: i32) -> (i32, i32, i32) {
    %c0_i32 = arith.constant 0 : i32
    %c0_i32_0 = arith.constant 0 : i32
    %c0_i32_1 = arith.constant 0 : i32
    return %arg0, %c0_i32, %c0_i32_0 : i32, i32, i32
  }
}

module attributes {stable_mosaic.version = 11 : i64} {
  func.func @_head_kernel(%arg0: i32, %arg1: memref<1x4x128xf32, #tpu.memory_space<vmem>>, %arg2: memref<1x128xf32, #tpu.memory_space<vmem>>, %arg3: memref<1x128xf32, #tpu.memory_space<vmem>>, %arg4: memref<128x128xf32, #tpu.memory_space<vmem>>, %arg5: memref<1x128xf32, #tpu.memory_space<vmem>>, %arg6: memref<128x128xf32, #tpu.memory_space<vmem>>, %arg7: memref<1x128xf32, #tpu.memory_space<vmem>>, %arg8: memref<1x1x128xf32, #tpu.memory_space<vmem>>) attributes {dimension_semantics = [#tpu.dimension_semantics<parallel>], iteration_bounds = array<i64: 2>, scalar_prefetch = 0 : i64, scratch_operands = 0 : i64, tpu.core_type = #tpu.core_type<tc>, window_params = [{transform_indices = @transform_0, window_bounds = array<i64: 1, 4, 128>}, {pipeline_mode = #tpu.pipeline_mode<synchronous>, transform_indices = @transform_1, window_bounds = array<i64: 1, 128>}, {pipeline_mode = #tpu.pipeline_mode<synchronous>, transform_indices = @transform_2, window_bounds = array<i64: 1, 128>}, {pipeline_mode = #tpu.pipeline_mode<synchronous>, transform_indices = @transform_3, window_bounds = array<i64: 128, 128>}, {pipeline_mode = #tpu.pipeline_mode<synchronous>, transform_indices = @transform_4, window_bounds = array<i64: 1, 128>}, {pipeline_mode = #tpu.pipeline_mode<synchronous>, transform_indices = @transform_5, window_bounds = array<i64: 128, 128>}, {pipeline_mode = #tpu.pipeline_mode<synchronous>, transform_indices = @transform_6, window_bounds = array<i64: 1, 128>}, {transform_indices = @transform_7, window_bounds = array<i64: 1, 1, 128>}]} {
    %c0 = arith.constant 0 : index
    %c0_0 = arith.constant 0 : index
    %c0_1 = arith.constant 0 : index
    %0 = vector.load %arg1[%c0, %c0_0, %c0_1] : memref<1x4x128xf32, #tpu.memory_space<vmem>>, vector<1x4x128xf32>
    %1 = vector.shape_cast %0 : vector<1x4x128xf32> to vector<4x128xf32>
    %c0_2 = arith.constant 0 : index
    %c0_3 = arith.constant 0 : index
    %2 = vector.load %arg2[%c0_2, %c0_3] : memref<1x128xf32, #tpu.memory_space<vmem>>, vector<1x128xf32>
    %3 = vector.broadcast %2 : vector<1x128xf32> to vector<4x128xf32>
    %4 = arith.mulf %1, %3 : vector<4x128xf32>
    %c0_4 = arith.constant 0 : index
    %c0_5 = arith.constant 0 : index
    %5 = vector.load %arg3[%c0_4, %c0_5] : memref<1x128xf32, #tpu.memory_space<vmem>>, vector<1x128xf32>
    %6 = vector.broadcast %5 : vector<1x128xf32> to vector<4x128xf32>
    %7 = arith.addf %4, %6 : vector<4x128xf32>
    %cst = arith.constant 0.000000e+00 : f32
    %8 = vector.broadcast %cst : f32 to vector<4x128xf32>
    %9 = arith.maximumf %7, %8 : vector<4x128xf32>
    %cst_6 = arith.constant dense<0.000000e+00> : vector<128xf32>
    %10 = vector.multi_reduction <add>, %9, %cst_6 [0] : vector<4x128xf32> to vector<128xf32>
    %11 = vector.shape_cast %10 : vector<128xf32> to vector<1x128xf32>
    %cst_7 = arith.constant 2.500000e-01 : f32
    %12 = vector.broadcast %cst_7 : f32 to vector<1x128xf32>
    %13 = arith.mulf %11, %12 : vector<1x128xf32>
    %c0_8 = arith.constant 0 : index
    %c0_9 = arith.constant 0 : index
    %14 = vector.load %arg4[%c0_8, %c0_9] : memref<128x128xf32, #tpu.memory_space<vmem>>, vector<128x128xf32>
    %cst_10 = arith.constant dense<0.000000e+00> : vector<1x128xf32>
    %15 = tpu.matmul %13, %14, %cst_10 {dimension_numbers = #tpu.dot_dimension_numbers<[1], [0], [0], [1], [0, 0, 1, 1], [], []>} : vector<1x128xf32>, vector<128x128xf32>, vector<1x128xf32> -> vector<1x128xf32>
    %c0_11 = arith.constant 0 : index
    %c0_12 = arith.constant 0 : index
    %16 = vector.load %arg5[%c0_11, %c0_12] : memref<1x128xf32, #tpu.memory_space<vmem>>, vector<1x128xf32>
    %17 = arith.addf %15, %16 : vector<1x128xf32>
    %18 = arith.negf %17 : vector<1x128xf32>
    %19 = math.exp %18 : vector<1x128xf32>
    %cst_13 = arith.constant 1.000000e+00 : f32
    %20 = vector.broadcast %cst_13 : f32 to vector<1x128xf32>
    %21 = arith.addf %20, %19 : vector<1x128xf32>
    %22 = arith.divf %20, %21 : vector<1x128xf32>
    %c0_14 = arith.constant 0 : index
    %c0_15 = arith.constant 0 : index
    %23 = vector.load %arg6[%c0_14, %c0_15] : memref<128x128xf32, #tpu.memory_space<vmem>>, vector<128x128xf32>
    %cst_16 = arith.constant dense<0.000000e+00> : vector<1x128xf32>
    %24 = tpu.matmul %22, %23, %cst_16 {dimension_numbers = #tpu.dot_dimension_numbers<[1], [0], [0], [1], [0, 0, 1, 1], [], []>} : vector<1x128xf32>, vector<128x128xf32>, vector<1x128xf32> -> vector<1x128xf32>
    %c0_17 = arith.constant 0 : index
    %c0_18 = arith.constant 0 : index
    %25 = vector.load %arg7[%c0_17, %c0_18] : memref<1x128xf32, #tpu.memory_space<vmem>>, vector<1x128xf32>
    %26 = arith.addf %24, %25 : vector<1x128xf32>
    %27 = tpu.iota {dimensions = array<i32: 1>} : vector<1x128xi32>
    %c4_i32 = arith.constant 4 : i32
    %28 = vector.broadcast %c4_i32 : i32 to vector<1x128xi32>
    %29 = arith.cmpi slt, %27, %28 : vector<1x128xi32>
    %cst_19 = arith.constant -1.000000e+30 : f32
    %30 = vector.broadcast %cst_19 : f32 to vector<1x128xf32>
    %31 = arith.select %29, %26, %30 : vector<1x128xi1>, vector<1x128xf32>
    %cst_20 = arith.constant dense<0xFF800000> : vector<1xf32>
    %32 = vector.multi_reduction <maximumf>, %31, %cst_20 [1] : vector<1x128xf32> to vector<1xf32>
    %33 = vector.shape_cast %32 : vector<1xf32> to vector<1x1xf32>
    %34 = vector.broadcast %33 : vector<1x1xf32> to vector<1x128xf32>
    %35 = arith.subf %31, %34 : vector<1x128xf32>
    %36 = math.exp %35 : vector<1x128xf32>
    %cst_21 = arith.constant dense<0.000000e+00> : vector<1xf32>
    %37 = vector.multi_reduction <add>, %36, %cst_21 [1] : vector<1x128xf32> to vector<1xf32>
    %38 = vector.shape_cast %37 : vector<1xf32> to vector<1x1xf32>
    %39 = vector.broadcast %38 : vector<1x1xf32> to vector<1x128xf32>
    %40 = arith.divf %36, %39 : vector<1x128xf32>
    %c0_22 = arith.constant 0 : index
    %c0_23 = arith.constant 0 : index
    %c0_24 = arith.constant 0 : index
    %41 = vector.load %arg8[%c0_22, %c0_23, %c0_24] : memref<1x1x128xf32, #tpu.memory_space<vmem>>, vector<1x1x128xf32>
    %42 = vector.shape_cast %41 : vector<1x1x128xf32> to vector<1x128xf32>
    %43 = vector.shape_cast %40 : vector<1x128xf32> to vector<1x1x128xf32>
    tpu.vector_store %arg8[%c0_22, %c0_23, %c0_24], %43 {strides = array<i32>} : memref<1x1x128xf32, #tpu.memory_space<vmem>>, vector<1x1x128xf32>,
    return
  }
  func.func @transform_0(%arg0: i32) -> (i32, i32, i32) {
    %c0_i32 = arith.constant 0 : i32
    %c0_i32_0 = arith.constant 0 : i32
    %c0_i32_1 = arith.constant 0 : i32
    return %arg0, %c0_i32, %c0_i32_0 : i32, i32, i32
  }
  func.func @transform_1(%arg0: i32) -> (i32, i32) {
    %c0_i32 = arith.constant 0 : i32
    %c0_i32_0 = arith.constant 0 : i32
    %c0_i32_1 = arith.constant 0 : i32
    return %c0_i32, %c0_i32_0 : i32, i32
  }
  func.func @transform_2(%arg0: i32) -> (i32, i32) {
    %c0_i32 = arith.constant 0 : i32
    %c0_i32_0 = arith.constant 0 : i32
    %c0_i32_1 = arith.constant 0 : i32
    return %c0_i32, %c0_i32_0 : i32, i32
  }
  func.func @transform_3(%arg0: i32) -> (i32, i32) {
    %c0_i32 = arith.constant 0 : i32
    %c0_i32_0 = arith.constant 0 : i32
    %c0_i32_1 = arith.constant 0 : i32
    return %c0_i32, %c0_i32_0 : i32, i32
  }
  func.func @transform_4(%arg0: i32) -> (i32, i32) {
    %c0_i32 = arith.constant 0 : i32
    %c0_i32_0 = arith.constant 0 : i32
    %c0_i32_1 = arith.constant 0 : i32
    return %c0_i32, %c0_i32_0 : i32, i32
  }
  func.func @transform_5(%arg0: i32) -> (i32, i32) {
    %c0_i32 = arith.constant 0 : i32
    %c0_i32_0 = arith.constant 0 : i32
    %c0_i32_1 = arith.constant 0 : i32
    return %c0_i32, %c0_i32_0 : i32, i32
  }
  func.func @transform_6(%arg0: i32) -> (i32, i32) {
    %c0_i32 = arith.constant 0 : i32
    %c0_i32_0 = arith.constant 0 : i32
    %c0_i32_1 = arith.constant 0 : i32
    return %c0_i32, %c0_i32_0 : i32, i32
  }
  func.func @transform_7(%arg0: i32) -> (i32, i32, i32) {
    %c0_i32 = arith.constant 0 : i32
    %c0_i32_0 = arith.constant 0 : i32
    %c0_i32_1 = arith.constant 0 : i32
    return %arg0, %c0_i32, %c0_i32_0 : i32, i32, i32
  }
}

</mosaic_0001>

<bundles_post_ra>
// kernel: _lambda_.11
= control target key start
LH: loop header
LB: loop body
LE: loop exit
PB: predicated region body
PF: predicated region fallthrough
CT: control target
= control target key end

     0   :  { %s862_s12 = smov 0   ;;  %s1038_s0 = inlined_call_operand.vmem [shape: f32[2,18,128], index: 0, kind: input, shape index: {}]   ;;  %s1039_s1 = inlined_call_operand.vmem [shape: f32[3,128,128], index: 1, kind: input, shape index: {}]   ;;  %s1040_s2 = inlined_call_operand.vmem [shape: f32[1,128], index: 2, kind: input, shape index: {}]   ;;  %s1041_s3 = inlined_call_operand.vmem [shape: f32[2,16,128], index: 3, kind: output, shape index: {}]  }
   0x1 LB: > { %s522_s13 = sadd.s32 4294967295, %s840_s12   ;;  %p526_p0 = scmp.ge.s32.totalorder %s840_s12, 1  ;;  %s840_s12 = sphi %s862_s12, %s13_s12  }
   0x2   : > { %p137_p1 = scmp.lt.s32.totalorder %s840_s12, 3 }
   0x4   : > { %p138_p2 = pnand %p526_p0, %p137_p1 }
   0x5   : > { %v173_v0 = vld [vmem:[%s1039_s1] sm:$0xff] (!%p138_p2)  ;;  %v174_v1 = vld [vmem:[%s1039_s1 + $0x8] sm:$0xff] (!%p138_p2)  ;;  %v175_v2 = vld [vmem:[%s1039_s1 + $0x10] sm:$0xff] (!%p138_p2)  ;;  %p161_p3 = scmp.lt.s32.totalorder (!%p138_p2), %s522_s13, 1 }
   0x6   : > { %141 = sbr.rel (%p138_p2) target bundleno = 292 (0x124), region = 32  ;;  %v757_v3 = vpack.c.bf16 (!%p138_p2), %v174_v1, %v173_v0  ;;  %v176_v4 = vld [vmem:[%s1039_s1 + $0x18] sm:$0xff] (!%p138_p2)  ;;  %v177_v6 = vld [vmem:[%s1039_s1 + $0x20] sm:$0xff] (!%p138_p2)  ;;  %v178_v7 = vld [vmem:[%s1039_s1 + $0x28] sm:$0xff] (!%p138_p2) }
   0x7   : > { %v761_v5 = vpack.c.bf16 (!%p138_p2), %v176_v4, %v175_v2  ;;  %v765_v8 = vpack.c.bf16 (!%p138_p2), %v178_v7, %v177_v6  ;;  %v530_v9 = vld [vmem:[%s1039_s1 + $0x80] sm:$0xff] (!%p138_p2)  ;;  %v531_v10 = vld [vmem:[%s1039_s1 + $0x88] sm:$0xff] (!%p138_p2)  ;;  %v179_v11 = vld [vmem:[%s1039_s1 + $0x30] sm:$0xff] (!%p138_p2) }
   0x8   : > { %758 = vmatprep.subr.bf16.mxu0 (!%p138_p2), %v757_v3  ;;  %v180_v12 = vld [vmem:[%s1039_s1 + $0x38] sm:$0xff] (!%p138_p2)  ;;  %v725_v13 = vpack.c.bf16 (!%p138_p2), %v531_v10, %v530_v9  ;;  %v532_v14 = vld [vmem:[%s1039_s1 + $0x90] sm:$0xff] (!%p138_p2)  ;;  %v534_v18 = vld [vmem:[%s1039_s1 + $0xa0] sm:$0xff] (!%p138_p2) }
   0x9   : > { %760 = vmatpush3.bf16.msra.mxu0 (!%p138_p2), %v757_v3  ;;  %v533_v16 = vld [vmem:[%s1039_s1 + $0x98] sm:$0xff] (!%p138_p2)  ;;  %v769_v19 = vpack.c.bf16 (!%p138_p2), %v180_v12, %v179_v11  ;;  %v535_v20 = vld [vmem:[%s1039_s1 + $0xa8] sm:$0xff] (!%p138_p2)  ;;  %v181_v21 = vld [vmem:[%s1039_s1 + $0x40] sm:$0xff] (!%p138_p2) }
   0xa   : > { %762 = vmatprep.subr.bf16.mxu0 (!%p138_p2), %v761_v5  ;;  %726 = vmatprep.subr.bf16.mxu1 (!%p138_p2), %v725_v13  ;;  %v729_v17 = vpack.c.bf16 (!%p138_p2), %v533_v16, %v532_v14  ;;  %v182_v22 = vld [vmem:[%s1039_s1 + $0x48] sm:$0xff] (!%p138_p2)  ;;  %v733_v23 = vpack.c.bf16 (!%p138_p2), %v535_v20, %v534_v18  ;;  %v536_v24 = vld [vmem:[%s1039_s1 + $0xb0] sm:$0xff] (!%p138_p2)  ;;  %v537_v25 = vld [vmem:[%s1039_s1 + $0xb8] sm:$0xff] (!%p138_p2) }
   0xb   : > { %728 = vmatpush3.bf16.msra.mxu1 (!%p138_p2), %v725_v13  ;;  %v773_v26 = vpack.c.bf16 (!%p138_p2), %v182_v22, %v181_v21  ;;  %v183_v27 = vld [vmem:[%s1039_s1 + $0x50] sm:$0xff] (!%p138_p2)  ;;  %v184_v28 = vld [vmem:[%s1039_s1 + $0x58] sm:$0xff] (!%p138_p2)  ;;  %v737_v29 = vpack.c.bf16 (!%p138_p2), %v537_v25, %v536_v24  ;;  %v538_v30 = vld [vmem:[%s1039_s1 + $0xc0] sm:$0xff] (!%p138_p2) }
   0xc   : > { %730 = vmatprep.subr.bf16.mxu1 (!%p138_p2), %v729_v17  ;;  %v539_v31 = vld [vmem:[%s1039_s1 + $0xc8] sm:$0xff] (!%p138_p2)  ;;  %v777_v33 = vpack.c.bf16 (!%p138_p2), %v184_v28, %v183_v27  ;;  %v185_v34 = vld [vmem:[%s1039_s1 + $0x60] sm:$0xff] (!%p138_p2)  ;;  %v540_v37 = vld [vmem:[%s1039_s1 + $0xd0] sm:$0xff] (!%p138_p2) }
   0xd   : > { %s1043_s13 = smov (!%p161_p3, %s522_s13), 1  ;;  %764 = vmatpush3.bf16.msra.mxu0 %v761_v5  ;;  %v186_v35 = vld [vmem:[%s1039_s1 + $0x68] sm:$0xff]  ;;  %v741_v36 = vpack.c.bf16 %v539_v31, %v538_v30  ;;  %v541_v38 = vld [vmem:[%s1039_s1 + $0xd8] sm:$0xff]  ;;  %v187_v40 = vld [vmem:[%s1039_s1 + $0x70] sm:$0xff] }
   0xe   : > { %s825_s26 = smul.u32 24, %s1043_s13  ;;  %766 = vmatprep.subr.bf16.mxu0 %v765_v8  ;;  %v781_v39 = vpack.c.bf16 %v186_v35, %v185_v34  ;;  %v188_v41 = vld [vmem:[%s1039_s1 + $0x78] sm:$0xff]  ;;  %v745_v42 = vpack.c.bf16 %v541_v38, %v540_v37  ;;  %v542_v43 = vld [vmem:[%s1039_s1 + $0xe0] sm:$0xff]  ;;  %v543_v44 = vld [vmem:[%s1039_s1 + $0xe8] sm:$0xff]  ;;  %s565_s19 = sshll.u32 %s1043_s13, 4 }
   0xf   : > { %732 = vmatpush3.bf16.msra.mxu1 %v729_v17  ;;  %v785_v45 = vpack.c.bf16 %v188_v41, %v187_v40  ;;  %v546_v46 = vld [vmem:[%s1039_s1 + $0x100] sm:$0xff]  ;;  %v547_v47 = vld [vmem:[%s1039_s1 + $0x108] sm:$0xff]  ;;  %v749_v48 = vpack.c.bf16 %v543_v44, %v542_v43  ;;  %v544_v49 = vld [vmem:[%s1039_s1 + $0xf0] sm:$0xff]  ;;  %s170_s22 = scalar_lea.vmem %s1041_s3, %s565_s19 }
  0x10   : > { %s906_s10 = scalar_lea.vmem %s1038_s0, %s825_s26  ;;  %734 = vmatprep.subr.bf16.mxu1 %v733_v23  ;;  %v545_v50 = vld [vmem:[%s1039_s1 + $0xf8] sm:$0xff]  ;;  %v789_v51 = vpack.c.bf16 %v547_v47, %v546_v46  ;;  %v548_v52 = vld [vmem:[%s1039_s1 + $0x110] sm:$0xff]  ;;  %v550_v58 = vld [vmem:[%s1039_s1 + $0x120] sm:$0xff] }
  0x11   : > { %v171_v15 = vld [vmem:[%s906_s10] sm:$0xff]  ;;  %768 = vmatpush3.bf16.msra.mxu0 %v765_v8  ;;  %v549_v53 = vld [vmem:[%s1039_s1 + $0x118] sm:$0xff]  ;;  %v753_v54 = vpack.c.bf16 %v545_v50, %v544_v49  ;;  %v172_v55 = vld [vmem:[%s906_s10 + $0x8] sm:$0xff] }
  0x12   : > { %687 = vmatprep.mubr.f32.mxu0 %v171_v15  ;;  %770 = vmatprep.subr.bf16.mxu0 %v769_v19  ;;  %v189_v32 = vld [vmem:[%s906_s10 + $0x1] sm:$0xff]  ;;  %v793_v56 = vpack.c.bf16 %v549_v53, %v548_v52  ;;  %v190_v61 = vld [vmem:[%s906_s10 + $0x9] sm:$0xff]  ;;  %v553_v63 = vld [vmem:[%s1039_s1 + $0x138] sm:$0xff] }
  0x13   : > { %736 = vmatpush3.bf16.msra.mxu1 %v733_v23  ;;  %652 = vmatprep.mubr.f32.mxu1 %v189_v32  ;;  %v358_v57 = vld [vmem:[%s906_s10 + $0x2] sm:$0xff]  ;;  %v552_v62 = vld [vmem:[%s1039_s1 + $0x130] sm:$0xff]  ;;  %v557_v5 = vld [vmem:[%s1039_s1 + $0x158] sm:$0xff] }
  0x14   : > { %738 = vmatprep.subr.bf16.mxu1 %v737_v29  ;;  %v551_v59 = vld [vmem:[%s1039_s1 + $0x128] sm:$0xff]  ;;  %v801_v0 = vpack.c.bf16 %v553_v63, %v552_v62  ;;  %v554_v1 = vld [vmem:[%s1039_s1 + $0x140] sm:$0xff]  ;;  %v556_v4 = vld [vmem:[%s1039_s1 + $0x150] sm:$0xff] }
  0x15   : > { %772 = vmatpush3.bf16.msra.mxu0 %v769_v19  ;;  %v797_v60 = vpack.c.bf16 %v551_v59, %v550_v58  ;;  %v555_v2 = vld [vmem:[%s1039_s1 + $0x148] sm:$0xff]  ;;  %v809_v6 = vpack.c.bf16 %v557_v5, %v556_v4  ;;  %v558_v7 = vld [vmem:[%s1039_s1 + $0x160] sm:$0xff]  ;;  %v560_v10 = vld [vmem:[%s1039_s1 + $0x170] sm:$0xff] }
  0x16   : > { %774 = vmatprep.subr.bf16.mxu0 %v773_v26  ;;  %v805_v3 = vpack.c.bf16 %v555_v2, %v554_v1  ;;  %v559_v8 = vld [vmem:[%s1039_s1 + $0x168] sm:$0xff]  ;;  %v561_v11 = vld [vmem:[%s1039_s1 + $0x178] sm:$0xff]  ;;  %v562_v17 = vld [vmem:[%s1040_s2] ss:$0 sm:$0xff] }
  0x17   : > { %740 = vmatpush3.bf16.msra.mxu1 %v737_v29  ;;  %v813_v9 = vpack.c.bf16 %v559_v8, %v558_v7  ;;  %v817_v12 = vpack.c.bf16 %v561_v11, %v560_v10  ;;  %v359_v13 = vld [vmem:[%s906_s10 + $0xa] sm:$0xff] }
  0x18   : > { %742 = vmatprep.subr.bf16.mxu1 %v741_v36 }
  0x19   : > { %776 = vmatpush3.bf16.msra.mxu0 %v773_v26 }
  0x1a   : > { %778 = vmatprep.subr.bf16.mxu0 %v777_v33 }
  0x1b   : > { %744 = vmatpush3.bf16.msra.mxu1 %v741_v36 }
  0x1c   : > { %746 = vmatprep.subr.bf16.mxu1 %v745_v42 }
  0x1d   : > { %780 = vmatpush3.bf16.msra.mxu0 %v777_v33 }
  0x1e   : > { %782 = vmatprep.subr.bf16.mxu0 %v781_v39 }
  0x1f   : > { %748 = vmatpush3.bf16.msra.mxu1 %v745_v42 }
  0x20   : > { %750 = vmatprep.subr.bf16.mxu1 %v749_v48 }
  0x21   : > { %784 = vmatpush3.bf16.msra.mxu0 %v781_v39 }
  0x22   : > { %786 = vmatprep.subr.bf16.mxu0 %v785_v45 }
  0x23   : > { %752 = vmatpush3.bf16.msra.mxu1 %v749_v48 }
  0x24   : > { %754 = vmatprep.subr.bf16.mxu1 %v753_v54 }
  0x25   : > { %788 = vmatpush3.bf16.msra.mxu0 %v785_v45 }
  0x26   : > { %790 = vmatprep.subr.bf16.mxu0 %v789_v51 }
  0x27   : > { %756 = vmatpush3.bf16.msra.mxu1 %v753_v54 }
  0x28   : > { %688 = vmatmul.mubr.f32.vlgmr.msra.gmra.mrb[0].mxu0 %v172_v55 }
  0x29   : > { %792 = vmatpush3.bf16.msra.mxu0 %v789_v51  ;;  %722 = vmatprep.mubr.f32.mxu0 %v358_v57 }
  0x2a   : > { %794 = vmatprep.subr.bf16.mxu0 %v793_v56  ;;  %653 = vmatmul.mubr.f32.vlgmr.msra.gmra.mrb[0].mxu1 %v190_v61 }
  0x2d   : > { %796 = vmatpush3.bf16.msra.mxu0 %v793_v56 }
  0x2e   : > { %798 = vmatprep.subr.bf16.mxu0 %v797_v60 }
  0x31   : > { %800 = vmatpush3.bf16.msra.mxu0 %v797_v60 }
  0x32   : > { %802 = vmatprep.subr.bf16.mxu0 %v801_v0 }
  0x35   : > { %804 = vmatpush3.bf16.msra.mxu0 %v801_v0 }
  0x36   : > { %806 = vmatprep.subr.bf16.mxu0 %v805_v3 }
  0x39   : > { %808 = vmatpush3.bf16.msra.mxu0 %v805_v3 }
  0x3a   : > { %810 = vmatprep.subr.bf16.mxu0 %v809_v6 }
  0x3d   : > { %812 = vmatpush3.bf16.msra.mxu0 %v809_v6 }
  0x3e   : > { %814 = vmatprep.subr.bf16.mxu0 %v813_v9 }
  0x41   : > { %816 = vmatpush3.bf16.msra.mxu0 %v813_v9 }
  0x42   : > { %818 = vmatprep.subr.bf16.mxu0 %v817_v12 }
  0x45   : > { %820 = vmatpush3.bf16.msra.mxu0 %v817_v12 }
  0x48   : > { %723 = vmatmul.mubr.f32.vlgmr.msra.gmra.mrb[0].mxu0 %v359_v13 }
  0xfd   : > { %v654_v14 = vpop.f32.mrb[0].mxu1 }
  0xfe   : > { %v274_v15 = vpop.f32.mrb[1].mxu1 }
 0x11b   : > { %v724_v16 = vpop.f32.mrb[0].mxu0 }
 0x11c   : > { %v821_v18 = vadd.f32 %v724_v16, %v654_v14  ;;  %v443_v19 = vpop.f32.mrb[1].mxu0 }
 0x11d   : > { %v822_v20 = vadd.f32 %v443_v19, %v274_v15 }
 0x11e   : > { %v462_v21 = vadd.f32 %v821_v18, %v562_v17 }
 0x11f   : > { %v461_v22 = vadd.f32 %v822_v20, %v562_v17 }
 0x120   : > { %v464_v23 = vmax.f32 %v462_v21, 0.0 }
 0x121   : > { %v463_v24 = vmax.f32 %v461_v22, 0.0 }
 0x122   : > { %466 = vst [vmem:[%s170_s22 + $0x8] sm:$0xff] %v464_v23 }
 0x123   : > { %465 = vst [vmem:[%s170_s22] sm:$0xff] %v463_v24 }
 0x124 PF: > { %s13_s12 = sadd.s32 1, %s840_s12  }
 0x125   : > { %p10_p4 = scmp.ge.s32.totalorder %s13_s12, 4  }
 0x127   :  { %12 = sbr.rel (!%p10_p4) target bundleno = 1 (0x1), region = 64 }

// kernel: _lambda_.10
= control target key start
LH: loop header
LB: loop body
LE: loop exit
PB: predicated region body
PF: predicated region fallthrough
CT: control target
= control target key end

     0   :  { %8 = vsyncpa [#allocation3], 0  ;;  %s907_s12 = smov 0   ;;  %s978_s0 = inlined_call_operand.vmem [shape: f32[2,18,128], index: 0, kind: input, shape index: {}]   ;;  %s979_s1 = inlined_call_operand.hbm [shape: f32[3,128,128], index: 1, kind: input, shape index: {}]   ;;  %s980_s2 = inlined_call_operand.vmem [shape: f32[1,128], index: 2, kind: input, shape index: {}]   ;;  %s981_s3 = inlined_call_operand.vmem [shape: f32[2,16,128], index: 3, kind: output, shape index: {}]  }
   0x1 LB: > { %s913_s13 = sadd.s32 4294967295, %s882_s12   ;;  %p551_p0 = scmp.ge.s32.totalorder %s882_s12, 1  ;;  %s882_s12 = sphi %s907_s12, %s14_s12  }
   0x2   : > { %p113_p1 = scmp.lt.s32.totalorder %s882_s12, 3  ;;  %s884_s14 = smov [#allocation2]  }
   0x3   : > { %s125_s15 = sshll.u32 %s884_s14, 4  ;;  %p982_p3 = scmp.eq.s32.totalorder %s913_s13, 0  ;;  %s126_s15 = int_to_ptr.vmem [resolvable:$true] %s125_s15 }
   0x4   : > { %p917_p2 = pnand %p551_p0, %p113_p1  ;;  %s844_s20 = scalar_lea.hbm %s979_s1, 6144 }
   0x5   : > { %p845_p6 = scmp.ne.s32.totalorder %s979_s1, %s844_s20  ;;  %p851_p10 = scmp.lt.u32.totalorder %s844_s20, %s979_s1 }
   0x6   : > { %s984_s16 = scalar_select %p917_p2, 1, 0 }
   0x7   : > { %p827_p4 = pneg %p917_p2 }
   0x9   : > { %p926_p5 = pnand %p982_p3, %p827_p4 }
   0xb   : > { %p846_p7 = pneg %p926_p5 }
   0xd   : > { %p847_p8 = pnand %p846_p7, %p845_p6 }
   0xf   : > { %p848_p9 = pneg %p847_p8 }
  0x11   : > { %p853_p11 = pnand %p851_p10, %p848_p9 }
  0x13   : > { %856 = shalt.err (!%p853_p11)
}
  0x14   : > { %s857_s25 = scalar_lea.vmem %s126_s15, 6144  ;;  %p865_p1 = scmp.lt.s32.totalorder %s126_s15, %s126_s15 }
  0x15   : > { %p858_p12 = scmp.ne.s32.totalorder %s126_s15, %s857_s25  ;;  %p866_p4 = scmp.lt.s32.totalorder %s857_s25, %s857_s25 }
  0x17   : > { %p860_p13 = pnand %p858_p12, %p846_p7  ;;  %p867_p3 = por %p866_p4, %p865_p1 }
  0x19   : > { %p861_p0 = pneg %p860_p13 }
  0x1b   : > { %p868_p2 = pnand %p867_p3, %p861_p0 }
  0x1d   : > { %871 = shalt.err (!%p868_p2)
}
  0x1e   : > { %s885_s26 = smov 128   ;;  %s886_s27 = smov 8  }
  0x1f   : > { %830 = dma.hbm_to_vmem [thread:$0]  (!%p926_p5), %s979_s1, 6144, %s126_s15, [#allocation3], %s885_s26, %s885_s26, %s886_s27  }
  0x20   : > { %p986_p6 = scmp.ne.s32.totalorder %s984_s16, 0 }
  0x21   : > { %p987_p8 = scmp.eq.s32.totalorder (!%p986_p6), %s913_s13, 0 }
  0x22   : > { %152 = sbr.rel (%p986_p6) target bundleno = 329 (0x149), region = 32 }
  0x29   : > { %877 = dma.done.wait (%p987_p8), [#allocation3], 6144   ;;  %p988_p7 = pmov %p987_p8 }
  0x2a   : > { %p176_p2 = scmp.lt.s32.totalorder %s913_s13, 1  ;;  %v188_v0 = vld [vmem:[#allocation2] sm:$0xff]  ;;  %v189_v1 = vld [vmem:[#allocation2 + $0x8] sm:$0xff]  ;;  %v190_v2 = vld [vmem:[#allocation2 + $0x10] sm:$0xff] }
  0x2b   : > { %879 = vsyncadd (%p988_p7), [#allocation3], 4294961152  ;;  %v754_v3 = vpack.c.bf16 %v189_v1, %v188_v0  ;;  %v191_v4 = vld [vmem:[#allocation2 + $0x18] sm:$0xff]  ;;  %v192_v6 = vld [vmem:[#allocation2 + $0x20] sm:$0xff] }
  0x2c   : > { %s990_s13 = smov (!%p176_p2, %s913_s13), 1  ;;  %v758_v5 = vpack.c.bf16 %v191_v4, %v190_v2  ;;  %v193_v7 = vld [vmem:[#allocation2 + $0x28] sm:$0xff]  ;;  %v207_v9 = vld [vmem:[#allocation2 + $0x80] sm:$0xff]  ;;  %v194_v11 = vld [vmem:[#allocation2 + $0x30] sm:$0xff] }
  0x2d   : > { %s822_s30 = smul.u32 24, %s990_s13  ;;  %755 = vmatprep.subr.bf16.mxu0 %v754_v3  ;;  %v762_v8 = vpack.c.bf16 %v193_v7, %v192_v6  ;;  %v208_v10 = vld [vmem:[#allocation2 + $0x88] sm:$0xff]  ;;  %v195_v12 = vld [vmem:[#allocation2 + $0x38] sm:$0xff]  ;;  %v209_v15 = vld [vmem:[#allocation2 + $0x90] sm:$0xff]  ;;  %s562_s9 = sshll.u32 %s990_s13, 4 }
  0x2e   : > { %757 = vmatpush3.bf16.msra.mxu0 %v754_v3  ;;  %v722_v13 = vpack.c.bf16 %v208_v10, %v207_v9  ;;  %v210_v16 = vld [vmem:[#allocation2 + $0x98] sm:$0xff]  ;;  %v211_v18 = vld [vmem:[#allocation2 + $0xa0] sm:$0xff]  ;;  %v766_v19 = vpack.c.bf16 %v195_v12, %v194_v11  ;;  %v212_v20 = vld [vmem:[#allocation2 + $0xa8] sm:$0xff]  ;;  %s185_s14 = scalar_lea.vmem %s981_s3, %s562_s9 }
  0x2f   : > { %s960_s6 = scalar_lea.vmem %s978_s0, %s822_s30  ;;  %759 = vmatprep.subr.bf16.mxu0 %v758_v5  ;;  %v726_v17 = vpack.c.bf16 %v210_v16, %v209_v15  ;;  %v196_v21 = vld [vmem:[#allocation2 + $0x40] sm:$0xff]  ;;  %v197_v22 = vld [vmem:[#allocation2 + $0x48] sm:$0xff]  ;;  %v730_v23 = vpack.c.bf16 %v212_v20, %v211_v18  ;;  %v213_v24 = vld [vmem:[#allocation2 + $0xb0] sm:$0xff] }
  0x30   : > { %v186_v14 = vld [vmem:[%s960_s6] sm:$0xff]  ;;  %723 = vmatprep.subr.bf16.mxu1 %v722_v13  ;;  %v214_v25 = vld [vmem:[#allocation2 + $0xb8] sm:$0xff]  ;;  %v770_v26 = vpack.c.bf16 %v197_v22, %v196_v21  ;;  %v198_v27 = vld [vmem:[#allocation2 + $0x50] sm:$0xff] }
  0x31   : > { %684 = vmatprep.mubr.f32.mxu0 %v186_v14  ;;  %725 = vmatpush3.bf16.msra.mxu1 %v722_v13  ;;  %v199_v28 = vld [vmem:[#allocation2 + $0x58] sm:$0xff]  ;;  %v734_v29 = vpack.c.bf16 %v214_v25, %v213_v24  ;;  %v215_v30 = vld [vmem:[#allocation2 + $0xc0] sm:$0xff]  ;;  %v216_v31 = vld [vmem:[#allocation2 + $0xc8] sm:$0xff] }
  0x32   : > { %761 = vmatpush3.bf16.msra.mxu0 %v758_v5  ;;  %727 = vmatprep.subr.bf16.mxu1 %v726_v17  ;;  %v204_v32 = vld [vmem:[%s960_s6 + $0x1] sm:$0xff]  ;;  %v774_v33 = vpack.c.bf16 %v199_v28, %v198_v27  ;;  %v738_v36 = vpack.c.bf16 %v216_v31, %v215_v30  ;;  %v217_v37 = vld [vmem:[#allocation2 + $0xd0] sm:$0xff]  ;;  %v218_v38 = vld [vmem:[#allocation2 + $0xd8] sm:$0xff] }
  0x33   : > { %763 = vmatprep.subr.bf16.mxu0 %v762_v8  ;;  %v200_v34 = vld [vmem:[#allocation2 + $0x60] sm:$0xff]  ;;  %v201_v35 = vld [vmem:[#allocation2 + $0x68] sm:$0xff]  ;;  %649 = vmatprep.mubr.f32.mxu1 %v204_v32  ;;  %v202_v40 = vld [vmem:[#allocation2 + $0x70] sm:$0xff]  ;;  %v742_v42 = vpack.c.bf16 %v218_v38, %v217_v37 }
  0x34   : > { %v778_v39 = vpack.c.bf16 %v201_v35, %v200_v34  ;;  %v203_v41 = vld [vmem:[#allocation2 + $0x78] sm:$0xff]  ;;  %v219_v43 = vld [vmem:[#allocation2 + $0xe0] sm:$0xff]  ;;  %v220_v44 = vld [vmem:[#allocation2 + $0xe8] sm:$0xff] }
  0x35   : > { %729 = vmatpush3.bf16.msra.mxu1 %v726_v17  ;;  %v782_v45 = vpack.c.bf16 %v203_v41, %v202_v40  ;;  %v376_v46 = vld [vmem:[#allocation2 + $0x100] sm:$0xff]  ;;  %v377_v47 = vld [vmem:[#allocation2 + $0x108] sm:$0xff]  ;;  %v746_v48 = vpack.c.bf16 %v220_v44, %v219_v43  ;;  %v221_v49 = vld [vmem:[#allocation2 + $0xf0] sm:$0xff] }
  0x36   : > { %765 = vmatpush3.bf16.msra.mxu0 %v762_v8  ;;  %731 = vmatprep.subr.bf16.mxu1 %v730_v23  ;;  %v222_v50 = vld [vmem:[#allocation2 + $0xf8] sm:$0xff]  ;;  %v786_v51 = vpack.c.bf16 %v377_v47, %v376_v46  ;;  %v378_v52 = vld [vmem:[#allocation2 + $0x110] sm:$0xff]  ;;  %v187_v55 = vld [vmem:[%s960_s6 + $0x8] sm:$0xff] }
  0x37   : > { %767 = vmatprep.subr.bf16.mxu0 %v766_v19  ;;  %v379_v53 = vld [vmem:[#allocation2 + $0x118] sm:$0xff]  ;;  %v750_v54 = vpack.c.bf16 %v222_v50, %v221_v49  ;;  %v373_v57 = vld [vmem:[%s960_s6 + $0x2] sm:$0xff]  ;;  %v382_v62 = vld [vmem:[#allocation2 + $0x130] sm:$0xff] }
  0x38   : > { %v790_v56 = vpack.c.bf16 %v379_v53, %v378_v52  ;;  %v380_v58 = vld [vmem:[#allocation2 + $0x120] sm:$0xff]  ;;  %v381_v59 = vld [vmem:[#allocation2 + $0x128] sm:$0xff]  ;;  %v383_v63 = vld [vmem:[#allocation2 + $0x138] sm:$0xff] }
  0x39   : > { %733 = vmatpush3.bf16.msra.mxu1 %v730_v23  ;;  %v794_v60 = vpack.c.bf16 %v381_v59, %v380_v58  ;;  %v205_v61 = vld [vmem:[%s960_s6 + $0x9] sm:$0xff]  ;;  %v798_v0 = vpack.c.bf16 %v383_v63, %v382_v62  ;;  %v384_v1 = vld [vmem:[#allocation2 + $0x140] sm:$0xff]  ;;  %v387_v5 = vld [vmem:[#allocation2 + $0x158] sm:$0xff] }
  0x3a   : > { %769 = vmatpush3.bf16.msra.mxu0 %v766_v19  ;;  %735 = vmatprep.subr.bf16.mxu1 %v734_v29  ;;  %v385_v2 = vld [vmem:[#allocation2 + $0x148] sm:$0xff]  ;;  %v386_v4 = vld [vmem:[#allocation2 + $0x150] sm:$0xff]  ;;  %v388_v7 = vld [vmem:[#allocation2 + $0x160] sm:$0xff] }
  0x3b   : > { %771 = vmatprep.subr.bf16.mxu0 %v770_v26  ;;  %v802_v3 = vpack.c.bf16 %v385_v2, %v384_v1  ;;  %v806_v6 = vpack.c.bf16 %v387_v5, %v386_v4  ;;  %v389_v8 = vld [vmem:[#allocation2 + $0x168] sm:$0xff]  ;;  %v390_v10 = vld [vmem:[#allocation2 + $0x170] sm:$0xff]  ;;  %v391_v11 = vld [vmem:[#allocation2 + $0x178] sm:$0xff] }
  0x3c   : > { %v810_v9 = vpack.c.bf16 %v389_v8, %v388_v7  ;;  %v814_v12 = vpack.c.bf16 %v391_v11, %v390_v10  ;;  %v374_v13 = vld [vmem:[%s960_s6 + $0xa] sm:$0xff]  ;;  %v559_v17 = vld [vmem:[%s980_s2] ss:$0 sm:$0xff] }
  0x3d   : > { %737 = vmatpush3.bf16.msra.mxu1 %v734_v29 }
  0x3e   : > { %773 = vmatpush3.bf16.msra.mxu0 %v770_v26  ;;  %739 = vmatprep.subr.bf16.mxu1 %v738_v36 }
  0x3f   : > { %775 = vmatprep.subr.bf16.mxu0 %v774_v33 }
  0x41   : > { %741 = vmatpush3.bf16.msra.mxu1 %v738_v36 }
  0x42   : > { %777 = vmatpush3.bf16.msra.mxu0 %v774_v33  ;;  %743 = vmatprep.subr.bf16.mxu1 %v742_v42 }
  0x43   : > { %779 = vmatprep.subr.bf16.mxu0 %v778_v39 }
  0x45   : > { %745 = vmatpush3.bf16.msra.mxu1 %v742_v42 }
  0x46   : > { %781 = vmatpush3.bf16.msra.mxu0 %v778_v39  ;;  %747 = vmatprep.subr.bf16.mxu1 %v746_v48 }
  0x47   : > { %783 = vmatprep.subr.bf16.mxu0 %v782_v45 }
  0x49   : > { %749 = vmatpush3.bf16.msra.mxu1 %v746_v48 }
  0x4a   : > { %785 = vmatpush3.bf16.msra.mxu0 %v782_v45  ;;  %751 = vmatprep.subr.bf16.mxu1 %v750_v54 }
  0x4b   : > { %787 = vmatprep.subr.bf16.mxu0 %v786_v51 }
  0x4d   : > { %685 = vmatmul.mubr.f32.vlgmr.msra.gmra.mrb[0].mxu0 %v187_v55  ;;  %753 = vmatpush3.bf16.msra.mxu1 %v750_v54 }
  0x4e   : > { %789 = vmatpush3.bf16.msra.mxu0 %v786_v51  ;;  %719 = vmatprep.mubr.f32.mxu0 %v373_v57 }
  0x4f   : > { %791 = vmatprep.subr.bf16.mxu0 %v790_v56 }
  0x50   : > { %650 = vmatmul.mubr.f32.vlgmr.msra.gmra.mrb[0].mxu1 %v205_v61 }
  0x52   : > { %793 = vmatpush3.bf16.msra.mxu0 %v790_v56 }
  0x53   : > { %795 = vmatprep.subr.bf16.mxu0 %v794_v60 }
  0x56   : > { %797 = vmatpush3.bf16.msra.mxu0 %v794_v60 }
  0x57   : > { %799 = vmatprep.subr.bf16.mxu0 %v798_v0 }
  0x5a   : > { %801 = vmatpush3.bf16.msra.mxu0 %v798_v0 }
  0x5b   : > { %803 = vmatprep.subr.bf16.mxu0 %v802_v3 }
  0x5e   : > { %805 = vmatpush3.bf16.msra.mxu0 %v802_v3 }
  0x5f   : > { %807 = vmatprep.subr.bf16.mxu0 %v806_v6 }
  0x62   : > { %809 = vmatpush3.bf16.msra.mxu0 %v806_v6 }
  0x63   : > { %811 = vmatprep.subr.bf16.mxu0 %v810_v9 }
  0x66   : > { %813 = vmatpush3.bf16.msra.mxu0 %v810_v9 }
  0x67   : > { %815 = vmatprep.subr.bf16.mxu0 %v814_v12 }
  0x6a   : > { %817 = vmatpush3.bf16.msra.mxu0 %v814_v12 }
  0x6d   : > { %720 = vmatmul.mubr.f32.vlgmr.msra.gmra.mrb[0].mxu0 %v374_v13 }
 0x123   : > { %v651_v14 = vpop.f32.mrb[0].mxu1 }
 0x124   : > { %v289_v15 = vpop.f32.mrb[1].mxu1 }
 0x140   : > { %v721_v16 = vpop.f32.mrb[0].mxu0 }
 0x141   : > { %v818_v18 = vadd.f32 %v721_v16, %v651_v14  ;;  %v458_v19 = vpop.f32.mrb[1].mxu0 }
 0x142   : > { %v819_v20 = vadd.f32 %v458_v19, %v289_v15 }
 0x143   : > { %v477_v21 = vadd.f32 %v818_v18, %v559_v17 }
 0x144   : > { %v476_v22 = vadd.f32 %v819_v20, %v559_v17 }
 0x145   : > { %v479_v23 = vmax.f32 %v477_v21, 0.0 }
 0x146   : > { %v478_v24 = vmax.f32 %v476_v22, 0.0 }
 0x147   : > { %481 = vst [vmem:[%s185_s14 + $0x8] sm:$0xff] %v479_v23 }
 0x148   : > { %480 = vst [vmem:[%s185_s14] sm:$0xff] %v478_v24 }
 0x149 PF: > { %s14_s12 = sadd.s32 1, %s882_s12  }
 0x14a   : > { %p11_p3 = scmp.ge.s32.totalorder %s14_s12, 4  }
 0x14c   :  { %13 = sbr.rel (!%p11_p3) target bundleno = 1 (0x1), region = 69 }
 0x153   :  { %503 = vsyncpa [#allocation3], 1 }
 0x154   :  { %505 = vsyncpa [#allocation3 + $0x1], 1 }

// kernel: _lambda_.13
= control target key start
LH: loop header
LB: loop body
LE: loop exit
PB: predicated region body
PF: predicated region fallthrough
CT: control target
= control target key end

     0   :  { %s922_s18 = smov 0   ;;  %s1151_s0 = inlined_call_operand.vmem [shape: f32[2,17,128], index: 0, kind: input, shape index: {}]   ;;  %s1152_s1 = inlined_call_operand.vmem [shape: f32[3,128,128], index: 1, kind: input, shape index: {}]   ;;  %s1153_s2 = inlined_call_operand.vmem [shape: f32[1,128], index: 2, kind: input, shape index: {}]   ;;  %s1154_s3 = inlined_call_operand.vmem [shape: f32[1,128], index: 3, kind: input, shape index: {}]   ;;  %s1155_s4 = inlined_call_operand.vmem [shape: f32[1,128], index: 4, kind: input, shape index: {}]   ;;  %s1156_s5 = inlined_call_operand.vmem [shape: f32[2,8,128], index: 5, kind: output, shape index: {}]  }
   0x1 LB: > { %s592_s19 = sadd.s32 4294967295, %s887_s18   ;;  %p596_p0 = scmp.ge.s32.totalorder %s887_s18, 1  ;;  %s887_s18 = sphi %s922_s18, %s15_s18  }
   0x2   : > { %p187_p1 = scmp.lt.s32.totalorder %s887_s18, 3 }
   0x4   : > { %p188_p2 = pnand %p596_p0, %p187_p1 }
   0x5   : > { %v602_v0 = vld [vmem:[%s1152_s1 + $0x80] sm:$0xff] (!%p188_p2)  ;;  %v603_v1 = vld [vmem:[%s1152_s1 + $0x88] sm:$0xff] (!%p188_p2)  ;;  %v889_v3 = vmov (!%p188_p2), 0.0|0.0   ;;  %v604_v6 = vld [vmem:[%s1152_s1 + $0x90] sm:$0xff] (!%p188_p2)  ;;  %vm890_vm0 = vmmov (!%p188_p2), 0   ;;  %v891_v11 = vmov (!%p188_p2), 0.0   ;;  %v225_v28 = vlaneseq (!%p188_p2) }
   0x6   : > { %191 = sbr.rel (%p188_p2) target bundleno = 290 (0x122), region = 40  ;;  %v248_v2 = vld [vmem:[%s1152_s1] sm:$0xff] (!%p188_p2)  ;;  %797 = vmatprep.subr.bf16.mxu0 (!%p188_p2), %v889_v3  ;;  %v798_v4 = vpack.c.bf16 (!%p188_p2), %v603_v1, %v602_v0  ;;  %821 = vmatprep.subr.bf16.mxu1 (!%p188_p2), %v889_v3  ;;  %v249_v5 = vld [vmem:[%s1152_s1 + $0x8] sm:$0xff] (!%p188_p2)  ;;  %v605_v7 = vld [vmem:[%s1152_s1 + $0x98] sm:$0xff] (!%p188_p2)  ;;  %p214_p3 = scmp.lt.s32.totalorder (!%p188_p2), %s592_s19, 1 }
   0x7   : > { %v822_v8 = vpack.c.bf16 (!%p188_p2), %v249_v5, %v248_v2  ;;  %v250_v9 = vld [vmem:[%s1152_s1 + $0x10] sm:$0xff] (!%p188_p2)  ;;  %v251_v10 = vld [vmem:[%s1152_s1 + $0x18] sm:$0xff] (!%p188_p2)  ;;  %724 = vmatprep.mubr.msk.f32.mxu0 (!%p188_p2), %vm890_vm0, %v891_v11  ;;  %759 = vmatprep.mubr.msk.f32.mxu1 (!%p188_p2), %vm890_vm0, %v891_v11  ;;  %v801_v12 = vpack.c.bf16 (!%p188_p2), %v605_v7, %v604_v6  ;;  %v606_v14 = vld [vmem:[%s1152_s1 + $0xa0] sm:$0xff] (!%p188_p2)  ;;  %v226_v35 = vshrl.u32 (!%p188_p2), %v225_v28, 7 }
   0x8   : > { %799 = vmatpush3.bf16.msra.mxu0 (!%p188_p2), %v798_v4  ;;  %v825_v13 = vpack.c.bf16 (!%p188_p2), %v251_v10, %v250_v9  ;;  %v607_v15 = vld [vmem:[%s1152_s1 + $0xa8] sm:$0xff] (!%p188_p2)  ;;  %v252_v16 = vld [vmem:[%s1152_s1 + $0x20] sm:$0xff] (!%p188_p2)  ;;  %v608_v20 = vld [vmem:[%s1152_s1 + $0xb0] sm:$0xff] (!%p188_p2) }
   0x9   : > { %823 = vmatpush3.bf16.msra.mxu1 (!%p188_p2), %v822_v8  ;;  %800 = vmatprep.subr.bf16.mxu0 (!%p188_p2), %v889_v3  ;;  %v253_v17 = vld [vmem:[%s1152_s1 + $0x28] sm:$0xff] (!%p188_p2)  ;;  %v804_v18 = vpack.c.bf16 (!%p188_p2), %v607_v15, %v606_v14  ;;  %v609_v21 = vld [vmem:[%s1152_s1 + $0xb8] sm:$0xff] (!%p188_p2)  ;;  %v254_v22 = vld [vmem:[%s1152_s1 + $0x30] sm:$0xff] (!%p188_p2)  ;;  %v1041_v44 = vmul.u32 (!%p188_p2), 2, %v226_v35 }
   0xa   : > { %824 = vmatprep.subr.bf16.mxu1 (!%p188_p2), %v889_v3  ;;  %v828_v19 = vpack.c.bf16 (!%p188_p2), %v253_v17, %v252_v16  ;;  %v255_v23 = vld [vmem:[%s1152_s1 + $0x38] sm:$0xff] (!%p188_p2)  ;;  %v807_v24 = vpack.c.bf16 (!%p188_p2), %v609_v21, %v608_v20  ;;  %v610_v26 = vld [vmem:[%s1152_s1 + $0xc0] sm:$0xff] (!%p188_p2)  ;;  %v611_v27 = vld [vmem:[%s1152_s1 + $0xc8] sm:$0xff] (!%p188_p2) }
   0xb   : > { %v831_v25 = vpack.c.bf16 (!%p188_p2), %v255_v23, %v254_v22  ;;  %v256_v29 = vld [vmem:[%s1152_s1 + $0x40] sm:$0xff] (!%p188_p2)  ;;  %v257_v30 = vld [vmem:[%s1152_s1 + $0x48] sm:$0xff] (!%p188_p2)  ;;  %v810_v31 = vpack.c.bf16 (!%p188_p2), %v611_v27, %v610_v26  ;;  %v612_v33 = vld [vmem:[%s1152_s1 + $0xd0] sm:$0xff] (!%p188_p2)  ;;  %v269_v55 = vadd.s32 (!%p188_p2), 1, %v1041_v44  ;;  %vm244_vm3 = vcmp.ge.s32.totalorder (!%p188_p2), %v1041_v44, 0 }
   0xc   : > { %802 = vmatpush3.bf16.msra.mxu0 (!%p188_p2), %v801_v12  ;;  %v834_v32 = vpack.c.bf16 (!%p188_p2), %v257_v30, %v256_v29  ;;  %v613_v34 = vld [vmem:[%s1152_s1 + $0xd8] sm:$0xff] (!%p188_p2)  ;;  %v258_v36 = vld [vmem:[%s1152_s1 + $0x50] sm:$0xff] (!%p188_p2)  ;;  %v1031_v39 = vld [vmem:[%s1154_s3] ss:$0 sm:$0xff] (!%p188_p2)  ;;  %vm245_vm4 = vcmp.lt.s32.totalorder (!%p188_p2), %v1041_v44, 16  ;;  %v436_v26 = vadd.s32 (!%p188_p2), 2, %v1041_v44 }
   0xd   : > { %826 = vmatpush3.bf16.msra.mxu1 %v825_v13  ;;  %803 = vmatprep.subr.bf16.mxu0 %v889_v3  ;;  %s1158_s19 = smov (!%p214_p3, %s592_s19), 1  ;;  %v259_v37 = vld [vmem:[%s1152_s1 + $0x58] sm:$0xff]  ;;  %v813_v38 = vpack.c.bf16 %v613_v34, %v612_v33  ;;  %v614_v42 = vld [vmem:[%s1152_s1 + $0xe0] sm:$0xff]  ;;  %v615_v43 = vld [vmem:[%s1152_s1 + $0xe8] sm:$0xff]  ;;  %vm270_vm1 = vcmp.ge.s32.totalorder %v269_v55, 0  ;;  %vm271_vm2 = vcmp.lt.s32.totalorder %v269_v55, 16 }
   0xe   : > { %827 = vmatprep.subr.bf16.mxu1 %v889_v3  ;;  %s869_s8 = smul.u32 24, %s1158_s19  ;;  %v837_v41 = vpack.c.bf16 %v259_v37, %v258_v36  ;;  %v260_v46 = vld [vmem:[%s1152_s1 + $0x60] sm:$0xff]  ;;  %v261_v47 = vld [vmem:[%s1152_s1 + $0x68] sm:$0xff]  ;;  %v816_v49 = vpack.c.bf16 %v615_v43, %v614_v42  ;;  %v616_v53 = vld [vmem:[%s1152_s1 + $0xf0] sm:$0xff]  ;;  %vm437_vm7 = vcmp.ge.s32.totalorder %v436_v26, 0  ;;  %vm438_vm8 = vcmp.lt.s32.totalorder %v436_v26, 16 }
   0xf   : > { %v1055_v50 = vld [vmem:[%s1155_s4] ss:$0 sm:$0xff]  ;;  %v840_v52 = vpack.c.bf16 %v261_v47, %v260_v46  ;;  %v617_v54 = vld [vmem:[%s1152_s1 + $0xf8] sm:$0xff]  ;;  %v262_v56 = vld [vmem:[%s1152_s1 + $0x70] sm:$0xff]  ;;  %s598_s10 = sshll.u32 %s1158_s19, 3 }
  0x10   : > { %805 = vmatpush3.bf16.msra.mxu0 %v804_v18  ;;  %s1019_s21 = scalar_lea.vmem %s1151_s0, %s869_s8  ;;  %v263_v57 = vld [vmem:[%s1152_s1 + $0x78] sm:$0xff]  ;;  %v819_v59 = vpack.c.bf16 %v617_v54, %v616_v53  ;;  %v621_v62 = vld [vmem:[%s1152_s1 + $0x100] sm:$0xff]  ;;  %v622_v63 = vld [vmem:[%s1152_s1 + $0x108] sm:$0xff]  ;;  %s222_s13 = scalar_lea.vmem %s1156_s5, %s598_s10 }
  0x11   : > { %829 = vmatpush3.bf16.msra.mxu1 %v828_v19  ;;  %806 = vmatprep.subr.bf16.mxu0 %v889_v3  ;;  %v601_v40 = vld [vmem:[%s1019_s21 + $0x1] ss:$2 sm:$0xff]  ;;  %v228_v45 = vld [vmem:[%s1019_s21] ss:$2 sm:$0xff]  ;;  %v843_v61 = vpack.c.bf16 %v263_v57, %v262_v56  ;;  %vm272_vm5 = vmand %vm270_vm1, %vm271_vm2  ;;  %v846_v2 = vpack.c.bf16 %v622_v63, %v621_v62 }
  0x12   : > { %830 = vmatprep.subr.bf16.mxu1 %v889_v3  ;;  %v266_v48 = vmul.f32 %v601_v40, %v1031_v39  ;;  %v235_v51 = vmul.f32 %v1031_v39, %v228_v45  ;;  %vm246_vm6 = vmand %vm244_vm3, %vm245_vm4  ;;  %v623_v4 = vld [vmem:[%s1152_s1 + $0x110] sm:$0xff]  ;;  %v624_v5 = vld [vmem:[%s1152_s1 + $0x118] sm:$0xff] }
  0x13   : > { %v849_v6 = vpack.c.bf16 %v624_v5, %v623_v4  ;;  %v625_v7 = vld [vmem:[%s1152_s1 + $0x120] sm:$0xff]  ;;  %v626_v8 = vld [vmem:[%s1152_s1 + $0x128] sm:$0xff]  ;;  %v627_v10 = vld [vmem:[%s1152_s1 + $0x130] sm:$0xff] }
  0x14   : > { %808 = vmatpush3.bf16.msra.mxu0 %v807_v24  ;;  %v267_v58 = vadd.f32 %v1055_v50, %v266_v48  ;;  %v242_v60 = vadd.f32 %v1055_v50, %v235_v51  ;;  %v852_v9 = vpack.c.bf16 %v626_v8, %v625_v7  ;;  %v628_v12 = vld [vmem:[%s1152_s1 + $0x138] sm:$0xff]  ;;  %v630_v14 = vld [vmem:[%s1152_s1 + $0x148] sm:$0xff]  ;;  %v631_v16 = vld [vmem:[%s1152_s1 + $0x150] sm:$0xff] }
  0x15   : > { %832 = vmatpush3.bf16.msra.mxu1 %v831_v25  ;;  %809 = vmatprep.subr.bf16.mxu0 %v889_v3  ;;  %v855_v13 = vpack.c.bf16 %v628_v12, %v627_v10  ;;  %v632_v17 = vld [vmem:[%s1152_s1 + $0x158] sm:$0xff]  ;;  %v620_v19 = vld [vmem:[%s1019_s21 + $0x2] ss:$2 sm:$0xff]  ;;  %vm439_vm9 = vmand %vm437_vm7, %vm438_vm8 }
  0x16   : > { %833 = vmatprep.subr.bf16.mxu1 %v889_v3  ;;  %v268_v0 = vmax.f32 %v267_v58, 0.0  ;;  %v243_v1 = vmax.f32 %v242_v60, 0.0  ;;  %v861_v18 = vpack.c.bf16 %v632_v17, %v631_v16  ;;  %v633_v20 = vld [vmem:[%s1152_s1 + $0x160] sm:$0xff]  ;;  %v634_v21 = vld [vmem:[%s1152_s1 + $0x168] sm:$0xff]  ;;  %v433_v22 = vmul.f32 %v620_v19, %v1031_v39  ;;  %v635_v24 = vld [vmem:[%s1152_s1 + $0x170] sm:$0xff] }
  0x17   : > { %v864_v23 = vpack.c.bf16 %v634_v21, %v633_v20  ;;  %v636_v25 = vld [vmem:[%s1152_s1 + $0x178] sm:$0xff]  ;;  %v638_v36 = vld [vmem:[%s1153_s2] ss:$0 sm:$0xff] }
  0x18   : > { %811 = vmatpush3.bf16.msra.mxu0 %v810_v31  ;;  %v434_v27 = vadd.f32 %v1055_v50, %v433_v22  ;;  %v867_v28 = vpack.c.bf16 %v636_v25, %v635_v24 }
  0x19   : > { %835 = vmatpush3.bf16.msra.mxu1 %v834_v32  ;;  %812 = vmatprep.subr.bf16.mxu0 %v889_v3 }
  0x1a   : > { %836 = vmatprep.subr.bf16.mxu1 %v889_v3  ;;  %v435_v29 = vmax.f32 %v434_v27, 0.0 }
  0x1c   : > { %814 = vmatpush3.bf16.msra.mxu0 %v813_v38 }
  0x1d   : > { %838 = vmatpush3.bf16.msra.mxu1 %v837_v41  ;;  %815 = vmatprep.subr.bf16.mxu0 %v889_v3 }
  0x1e   : > { %839 = vmatprep.subr.bf16.mxu1 %v889_v3 }
  0x20   : > { %817 = vmatpush3.bf16.msra.mxu0 %v816_v49 }
  0x21   : > { %841 = vmatpush3.bf16.msra.mxu1 %v840_v52  ;;  %818 = vmatprep.subr.bf16.mxu0 %v889_v3 }
  0x22   : > { %842 = vmatprep.subr.bf16.mxu1 %v889_v3 }
  0x24   : > { %820 = vmatpush3.bf16.msra.mxu0 %v819_v59 }
  0x25   : > { %844 = vmatpush3.bf16.msra.mxu1 %v843_v61  ;;  %845 = vmatprep.subr.bf16.mxu0 %v889_v3 }
  0x27   : > { %725 = vmatmul.mubr.msk.f32.vlgmr.msra.gmra.mrb[0].mxu0 %vm272_vm5, %v268_v0 }
  0x28   : > { %760 = vmatmul.mubr.msk.f32.vlgmr.msra.gmra.mrb[0].mxu1 %vm246_vm6, %v243_v1  ;;  %847 = vmatpush3.bf16.msra.mxu0 %v846_v2 }
  0x29   : > { %848 = vmatprep.subr.bf16.mxu0 %v889_v3  ;;  %794 = vmatprep.mubr.msk.f32.mxu0 %vm890_vm0, %v891_v11  ;;  %v629_v11 = vld [vmem:[%s1152_s1 + $0x140] sm:$0xff] }
  0x2a   : > { %v858_v15 = vpack.c.bf16 %v630_v14, %v629_v11 }
  0x2c   : > { %850 = vmatpush3.bf16.msra.mxu0 %v849_v6 }
  0x2d   : > { %851 = vmatprep.subr.bf16.mxu0 %v889_v3 }
  0x30   : > { %853 = vmatpush3.bf16.msra.mxu0 %v852_v9 }
  0x31   : > { %854 = vmatprep.subr.bf16.mxu0 %v889_v3 }
  0x34   : > { %856 = vmatpush3.bf16.msra.mxu0 %v855_v13 }
  0x35   : > { %857 = vmatprep.subr.bf16.mxu0 %v889_v3 }
  0x38   : > { %859 = vmatpush3.bf16.msra.mxu0 %v858_v15 }
  0x39   : > { %860 = vmatprep.subr.bf16.mxu0 %v889_v3 }
  0x3c   : > { %862 = vmatpush3.bf16.msra.mxu0 %v861_v18 }
  0x3d   : > { %863 = vmatprep.subr.bf16.mxu0 %v889_v3 }
  0x40   : > { %865 = vmatpush3.bf16.msra.mxu0 %v864_v23 }
  0x41   : > { %866 = vmatprep.subr.bf16.mxu0 %v889_v3 }
  0x44   : > { %868 = vmatpush3.bf16.msra.mxu0 %v867_v28 }
  0x47   : > { %795 = vmatmul.mubr.msk.f32.vlgmr.msra.gmra.mrb[2].mxu0 %vm439_vm9, %v435_v29 }
  0xfa   : > { %v357_v30 = vpop.f32.mrb[0].mxu0 }
  0xfb   : > { %v726_v31 = vpop.f32.mrb[1].mxu0  ;;  %v427_v32 = vpop.f32.mrb[0].mxu1 }
  0xfc   : > { %v428_v33 = vadd.f32 %v427_v32, %v357_v30  ;;  %v761_v34 = vpop.f32.mrb[1].mxu1 }
 0x11a   : > { %v524_v35 = vpop.f32.mrb[2].mxu0 }
 0x11b   : > { %v528_v37 = vadd.f32 %v524_v35, %v428_v33  ;;  %v796_v38 = vpop.f32.mrb[3].mxu0 }
 0x11d   : > { %v536_v3 = vadd.f32 %v638_v36, %v528_v37 }
 0x11f   : > { %v537_v39 = vmax.f32 %v536_v3, 0.0 }
 0x121   : > { %538 = vst [vmem:[%s222_s13] sm:$0xff] %v537_v39 }
 0x122 PF: > { %s15_s18 = sadd.s32 1, %s887_s18  }
 0x123   : > { %p12_p4 = scmp.ge.s32.totalorder %s15_s18, 4  }
 0x125   :  { %14 = sbr.rel (!%p12_p4) target bundleno = 1 (0x1), region = 74 }

// kernel: _lambda_.12
= control target key start
LH: loop header
LB: loop body
LE: loop exit
PB: predicated region body
PF: predicated region fallthrough
CT: control target
= control target key end

     0   :  { %s931_s15 = smov 0   ;;  %s1110_s0 = inlined_call_operand.vmem [shape: f32[2,18,128], index: 0, kind: input, shape index: {}]   ;;  %s1111_s1 = inlined_call_operand.vmem [shape: f32[3,128,128], index: 1, kind: input, shape index: {}]   ;;  %s1112_s2 = inlined_call_operand.vmem [shape: f32[1,128], index: 2, kind: input, shape index: {}]   ;;  %s1113_s3 = inlined_call_operand.vmem [shape: f32[2,16,128], index: 3, kind: input, shape index: {}]   ;;  %s1114_s4 = inlined_call_operand.vmem [shape: f32[2,16,128], index: 4, kind: output, shape index: {}]  }
   0x1 LB: > { %s583_s16 = sadd.s32 4294967295, %s904_s15   ;;  %p587_p0 = scmp.ge.s32.totalorder %s904_s15, 1  ;;  %s904_s15 = sphi %s931_s15, %s14_s15  }
   0x2   : > { %p172_p1 = scmp.lt.s32.totalorder %s904_s15, 3 }
   0x4   : > { %p173_p2 = pnand %p587_p0, %p172_p1 }
   0x5   : > { %v220_v0 = vld [vmem:[%s1111_s1] sm:$0xff] (!%p173_p2)  ;;  %v221_v1 = vld [vmem:[%s1111_s1 + $0x8] sm:$0xff] (!%p173_p2)  ;;  %v222_v2 = vld [vmem:[%s1111_s1 + $0x10] sm:$0xff] (!%p173_p2)  ;;  %p203_p3 = scmp.lt.s32.totalorder (!%p173_p2), %s583_s16, 1 }
   0x6   : > { %176 = sbr.rel (%p173_p2) target bundleno = 292 (0x124), region = 36  ;;  %v821_v3 = vpack.c.bf16 (!%p173_p2), %v221_v1, %v220_v0  ;;  %v223_v4 = vld [vmem:[%s1111_s1 + $0x18] sm:$0xff] (!%p173_p2)  ;;  %v224_v6 = vld [vmem:[%s1111_s1 + $0x20] sm:$0xff] (!%p173_p2)  ;;  %v225_v7 = vld [vmem:[%s1111_s1 + $0x28] sm:$0xff] (!%p173_p2) }
   0x7   : > { %v825_v5 = vpack.c.bf16 (!%p173_p2), %v223_v4, %v222_v2  ;;  %v829_v8 = vpack.c.bf16 (!%p173_p2), %v225_v7, %v224_v6  ;;  %v593_v9 = vld [vmem:[%s1111_s1 + $0x80] sm:$0xff] (!%p173_p2)  ;;  %v594_v10 = vld [vmem:[%s1111_s1 + $0x88] sm:$0xff] (!%p173_p2)  ;;  %v226_v11 = vld [vmem:[%s1111_s1 + $0x30] sm:$0xff] (!%p173_p2) }
   0x8   : > { %822 = vmatprep.subr.bf16.mxu0 (!%p173_p2), %v821_v3  ;;  %v227_v12 = vld [vmem:[%s1111_s1 + $0x38] sm:$0xff] (!%p173_p2)  ;;  %v789_v13 = vpack.c.bf16 (!%p173_p2), %v594_v10, %v593_v9  ;;  %v595_v14 = vld [vmem:[%s1111_s1 + $0x90] sm:$0xff] (!%p173_p2)  ;;  %v597_v18 = vld [vmem:[%s1111_s1 + $0xa0] sm:$0xff] (!%p173_p2) }
   0x9   : > { %824 = vmatpush3.bf16.msra.mxu0 (!%p173_p2), %v821_v3  ;;  %v596_v16 = vld [vmem:[%s1111_s1 + $0x98] sm:$0xff] (!%p173_p2)  ;;  %v833_v19 = vpack.c.bf16 (!%p173_p2), %v227_v12, %v226_v11  ;;  %v598_v20 = vld [vmem:[%s1111_s1 + $0xa8] sm:$0xff] (!%p173_p2)  ;;  %v228_v21 = vld [vmem:[%s1111_s1 + $0x40] sm:$0xff] (!%p173_p2) }
   0xa   : > { %826 = vmatprep.subr.bf16.mxu0 (!%p173_p2), %v825_v5  ;;  %790 = vmatprep.subr.bf16.mxu1 (!%p173_p2), %v789_v13  ;;  %v793_v17 = vpack.c.bf16 (!%p173_p2), %v596_v16, %v595_v14  ;;  %v229_v22 = vld [vmem:[%s1111_s1 + $0x48] sm:$0xff] (!%p173_p2)  ;;  %v797_v23 = vpack.c.bf16 (!%p173_p2), %v598_v20, %v597_v18  ;;  %v599_v24 = vld [vmem:[%s1111_s1 + $0xb0] sm:$0xff] (!%p173_p2)  ;;  %v600_v25 = vld [vmem:[%s1111_s1 + $0xb8] sm:$0xff] (!%p173_p2) }
   0xb   : > { %792 = vmatpush3.bf16.msra.mxu1 (!%p173_p2), %v789_v13  ;;  %v837_v26 = vpack.c.bf16 (!%p173_p2), %v229_v22, %v228_v21  ;;  %v230_v27 = vld [vmem:[%s1111_s1 + $0x50] sm:$0xff] (!%p173_p2)  ;;  %v231_v28 = vld [vmem:[%s1111_s1 + $0x58] sm:$0xff] (!%p173_p2)  ;;  %v801_v29 = vpack.c.bf16 (!%p173_p2), %v600_v25, %v599_v24  ;;  %v601_v30 = vld [vmem:[%s1111_s1 + $0xc0] sm:$0xff] (!%p173_p2) }
   0xc   : > { %794 = vmatprep.subr.bf16.mxu1 (!%p173_p2), %v793_v17  ;;  %v602_v31 = vld [vmem:[%s1111_s1 + $0xc8] sm:$0xff] (!%p173_p2)  ;;  %v841_v33 = vpack.c.bf16 (!%p173_p2), %v231_v28, %v230_v27  ;;  %v232_v34 = vld [vmem:[%s1111_s1 + $0x60] sm:$0xff] (!%p173_p2)  ;;  %v603_v37 = vld [vmem:[%s1111_s1 + $0xd0] sm:$0xff] (!%p173_p2) }
   0xd   : > { %s1116_s16 = smov (!%p203_p3, %s583_s16), 1  ;;  %828 = vmatpush3.bf16.msra.mxu0 %v825_v5  ;;  %v233_v35 = vld [vmem:[%s1111_s1 + $0x68] sm:$0xff]  ;;  %v805_v36 = vpack.c.bf16 %v602_v31, %v601_v30  ;;  %v604_v38 = vld [vmem:[%s1111_s1 + $0xd8] sm:$0xff]  ;;  %v234_v40 = vld [vmem:[%s1111_s1 + $0x70] sm:$0xff] }
   0xe   : > { %s889_s29 = smul.u32 24, %s1116_s16  ;;  %830 = vmatprep.subr.bf16.mxu0 %v829_v8  ;;  %v845_v39 = vpack.c.bf16 %v233_v35, %v232_v34  ;;  %v235_v41 = vld [vmem:[%s1111_s1 + $0x78] sm:$0xff]  ;;  %v809_v42 = vpack.c.bf16 %v604_v38, %v603_v37  ;;  %v605_v43 = vld [vmem:[%s1111_s1 + $0xe0] sm:$0xff]  ;;  %v606_v44 = vld [vmem:[%s1111_s1 + $0xe8] sm:$0xff]  ;;  %s628_s24 = sshll.u32 %s1116_s16, 4 }
   0xf   : > { %796 = vmatpush3.bf16.msra.mxu1 %v793_v17  ;;  %v849_v45 = vpack.c.bf16 %v235_v41, %v234_v40  ;;  %v609_v46 = vld [vmem:[%s1111_s1 + $0x100] sm:$0xff]  ;;  %v610_v47 = vld [vmem:[%s1111_s1 + $0x108] sm:$0xff]  ;;  %v813_v48 = vpack.c.bf16 %v606_v44, %v605_v43  ;;  %v607_v49 = vld [vmem:[%s1111_s1 + $0xf0] sm:$0xff]  ;;  %s212_s27 = scalar_lea.vmem %s1113_s3, %s628_s24  ;;  %s217_s5 = scalar_lea.vmem %s1114_s4, %s628_s24 }
  0x10   : > { %s975_s14 = scalar_lea.vmem %s1110_s0, %s889_s29  ;;  %798 = vmatprep.subr.bf16.mxu1 %v797_v23  ;;  %v608_v50 = vld [vmem:[%s1111_s1 + $0xf8] sm:$0xff]  ;;  %v853_v51 = vpack.c.bf16 %v610_v47, %v609_v46  ;;  %v611_v52 = vld [vmem:[%s1111_s1 + $0x110] sm:$0xff]  ;;  %v613_v58 = vld [vmem:[%s1111_s1 + $0x120] sm:$0xff] }
  0x11   : > { %v218_v15 = vld [vmem:[%s975_s14] sm:$0xff]  ;;  %832 = vmatpush3.bf16.msra.mxu0 %v829_v8  ;;  %v612_v53 = vld [vmem:[%s1111_s1 + $0x118] sm:$0xff]  ;;  %v817_v54 = vpack.c.bf16 %v608_v50, %v607_v49  ;;  %v219_v55 = vld [vmem:[%s975_s14 + $0x8] sm:$0xff] }
  0x12   : > { %751 = vmatprep.mubr.f32.mxu0 %v218_v15  ;;  %834 = vmatprep.subr.bf16.mxu0 %v833_v19  ;;  %v236_v32 = vld [vmem:[%s975_s14 + $0x1] sm:$0xff]  ;;  %v857_v56 = vpack.c.bf16 %v612_v53, %v611_v52  ;;  %v237_v61 = vld [vmem:[%s975_s14 + $0x9] sm:$0xff]  ;;  %v616_v63 = vld [vmem:[%s1111_s1 + $0x138] sm:$0xff] }
  0x13   : > { %800 = vmatpush3.bf16.msra.mxu1 %v797_v23  ;;  %716 = vmatprep.mubr.f32.mxu1 %v236_v32  ;;  %v405_v57 = vld [vmem:[%s975_s14 + $0x2] sm:$0xff]  ;;  %v615_v62 = vld [vmem:[%s1111_s1 + $0x130] sm:$0xff]  ;;  %v620_v5 = vld [vmem:[%s1111_s1 + $0x158] sm:$0xff] }
  0x14   : > { %802 = vmatprep.subr.bf16.mxu1 %v801_v29  ;;  %v614_v59 = vld [vmem:[%s1111_s1 + $0x128] sm:$0xff]  ;;  %v865_v0 = vpack.c.bf16 %v616_v63, %v615_v62  ;;  %v617_v1 = vld [vmem:[%s1111_s1 + $0x140] sm:$0xff]  ;;  %v619_v4 = vld [vmem:[%s1111_s1 + $0x150] sm:$0xff] }
  0x15   : > { %836 = vmatpush3.bf16.msra.mxu0 %v833_v19  ;;  %v861_v60 = vpack.c.bf16 %v614_v59, %v613_v58  ;;  %v618_v2 = vld [vmem:[%s1111_s1 + $0x148] sm:$0xff]  ;;  %v873_v6 = vpack.c.bf16 %v620_v5, %v619_v4  ;;  %v621_v7 = vld [vmem:[%s1111_s1 + $0x160] sm:$0xff]  ;;  %v623_v10 = vld [vmem:[%s1111_s1 + $0x170] sm:$0xff] }
  0x16   : > { %838 = vmatprep.subr.bf16.mxu0 %v837_v26  ;;  %v869_v3 = vpack.c.bf16 %v618_v2, %v617_v1  ;;  %v622_v8 = vld [vmem:[%s1111_s1 + $0x168] sm:$0xff]  ;;  %v624_v11 = vld [vmem:[%s1111_s1 + $0x178] sm:$0xff]  ;;  %v625_v17 = vld [vmem:[%s1112_s2] ss:$0 sm:$0xff] }
  0x17   : > { %804 = vmatpush3.bf16.msra.mxu1 %v801_v29  ;;  %v877_v9 = vpack.c.bf16 %v622_v8, %v621_v7  ;;  %v881_v12 = vpack.c.bf16 %v624_v11, %v623_v10  ;;  %v406_v13 = vld [vmem:[%s975_s14 + $0xa] sm:$0xff]  ;;  %v510_v23 = vld [vmem:[%s212_s27] sm:$0xff] }
  0x18   : > { %806 = vmatprep.subr.bf16.mxu1 %v805_v36  ;;  %v511_v20 = vld [vmem:[%s212_s27 + $0x8] sm:$0xff] }
  0x19   : > { %840 = vmatpush3.bf16.msra.mxu0 %v837_v26 }
  0x1a   : > { %842 = vmatprep.subr.bf16.mxu0 %v841_v33 }
  0x1b   : > { %808 = vmatpush3.bf16.msra.mxu1 %v805_v36 }
  0x1c   : > { %810 = vmatprep.subr.bf16.mxu1 %v809_v42 }
  0x1d   : > { %844 = vmatpush3.bf16.msra.mxu0 %v841_v33 }
  0x1e   : > { %846 = vmatprep.subr.bf16.mxu0 %v845_v39 }
  0x1f   : > { %812 = vmatpush3.bf16.msra.mxu1 %v809_v42 }
  0x20   : > { %814 = vmatprep.subr.bf16.mxu1 %v813_v48 }
  0x21   : > { %848 = vmatpush3.bf16.msra.mxu0 %v845_v39 }
  0x22   : > { %850 = vmatprep.subr.bf16.mxu0 %v849_v45 }
  0x23   : > { %816 = vmatpush3.bf16.msra.mxu1 %v813_v48 }
  0x24   : > { %818 = vmatprep.subr.bf16.mxu1 %v817_v54 }
  0x25   : > { %852 = vmatpush3.bf16.msra.mxu0 %v849_v45 }
  0x26   : > { %854 = vmatprep.subr.bf16.mxu0 %v853_v51 }
  0x27   : > { %820 = vmatpush3.bf16.msra.mxu1 %v817_v54 }
  0x28   : > { %752 = vmatmul.mubr.f32.vlgmr.msra.gmra.mrb[0].mxu0 %v219_v55 }
  0x29   : > { %856 = vmatpush3.bf16.msra.mxu0 %v853_v51  ;;  %786 = vmatprep.mubr.f32.mxu0 %v405_v57 }
  0x2a   : > { %858 = vmatprep.subr.bf16.mxu0 %v857_v56  ;;  %717 = vmatmul.mubr.f32.vlgmr.msra.gmra.mrb[0].mxu1 %v237_v61 }
  0x2d   : > { %860 = vmatpush3.bf16.msra.mxu0 %v857_v56 }
  0x2e   : > { %862 = vmatprep.subr.bf16.mxu0 %v861_v60 }
  0x31   : > { %864 = vmatpush3.bf16.msra.mxu0 %v861_v60 }
  0x32   : > { %866 = vmatprep.subr.bf16.mxu0 %v865_v0 }
  0x35   : > { %868 = vmatpush3.bf16.msra.mxu0 %v865_v0 }
  0x36   : > { %870 = vmatprep.subr.bf16.mxu0 %v869_v3 }
  0x39   : > { %872 = vmatpush3.bf16.msra.mxu0 %v869_v3 }
  0x3a   : > { %874 = vmatprep.subr.bf16.mxu0 %v873_v6 }
  0x3d   : > { %876 = vmatpush3.bf16.msra.mxu0 %v873_v6 }
  0x3e   : > { %878 = vmatprep.subr.bf16.mxu0 %v877_v9 }
  0x41   : > { %880 = vmatpush3.bf16.msra.mxu0 %v877_v9 }
  0x42   : > { %882 = vmatprep.subr.bf16.mxu0 %v881_v12 }
  0x45   : > { %884 = vmatpush3.bf16.msra.mxu0 %v881_v12 }
  0x48   : > { %787 = vmatmul.mubr.f32.vlgmr.msra.gmra.mrb[0].mxu0 %v406_v13 }
  0xfd   : > { %v718_v14 = vpop.f32.mrb[0].mxu1 }
  0xfe   : > { %v321_v15 = vpop.f32.mrb[1].mxu1 }
 0x11b   : > { %v788_v16 = vpop.f32.mrb[0].mxu0 }
 0x11c   : > { %v885_v18 = vadd.f32 %v788_v16, %v718_v14  ;;  %v490_v19 = vpop.f32.mrb[1].mxu0 }
 0x11d   : > { %v886_v21 = vadd.f32 %v490_v19, %v321_v15 }
 0x11e   : > { %v509_v22 = vadd.f32 %v885_v18, %v625_v17 }
 0x11f   : > { %v508_v24 = vadd.f32 %v886_v21, %v625_v17 }
 0x120   : > { %v513_v25 = vadd.f32 %v511_v20, %v509_v22 }
 0x121   : > { %v512_v26 = vadd.f32 %v510_v23, %v508_v24 }
 0x122   : > { %515 = vst [vmem:[%s217_s5 + $0x8] sm:$0xff] %v513_v25 }
 0x123   : > { %514 = vst [vmem:[%s217_s5] sm:$0xff] %v512_v26 }
 0x124 PF: > { %s14_s15 = sadd.s32 1, %s904_s15  }
 0x125   : > { %p11_p4 = scmp.ge.s32.totalorder %s14_s15, 4  }
 0x127   :  { %13 = sbr.rel (!%p11_p4) target bundleno = 1 (0x1), region = 71 }

// kernel: _lambda_.14
= control target key start
LH: loop header
LB: loop body
LE: loop exit
PB: predicated region body
PF: predicated region fallthrough
CT: control target
= control target key end

     0   :  { %s882_s15 = smov 0   ;;  %s1096_s0 = inlined_call_operand.vmem [shape: f32[2,10,128], index: 0, kind: input, shape index: {}]   ;;  %s1097_s1 = inlined_call_operand.vmem [shape: f32[3,128,128], index: 1, kind: input, shape index: {}]   ;;  %s1098_s2 = inlined_call_operand.vmem [shape: f32[1,128], index: 2, kind: input, shape index: {}]   ;;  %s1099_s3 = inlined_call_operand.vmem [shape: f32[2,16,128], index: 3, kind: input, shape index: {}]   ;;  %s1100_s4 = inlined_call_operand.vmem [shape: f32[2,8,128], index: 4, kind: output, shape index: {}]  }
   0x1 LB: > { %s559_s16 = sadd.s32 4294967295, %s852_s15   ;;  %p563_p0 = scmp.ge.s32.totalorder %s852_s15, 1  ;;  %s852_s15 = sphi %s882_s15, %s14_s15  }
   0x2   : > { %p172_p1 = scmp.lt.s32.totalorder %s852_s15, 3 }
   0x4   : > { %p173_p2 = pnand %p563_p0, %p172_p1 }
   0x5   : > { %v569_v0 = vld [vmem:[%s1097_s1 + $0x80] sm:$0xff] (!%p173_p2)  ;;  %v570_v1 = vld [vmem:[%s1097_s1 + $0x88] sm:$0xff] (!%p173_p2)  ;;  %v854_v3 = vmov (!%p173_p2), 0.0|0.0   ;;  %v571_v6 = vld [vmem:[%s1097_s1 + $0x90] sm:$0xff] (!%p173_p2)  ;;  %vm855_vm0 = vmmov (!%p173_p2), 0   ;;  %v856_v11 = vmov (!%p173_p2), 0.0  }
   0x6   : > { %176 = sbr.rel (%p173_p2) target bundleno = 290 (0x122), region = 36  ;;  %v217_v2 = vld [vmem:[%s1097_s1] sm:$0xff] (!%p173_p2)  ;;  %763 = vmatprep.subr.bf16.mxu0 (!%p173_p2), %v854_v3  ;;  %v764_v4 = vpack.c.bf16 (!%p173_p2), %v570_v1, %v569_v0  ;;  %787 = vmatprep.subr.bf16.mxu1 (!%p173_p2), %v854_v3  ;;  %v218_v5 = vld [vmem:[%s1097_s1 + $0x8] sm:$0xff] (!%p173_p2)  ;;  %v572_v7 = vld [vmem:[%s1097_s1 + $0x98] sm:$0xff] (!%p173_p2)  ;;  %p202_p3 = scmp.lt.s32.totalorder (!%p173_p2), %s559_s16, 1 }
   0x7   : > { %v788_v8 = vpack.c.bf16 (!%p173_p2), %v218_v5, %v217_v2  ;;  %v219_v9 = vld [vmem:[%s1097_s1 + $0x10] sm:$0xff] (!%p173_p2)  ;;  %v220_v10 = vld [vmem:[%s1097_s1 + $0x18] sm:$0xff] (!%p173_p2)  ;;  %690 = vmatprep.mubr.msk.f32.mxu0 (!%p173_p2), %vm855_vm0, %v856_v11  ;;  %725 = vmatprep.mubr.msk.f32.mxu1 (!%p173_p2), %vm855_vm0, %v856_v11  ;;  %v767_v12 = vpack.c.bf16 (!%p173_p2), %v572_v7, %v571_v6  ;;  %v573_v14 = vld [vmem:[%s1097_s1 + $0xa0] sm:$0xff] (!%p173_p2) }
   0x8   : > { %765 = vmatpush3.bf16.msra.mxu0 (!%p173_p2), %v764_v4  ;;  %v791_v13 = vpack.c.bf16 (!%p173_p2), %v220_v10, %v219_v9  ;;  %v574_v15 = vld [vmem:[%s1097_s1 + $0xa8] sm:$0xff] (!%p173_p2)  ;;  %v221_v16 = vld [vmem:[%s1097_s1 + $0x20] sm:$0xff] (!%p173_p2)  ;;  %v575_v20 = vld [vmem:[%s1097_s1 + $0xb0] sm:$0xff] (!%p173_p2) }
   0x9   : > { %789 = vmatpush3.bf16.msra.mxu1 (!%p173_p2), %v788_v8  ;;  %766 = vmatprep.subr.bf16.mxu0 (!%p173_p2), %v854_v3  ;;  %v222_v17 = vld [vmem:[%s1097_s1 + $0x28] sm:$0xff] (!%p173_p2)  ;;  %v770_v18 = vpack.c.bf16 (!%p173_p2), %v574_v15, %v573_v14  ;;  %v576_v21 = vld [vmem:[%s1097_s1 + $0xb8] sm:$0xff] (!%p173_p2)  ;;  %v223_v22 = vld [vmem:[%s1097_s1 + $0x30] sm:$0xff] (!%p173_p2) }
   0xa   : > { %790 = vmatprep.subr.bf16.mxu1 (!%p173_p2), %v854_v3  ;;  %v794_v19 = vpack.c.bf16 (!%p173_p2), %v222_v17, %v221_v16  ;;  %v224_v23 = vld [vmem:[%s1097_s1 + $0x38] sm:$0xff] (!%p173_p2)  ;;  %v773_v24 = vpack.c.bf16 (!%p173_p2), %v576_v21, %v575_v20  ;;  %v577_v26 = vld [vmem:[%s1097_s1 + $0xc0] sm:$0xff] (!%p173_p2)  ;;  %v578_v27 = vld [vmem:[%s1097_s1 + $0xc8] sm:$0xff] (!%p173_p2) }
   0xb   : > { %v797_v25 = vpack.c.bf16 (!%p173_p2), %v224_v23, %v223_v22  ;;  %v225_v28 = vld [vmem:[%s1097_s1 + $0x40] sm:$0xff] (!%p173_p2)  ;;  %v226_v29 = vld [vmem:[%s1097_s1 + $0x48] sm:$0xff] (!%p173_p2)  ;;  %v776_v30 = vpack.c.bf16 (!%p173_p2), %v578_v27, %v577_v26  ;;  %v579_v32 = vld [vmem:[%s1097_s1 + $0xd0] sm:$0xff] (!%p173_p2) }
   0xc   : > { %768 = vmatpush3.bf16.msra.mxu0 (!%p173_p2), %v767_v12  ;;  %v800_v31 = vpack.c.bf16 (!%p173_p2), %v226_v29, %v225_v28  ;;  %v580_v33 = vld [vmem:[%s1097_s1 + $0xd8] sm:$0xff] (!%p173_p2)  ;;  %v227_v34 = vld [vmem:[%s1097_s1 + $0x50] sm:$0xff] (!%p173_p2)  ;;  %v581_v38 = vld [vmem:[%s1097_s1 + $0xe0] sm:$0xff] (!%p173_p2) }
   0xd   : > { %792 = vmatpush3.bf16.msra.mxu1 %v791_v13  ;;  %769 = vmatprep.subr.bf16.mxu0 %v854_v3  ;;  %v228_v35 = vld [vmem:[%s1097_s1 + $0x58] sm:$0xff]  ;;  %v779_v36 = vpack.c.bf16 %v580_v33, %v579_v32  ;;  %v582_v39 = vld [vmem:[%s1097_s1 + $0xe8] sm:$0xff]  ;;  %v229_v40 = vld [vmem:[%s1097_s1 + $0x60] sm:$0xff]  ;;  %s1102_s16 = smov (!%p202_p3, %s559_s16), 1 }
   0xe   : > { %793 = vmatprep.subr.bf16.mxu1 %v854_v3  ;;  %v803_v37 = vpack.c.bf16 %v228_v35, %v227_v34  ;;  %v230_v41 = vld [vmem:[%s1097_s1 + $0x68] sm:$0xff]  ;;  %v782_v42 = vpack.c.bf16 %v582_v39, %v581_v38  ;;  %v583_v44 = vld [vmem:[%s1097_s1 + $0xf0] sm:$0xff]  ;;  %v584_v45 = vld [vmem:[%s1097_s1 + $0xf8] sm:$0xff]  ;;  %s605_s7 = sshll.u32 %s1102_s16, 4  ;;  %s568_s28 = sshll.u32 %s1102_s16, 3 }
   0xf   : > { %v806_v43 = vpack.c.bf16 %v230_v41, %v229_v40  ;;  %v231_v46 = vld [vmem:[%s1097_s1 + $0x70] sm:$0xff]  ;;  %v232_v47 = vld [vmem:[%s1097_s1 + $0x78] sm:$0xff]  ;;  %v785_v48 = vpack.c.bf16 %v584_v45, %v583_v44  ;;  %s1017_s10 = scalar_lea.vmem %s1096_s0, %s605_s7  ;;  %v585_v50 = vld [vmem:[%s1097_s1 + $0x100] sm:$0xff]  ;;  %s211_s25 = scalar_lea.vmem %s1099_s3, %s605_s7 }
  0x10   : > { %771 = vmatpush3.bf16.msra.mxu0 %v770_v18  ;;  %v809_v49 = vpack.c.bf16 %v232_v47, %v231_v46  ;;  %v586_v51 = vld [vmem:[%s1097_s1 + $0x108] sm:$0xff]  ;;  %v216_v54 = vld [vmem:[%s1017_s10] sm:$0xff]  ;;  %v587_v55 = vld [vmem:[%s1097_s1 + $0x110] sm:$0xff]  ;;  %s215_s30 = scalar_lea.vmem %s1100_s4, %s568_s28 }
  0x11   : > { %795 = vmatpush3.bf16.msra.mxu1 %v794_v19  ;;  %772 = vmatprep.subr.bf16.mxu0 %v854_v3  ;;  %v233_v52 = vld [vmem:[%s1017_s10 + $0x1] sm:$0xff]  ;;  %v812_v53 = vpack.c.bf16 %v586_v51, %v585_v50  ;;  %v588_v56 = vld [vmem:[%s1097_s1 + $0x118] sm:$0xff]  ;;  %v591_v61 = vld [vmem:[%s1097_s1 + $0x130] sm:$0xff] }
  0x12   : > { %796 = vmatprep.subr.bf16.mxu1 %v854_v3  ;;  %v815_v57 = vpack.c.bf16 %v588_v56, %v587_v55  ;;  %v589_v58 = vld [vmem:[%s1097_s1 + $0x120] sm:$0xff]  ;;  %v590_v59 = vld [vmem:[%s1097_s1 + $0x128] sm:$0xff]  ;;  %v592_v62 = vld [vmem:[%s1097_s1 + $0x138] sm:$0xff] }
  0x13   : > { %v818_v60 = vpack.c.bf16 %v590_v59, %v589_v58  ;;  %v821_v63 = vpack.c.bf16 %v592_v62, %v591_v61  ;;  %v593_v0 = vld [vmem:[%s1097_s1 + $0x140] sm:$0xff]  ;;  %v594_v1 = vld [vmem:[%s1097_s1 + $0x148] sm:$0xff]  ;;  %v595_v4 = vld [vmem:[%s1097_s1 + $0x150] sm:$0xff] }
  0x14   : > { %774 = vmatpush3.bf16.msra.mxu0 %v773_v24  ;;  %v824_v2 = vpack.c.bf16 %v594_v1, %v593_v0  ;;  %v596_v5 = vld [vmem:[%s1097_s1 + $0x158] sm:$0xff]  ;;  %v597_v7 = vld [vmem:[%s1097_s1 + $0x160] sm:$0xff]  ;;  %v598_v8 = vld [vmem:[%s1097_s1 + $0x168] sm:$0xff] }
  0x15   : > { %798 = vmatpush3.bf16.msra.mxu1 %v797_v25  ;;  %775 = vmatprep.subr.bf16.mxu0 %v854_v3  ;;  %v827_v6 = vpack.c.bf16 %v596_v5, %v595_v4  ;;  %v830_v9 = vpack.c.bf16 %v598_v8, %v597_v7  ;;  %v599_v10 = vld [vmem:[%s1097_s1 + $0x170] sm:$0xff]  ;;  %v391_v13 = vld [vmem:[%s1017_s10 + $0x2] sm:$0xff] }
  0x16   : > { %799 = vmatprep.subr.bf16.mxu1 %v854_v3  ;;  %v488_v19 = vld [vmem:[%s211_s25] ss:$2 sm:$0xff]  ;;  %v602_v20 = vld [vmem:[%s211_s25 + $0x1] ss:$2 sm:$0xff] }
  0x17   : > { %v491_v23 = vmax.f32 %v488_v19, %v602_v20 }
  0x18   : > { %777 = vmatpush3.bf16.msra.mxu0 %v776_v30 }
  0x19   : > { %801 = vmatpush3.bf16.msra.mxu1 %v800_v31  ;;  %778 = vmatprep.subr.bf16.mxu0 %v854_v3 }
  0x1a   : > { %802 = vmatprep.subr.bf16.mxu1 %v854_v3 }
  0x1c   : > { %780 = vmatpush3.bf16.msra.mxu0 %v779_v36 }
  0x1d   : > { %804 = vmatpush3.bf16.msra.mxu1 %v803_v37  ;;  %781 = vmatprep.subr.bf16.mxu0 %v854_v3 }
  0x1e   : > { %805 = vmatprep.subr.bf16.mxu1 %v854_v3 }
  0x20   : > { %783 = vmatpush3.bf16.msra.mxu0 %v782_v42 }
  0x21   : > { %807 = vmatpush3.bf16.msra.mxu1 %v806_v43  ;;  %784 = vmatprep.subr.bf16.mxu0 %v854_v3 }
  0x22   : > { %808 = vmatprep.subr.bf16.mxu1 %v854_v3 }
  0x24   : > { %786 = vmatpush3.bf16.msra.mxu0 %v785_v48 }
  0x25   : > { %810 = vmatpush3.bf16.msra.mxu1 %v809_v49  ;;  %811 = vmatprep.subr.bf16.mxu0 %v854_v3 }
  0x27   : > { %691 = vmatmul.mubr.f32.vlgmr.msra.gmra.mrb[0].mxu0 %v233_v52 }
  0x28   : > { %726 = vmatmul.mubr.f32.vlgmr.msra.gmra.mrb[0].mxu1 %v216_v54  ;;  %813 = vmatpush3.bf16.msra.mxu0 %v812_v53 }
  0x29   : > { %814 = vmatprep.subr.bf16.mxu0 %v854_v3  ;;  %760 = vmatprep.mubr.msk.f32.mxu0 %vm855_vm0, %v856_v11  ;;  %v600_v11 = vld [vmem:[%s1097_s1 + $0x178] sm:$0xff] }
  0x2a   : > { %v833_v12 = vpack.c.bf16 %v600_v11, %v599_v10 }
  0x2c   : > { %816 = vmatpush3.bf16.msra.mxu0 %v815_v57 }
  0x2d   : > { %817 = vmatprep.subr.bf16.mxu0 %v854_v3 }
  0x30   : > { %819 = vmatpush3.bf16.msra.mxu0 %v818_v60 }
  0x31   : > { %820 = vmatprep.subr.bf16.mxu0 %v854_v3 }
  0x34   : > { %822 = vmatpush3.bf16.msra.mxu0 %v821_v63 }
  0x35   : > { %823 = vmatprep.subr.bf16.mxu0 %v854_v3 }
  0x38   : > { %825 = vmatpush3.bf16.msra.mxu0 %v824_v2 }
  0x39   : > { %826 = vmatprep.subr.bf16.mxu0 %v854_v3 }
  0x3c   : > { %828 = vmatpush3.bf16.msra.mxu0 %v827_v6 }
  0x3d   : > { %829 = vmatprep.subr.bf16.mxu0 %v854_v3 }
  0x40   : > { %831 = vmatpush3.bf16.msra.mxu0 %v830_v9 }
  0x41   : > { %832 = vmatprep.subr.bf16.mxu0 %v854_v3  ;;  %v601_v3 = vld [vmem:[%s1098_s2] ss:$0 sm:$0xff] }
  0x44   : > { %834 = vmatpush3.bf16.msra.mxu0 %v833_v12 }
  0x47   : > { %761 = vmatmul.mubr.f32.vlgmr.msra.gmra.mrb[2].mxu0 %v391_v13 }
  0xfa   : > { %v317_v14 = vpop.f32.mrb[0].mxu0 }
  0xfb   : > { %v692_v15 = vpop.f32.mrb[1].mxu0  ;;  %v387_v16 = vpop.f32.mrb[0].mxu1 }
  0xfc   : > { %v388_v17 = vadd.f32 %v387_v16, %v317_v14  ;;  %v727_v18 = vpop.f32.mrb[1].mxu1 }
 0x11a   : > { %v475_v21 = vpop.f32.mrb[2].mxu0 }
 0x11b   : > { %v479_v22 = vadd.f32 %v475_v21, %v388_v17  ;;  %v762_v24 = vpop.f32.mrb[3].mxu0 }
 0x11d   : > { %v487_v25 = vadd.f32 %v601_v3, %v479_v22 }
 0x11f   : > { %v492_v26 = vadd.f32 %v491_v23, %v487_v25 }
 0x121   : > { %493 = vst [vmem:[%s215_s30] sm:$0xff] %v492_v26 }
 0x122 PF: > { %s14_s15 = sadd.s32 1, %s852_s15  }
 0x123   : > { %p11_p4 = scmp.ge.s32.totalorder %s14_s15, 4  }
 0x125   :  { %13 = sbr.rel (!%p11_p4) target bundleno = 1 (0x1), region = 72 }

// kernel: _lambda_.15
= control target key start
LH: loop header
LB: loop body
LE: loop exit
PB: predicated region body
PF: predicated region fallthrough
CT: control target
= control target key end

     0   :  { %s917_s18 = smov 0   ;;  %s1140_s0 = inlined_call_operand.vmem [shape: f32[2,10,128], index: 0, kind: input, shape index: {}]   ;;  %s1141_s1 = inlined_call_operand.vmem [shape: f32[3,128,128], index: 1, kind: input, shape index: {}]   ;;  %s1142_s2 = inlined_call_operand.vmem [shape: f32[1,128], index: 2, kind: input, shape index: {}]   ;;  %s1143_s3 = inlined_call_operand.vmem [shape: f32[1,128], index: 3, kind: input, shape index: {}]   ;;  %s1144_s4 = inlined_call_operand.vmem [shape: f32[1,128], index: 4, kind: input, shape index: {}]   ;;  %s1145_s5 = inlined_call_operand.vmem [shape: f32[2,8,128], index: 5, kind: output, shape index: {}]  }
   0x1 LB: > { %s589_s19 = sadd.s32 4294967295, %s882_s18   ;;  %p593_p0 = scmp.ge.s32.totalorder %s882_s18, 1  ;;  %s882_s18 = sphi %s917_s18, %s15_s18  }
   0x2   : > { %p187_p1 = scmp.lt.s32.totalorder %s882_s18, 3 }
   0x4   : > { %p188_p2 = pnand %p593_p0, %p187_p1 }
   0x5   : > { %v599_v0 = vld [vmem:[%s1141_s1 + $0x80] sm:$0xff] (!%p188_p2)  ;;  %v600_v1 = vld [vmem:[%s1141_s1 + $0x88] sm:$0xff] (!%p188_p2)  ;;  %v884_v3 = vmov (!%p188_p2), 0.0|0.0   ;;  %v601_v6 = vld [vmem:[%s1141_s1 + $0x90] sm:$0xff] (!%p188_p2)  ;;  %vm885_vm0 = vmmov (!%p188_p2), 0   ;;  %v886_v11 = vmov (!%p188_p2), 0.0   ;;  %v225_v52 = vlaneseq (!%p188_p2) }
   0x6   : > { %191 = sbr.rel (%p188_p2) target bundleno = 290 (0x122), region = 40  ;;  %v247_v2 = vld [vmem:[%s1141_s1] sm:$0xff] (!%p188_p2)  ;;  %793 = vmatprep.subr.bf16.mxu0 (!%p188_p2), %v884_v3  ;;  %v794_v4 = vpack.c.bf16 (!%p188_p2), %v600_v1, %v599_v0  ;;  %817 = vmatprep.subr.bf16.mxu1 (!%p188_p2), %v884_v3  ;;  %v248_v5 = vld [vmem:[%s1141_s1 + $0x8] sm:$0xff] (!%p188_p2)  ;;  %v602_v7 = vld [vmem:[%s1141_s1 + $0x98] sm:$0xff] (!%p188_p2)  ;;  %p214_p3 = scmp.lt.s32.totalorder (!%p188_p2), %s589_s19, 1 }
   0x7   : > { %v818_v8 = vpack.c.bf16 (!%p188_p2), %v248_v5, %v247_v2  ;;  %v249_v9 = vld [vmem:[%s1141_s1 + $0x10] sm:$0xff] (!%p188_p2)  ;;  %v250_v10 = vld [vmem:[%s1141_s1 + $0x18] sm:$0xff] (!%p188_p2)  ;;  %720 = vmatprep.mubr.msk.f32.mxu0 (!%p188_p2), %vm885_vm0, %v886_v11  ;;  %755 = vmatprep.mubr.msk.f32.mxu1 (!%p188_p2), %vm885_vm0, %v886_v11  ;;  %v797_v12 = vpack.c.bf16 (!%p188_p2), %v602_v7, %v601_v6  ;;  %v603_v14 = vld [vmem:[%s1141_s1 + $0xa0] sm:$0xff] (!%p188_p2)  ;;  %v226_v59 = vshrl.u32 (!%p188_p2), %v225_v52, 7 }
   0x8   : > { %795 = vmatpush3.bf16.msra.mxu0 (!%p188_p2), %v794_v4  ;;  %v821_v13 = vpack.c.bf16 (!%p188_p2), %v250_v10, %v249_v9  ;;  %v604_v15 = vld [vmem:[%s1141_s1 + $0xa8] sm:$0xff] (!%p188_p2)  ;;  %v251_v16 = vld [vmem:[%s1141_s1 + $0x20] sm:$0xff] (!%p188_p2)  ;;  %v605_v20 = vld [vmem:[%s1141_s1 + $0xb0] sm:$0xff] (!%p188_p2) }
   0x9   : > { %819 = vmatpush3.bf16.msra.mxu1 (!%p188_p2), %v818_v8  ;;  %796 = vmatprep.subr.bf16.mxu0 (!%p188_p2), %v884_v3  ;;  %v252_v17 = vld [vmem:[%s1141_s1 + $0x28] sm:$0xff] (!%p188_p2)  ;;  %v800_v18 = vpack.c.bf16 (!%p188_p2), %v604_v15, %v603_v14  ;;  %v606_v21 = vld [vmem:[%s1141_s1 + $0xb8] sm:$0xff] (!%p188_p2)  ;;  %v253_v22 = vld [vmem:[%s1141_s1 + $0x30] sm:$0xff] (!%p188_p2)  ;;  %vm243_vm1 = vcmp.ge.s32.totalorder (!%p188_p2), %v226_v59, 1 }
   0xa   : > { %820 = vmatprep.subr.bf16.mxu1 (!%p188_p2), %v884_v3  ;;  %v824_v19 = vpack.c.bf16 (!%p188_p2), %v252_v17, %v251_v16  ;;  %v254_v23 = vld [vmem:[%s1141_s1 + $0x38] sm:$0xff] (!%p188_p2)  ;;  %v803_v24 = vpack.c.bf16 (!%p188_p2), %v606_v21, %v605_v20  ;;  %v607_v26 = vld [vmem:[%s1141_s1 + $0xc0] sm:$0xff] (!%p188_p2)  ;;  %v608_v27 = vld [vmem:[%s1141_s1 + $0xc8] sm:$0xff] (!%p188_p2) }
   0xb   : > { %v827_v25 = vpack.c.bf16 (!%p188_p2), %v254_v23, %v253_v22  ;;  %v255_v28 = vld [vmem:[%s1141_s1 + $0x40] sm:$0xff] (!%p188_p2)  ;;  %v256_v29 = vld [vmem:[%s1141_s1 + $0x48] sm:$0xff] (!%p188_p2)  ;;  %v806_v30 = vpack.c.bf16 (!%p188_p2), %v608_v27, %v607_v26  ;;  %v609_v32 = vld [vmem:[%s1141_s1 + $0xd0] sm:$0xff] (!%p188_p2)  ;;  %v433_v26 = vadd.s32 (!%p188_p2), 2, %v226_v59 }
   0xc   : > { %798 = vmatpush3.bf16.msra.mxu0 (!%p188_p2), %v797_v12  ;;  %v830_v31 = vpack.c.bf16 (!%p188_p2), %v256_v29, %v255_v28  ;;  %v610_v33 = vld [vmem:[%s1141_s1 + $0xd8] sm:$0xff] (!%p188_p2)  ;;  %v257_v34 = vld [vmem:[%s1141_s1 + $0x50] sm:$0xff] (!%p188_p2)  ;;  %v1026_v37 = vld [vmem:[%s1143_s3] ss:$0 sm:$0xff] (!%p188_p2) }
   0xd   : > { %822 = vmatpush3.bf16.msra.mxu1 %v821_v13  ;;  %799 = vmatprep.subr.bf16.mxu0 %v884_v3  ;;  %s1147_s19 = smov (!%p214_p3, %s589_s19), 1  ;;  %v258_v35 = vld [vmem:[%s1141_s1 + $0x58] sm:$0xff]  ;;  %v809_v36 = vpack.c.bf16 %v610_v33, %v609_v32  ;;  %v611_v40 = vld [vmem:[%s1141_s1 + $0xe0] sm:$0xff]  ;;  %v612_v41 = vld [vmem:[%s1141_s1 + $0xe8] sm:$0xff]  ;;  %vm435_vm2 = vcmp.lt.s32.totalorder %v433_v26, 9 }
   0xe   : > { %823 = vmatprep.subr.bf16.mxu1 %v884_v3  ;;  %s636_s12 = sshll.u32 %s1147_s19, 4  ;;  %v833_v39 = vpack.c.bf16 %v258_v35, %v257_v34  ;;  %v259_v43 = vld [vmem:[%s1141_s1 + $0x60] sm:$0xff]  ;;  %v260_v44 = vld [vmem:[%s1141_s1 + $0x68] sm:$0xff]  ;;  %v812_v46 = vpack.c.bf16 %v612_v41, %v611_v40  ;;  %v613_v50 = vld [vmem:[%s1141_s1 + $0xf0] sm:$0xff]  ;;  %s596_s10 = sshll.u32 %s1147_s19, 3 }
   0xf   : > { %s1014_s21 = scalar_lea.vmem %s1140_s0, %s636_s12  ;;  %v1048_v47 = vld [vmem:[%s1144_s4] ss:$0 sm:$0xff]  ;;  %v836_v49 = vpack.c.bf16 %v260_v44, %v259_v43  ;;  %v614_v51 = vld [vmem:[%s1141_s1 + $0xf8] sm:$0xff]  ;;  %v261_v53 = vld [vmem:[%s1141_s1 + $0x70] sm:$0xff]  ;;  %s222_s13 = scalar_lea.vmem %s1145_s5, %s596_s10 }
  0x10   : > { %801 = vmatpush3.bf16.msra.mxu0 %v800_v18  ;;  %v263_v38 = vld [vmem:[%s1014_s21 + $0x1] sm:$0xff]  ;;  %v262_v54 = vld [vmem:[%s1141_s1 + $0x78] sm:$0xff]  ;;  %v815_v56 = vpack.c.bf16 %v614_v51, %v613_v50  ;;  %v618_v1 = vld [vmem:[%s1141_s1 + $0x110] sm:$0xff] }
  0x11   : > { %825 = vmatpush3.bf16.msra.mxu1 %v824_v19  ;;  %802 = vmatprep.subr.bf16.mxu0 %v884_v3  ;;  %v227_v42 = vld [vmem:[%s1014_s21] sm:$0xff]  ;;  %v264_v45 = vmul.f32 %v1026_v37, %v263_v38  ;;  %v839_v58 = vpack.c.bf16 %v262_v54, %v261_v53  ;;  %v617_v61 = vld [vmem:[%s1141_s1 + $0x108] sm:$0xff]  ;;  %v619_v2 = vld [vmem:[%s1141_s1 + $0x118] sm:$0xff] }
  0x12   : > { %826 = vmatprep.subr.bf16.mxu1 %v884_v3  ;;  %v234_v48 = vmul.f32 %v1026_v37, %v227_v42  ;;  %v616_v60 = vld [vmem:[%s1141_s1 + $0x100] sm:$0xff]  ;;  %v845_v4 = vpack.c.bf16 %v619_v2, %v618_v1  ;;  %v621_v6 = vld [vmem:[%s1141_s1 + $0x128] sm:$0xff]  ;;  %v622_v8 = vld [vmem:[%s1141_s1 + $0x130] sm:$0xff] }
  0x13   : > { %v265_v55 = vadd.f32 %v1048_v47, %v264_v45  ;;  %v842_v0 = vpack.c.bf16 %v617_v61, %v616_v60  ;;  %v620_v5 = vld [vmem:[%s1141_s1 + $0x120] sm:$0xff]  ;;  %v623_v9 = vld [vmem:[%s1141_s1 + $0x138] sm:$0xff]  ;;  %v625_v12 = vld [vmem:[%s1141_s1 + $0x148] sm:$0xff] }
  0x14   : > { %804 = vmatpush3.bf16.msra.mxu0 %v803_v24  ;;  %v241_v57 = vadd.f32 %v1048_v47, %v234_v48  ;;  %v848_v7 = vpack.c.bf16 %v621_v6, %v620_v5  ;;  %v851_v10 = vpack.c.bf16 %v623_v9, %v622_v8  ;;  %v626_v14 = vld [vmem:[%s1141_s1 + $0x150] sm:$0xff]  ;;  %v627_v15 = vld [vmem:[%s1141_s1 + $0x158] sm:$0xff]  ;;  %v429_v16 = vld [vmem:[%s1014_s21 + $0x2] sm:$0xff] }
  0x15   : > { %828 = vmatpush3.bf16.msra.mxu1 %v827_v25  ;;  %805 = vmatprep.subr.bf16.mxu0 %v884_v3  ;;  %v266_v62 = vmax.f32 %v265_v55, 0.0  ;;  %v857_v17 = vpack.c.bf16 %v627_v15, %v626_v14  ;;  %v628_v18 = vld [vmem:[%s1141_s1 + $0x160] sm:$0xff]  ;;  %v629_v19 = vld [vmem:[%s1141_s1 + $0x168] sm:$0xff]  ;;  %v430_v20 = vmul.f32 %v1026_v37, %v429_v16  ;;  %v630_v22 = vld [vmem:[%s1141_s1 + $0x170] sm:$0xff] }
  0x16   : > { %829 = vmatprep.subr.bf16.mxu1 %v884_v3  ;;  %v242_v63 = vmax.f32 %v241_v57, 0.0  ;;  %v860_v21 = vpack.c.bf16 %v629_v19, %v628_v18  ;;  %v631_v23 = vld [vmem:[%s1141_s1 + $0x178] sm:$0xff]  ;;  %v633_v34 = vld [vmem:[%s1142_s2] ss:$0 sm:$0xff] }
  0x17   : > { %v431_v24 = vadd.f32 %v1048_v47, %v430_v20  ;;  %v863_v25 = vpack.c.bf16 %v631_v23, %v630_v22 }
  0x18   : > { %807 = vmatpush3.bf16.msra.mxu0 %v806_v30 }
  0x19   : > { %831 = vmatpush3.bf16.msra.mxu1 %v830_v31  ;;  %808 = vmatprep.subr.bf16.mxu0 %v884_v3  ;;  %v432_v27 = vmax.f32 %v431_v24, 0.0 }
  0x1a   : > { %832 = vmatprep.subr.bf16.mxu1 %v884_v3 }
  0x1c   : > { %810 = vmatpush3.bf16.msra.mxu0 %v809_v36 }
  0x1d   : > { %834 = vmatpush3.bf16.msra.mxu1 %v833_v39  ;;  %811 = vmatprep.subr.bf16.mxu0 %v884_v3 }
  0x1e   : > { %835 = vmatprep.subr.bf16.mxu1 %v884_v3 }
  0x20   : > { %813 = vmatpush3.bf16.msra.mxu0 %v812_v46 }
  0x21   : > { %837 = vmatpush3.bf16.msra.mxu1 %v836_v49  ;;  %814 = vmatprep.subr.bf16.mxu0 %v884_v3 }
  0x22   : > { %838 = vmatprep.subr.bf16.mxu1 %v884_v3 }
  0x24   : > { %816 = vmatpush3.bf16.msra.mxu0 %v815_v56 }
  0x25   : > { %840 = vmatpush3.bf16.msra.mxu1 %v839_v58  ;;  %841 = vmatprep.subr.bf16.mxu0 %v884_v3 }
  0x27   : > { %721 = vmatmul.mubr.f32.vlgmr.msra.gmra.mrb[0].mxu0 %v266_v62 }
  0x28   : > { %756 = vmatmul.mubr.msk.f32.vlgmr.msra.gmra.mrb[0].mxu1 %vm243_vm1, %v242_v63  ;;  %843 = vmatpush3.bf16.msra.mxu0 %v842_v0 }
  0x29   : > { %844 = vmatprep.subr.bf16.mxu0 %v884_v3  ;;  %790 = vmatprep.mubr.msk.f32.mxu0 %vm885_vm0, %v886_v11  ;;  %v624_v11 = vld [vmem:[%s1141_s1 + $0x140] sm:$0xff] }
  0x2a   : > { %v854_v13 = vpack.c.bf16 %v625_v12, %v624_v11 }
  0x2c   : > { %846 = vmatpush3.bf16.msra.mxu0 %v845_v4 }
  0x2d   : > { %847 = vmatprep.subr.bf16.mxu0 %v884_v3 }
  0x30   : > { %849 = vmatpush3.bf16.msra.mxu0 %v848_v7 }
  0x31   : > { %850 = vmatprep.subr.bf16.mxu0 %v884_v3 }
  0x34   : > { %852 = vmatpush3.bf16.msra.mxu0 %v851_v10 }
  0x35   : > { %853 = vmatprep.subr.bf16.mxu0 %v884_v3 }
  0x38   : > { %855 = vmatpush3.bf16.msra.mxu0 %v854_v13 }
  0x39   : > { %856 = vmatprep.subr.bf16.mxu0 %v884_v3 }
  0x3c   : > { %858 = vmatpush3.bf16.msra.mxu0 %v857_v17 }
  0x3d   : > { %859 = vmatprep.subr.bf16.mxu0 %v884_v3 }
  0x40   : > { %861 = vmatpush3.bf16.msra.mxu0 %v860_v21 }
  0x41   : > { %862 = vmatprep.subr.bf16.mxu0 %v884_v3 }
  0x44   : > { %864 = vmatpush3.bf16.msra.mxu0 %v863_v25 }
  0x47   : > { %791 = vmatmul.mubr.msk.f32.vlgmr.msra.gmra.mrb[2].mxu0 %vm435_vm2, %v432_v27 }
  0xfa   : > { %v355_v28 = vpop.f32.mrb[0].mxu0 }
  0xfb   : > { %v722_v29 = vpop.f32.mrb[1].mxu0  ;;  %v425_v30 = vpop.f32.mrb[0].mxu1 }
  0xfc   : > { %v426_v31 = vadd.f32 %v425_v30, %v355_v28  ;;  %v757_v32 = vpop.f32.mrb[1].mxu1 }
 0x11a   : > { %v521_v33 = vpop.f32.mrb[2].mxu0 }
 0x11b   : > { %v525_v35 = vadd.f32 %v521_v33, %v426_v31  ;;  %v792_v36 = vpop.f32.mrb[3].mxu0 }
 0x11d   : > { %v533_v37 = vadd.f32 %v633_v34, %v525_v35 }
 0x11f   : > { %v534_v3 = vmax.f32 %v533_v37, 0.0 }
 0x121   : > { %535 = vst [vmem:[%s222_s13] sm:$0xff] %v534_v3 }
 0x122 PF: > { %s15_s18 = sadd.s32 1, %s882_s18  }
 0x123   : > { %p12_p4 = scmp.ge.s32.totalorder %s15_s18, 4  }
 0x125   :  { %14 = sbr.rel (!%p12_p4) target bundleno = 1 (0x1), region = 72 }

// kernel: _lambda_.16
= control target key start
LH: loop header
LB: loop body
LE: loop exit
PB: predicated region body
PF: predicated region fallthrough
CT: control target
= control target key end

     0   :  { %s873_s15 = smov 0   ;;  %s1083_s0 = inlined_call_operand.vmem [shape: f32[2,10,128], index: 0, kind: input, shape index: {}]   ;;  %s1084_s1 = inlined_call_operand.vmem [shape: f32[3,128,128], index: 1, kind: input, shape index: {}]   ;;  %s1085_s2 = inlined_call_operand.vmem [shape: f32[1,128], index: 2, kind: input, shape index: {}]   ;;  %s1086_s3 = inlined_call_operand.vmem [shape: f32[2,8,128], index: 3, kind: input, shape index: {}]   ;;  %s1087_s4 = inlined_call_operand.vmem [shape: f32[2,8,128], index: 4, kind: output, shape index: {}]  }
   0x1 LB: > { %s553_s16 = sadd.s32 4294967295, %s843_s15   ;;  %p557_p0 = scmp.ge.s32.totalorder %s843_s15, 1  ;;  %s843_s15 = sphi %s873_s15, %s14_s15  }
   0x2   : > { %p171_p1 = scmp.lt.s32.totalorder %s843_s15, 3 }
   0x4   : > { %p172_p2 = pnand %p557_p0, %p171_p1 }
   0x5   : > { %v562_v0 = vld [vmem:[%s1084_s1 + $0x80] sm:$0xff] (!%p172_p2)  ;;  %v563_v1 = vld [vmem:[%s1084_s1 + $0x88] sm:$0xff] (!%p172_p2)  ;;  %v845_v3 = vmov (!%p172_p2), 0.0|0.0   ;;  %v564_v6 = vld [vmem:[%s1084_s1 + $0x90] sm:$0xff] (!%p172_p2)  ;;  %vm846_vm0 = vmmov (!%p172_p2), 0   ;;  %v847_v11 = vmov (!%p172_p2), 0.0  }
   0x6   : > { %175 = sbr.rel (%p172_p2) target bundleno = 290 (0x122), region = 36  ;;  %v214_v2 = vld [vmem:[%s1084_s1] sm:$0xff] (!%p172_p2)  ;;  %754 = vmatprep.subr.bf16.mxu0 (!%p172_p2), %v845_v3  ;;  %v755_v4 = vpack.c.bf16 (!%p172_p2), %v563_v1, %v562_v0  ;;  %778 = vmatprep.subr.bf16.mxu1 (!%p172_p2), %v845_v3  ;;  %v215_v5 = vld [vmem:[%s1084_s1 + $0x8] sm:$0xff] (!%p172_p2)  ;;  %v565_v7 = vld [vmem:[%s1084_s1 + $0x98] sm:$0xff] (!%p172_p2)  ;;  %p200_p3 = scmp.lt.s32.totalorder (!%p172_p2), %s553_s16, 1 }
   0x7   : > { %v779_v8 = vpack.c.bf16 (!%p172_p2), %v215_v5, %v214_v2  ;;  %v216_v9 = vld [vmem:[%s1084_s1 + $0x10] sm:$0xff] (!%p172_p2)  ;;  %v217_v10 = vld [vmem:[%s1084_s1 + $0x18] sm:$0xff] (!%p172_p2)  ;;  %681 = vmatprep.mubr.msk.f32.mxu0 (!%p172_p2), %vm846_vm0, %v847_v11  ;;  %716 = vmatprep.mubr.msk.f32.mxu1 (!%p172_p2), %vm846_vm0, %v847_v11  ;;  %v758_v12 = vpack.c.bf16 (!%p172_p2), %v565_v7, %v564_v6  ;;  %v566_v14 = vld [vmem:[%s1084_s1 + $0xa0] sm:$0xff] (!%p172_p2) }
   0x8   : > { %756 = vmatpush3.bf16.msra.mxu0 (!%p172_p2), %v755_v4  ;;  %v782_v13 = vpack.c.bf16 (!%p172_p2), %v217_v10, %v216_v9  ;;  %v567_v15 = vld [vmem:[%s1084_s1 + $0xa8] sm:$0xff] (!%p172_p2)  ;;  %v218_v16 = vld [vmem:[%s1084_s1 + $0x20] sm:$0xff] (!%p172_p2)  ;;  %v568_v20 = vld [vmem:[%s1084_s1 + $0xb0] sm:$0xff] (!%p172_p2) }
   0x9   : > { %780 = vmatpush3.bf16.msra.mxu1 (!%p172_p2), %v779_v8  ;;  %757 = vmatprep.subr.bf16.mxu0 (!%p172_p2), %v845_v3  ;;  %v219_v17 = vld [vmem:[%s1084_s1 + $0x28] sm:$0xff] (!%p172_p2)  ;;  %v761_v18 = vpack.c.bf16 (!%p172_p2), %v567_v15, %v566_v14  ;;  %v569_v21 = vld [vmem:[%s1084_s1 + $0xb8] sm:$0xff] (!%p172_p2)  ;;  %v220_v22 = vld [vmem:[%s1084_s1 + $0x30] sm:$0xff] (!%p172_p2) }
   0xa   : > { %781 = vmatprep.subr.bf16.mxu1 (!%p172_p2), %v845_v3  ;;  %v785_v19 = vpack.c.bf16 (!%p172_p2), %v219_v17, %v218_v16  ;;  %v221_v23 = vld [vmem:[%s1084_s1 + $0x38] sm:$0xff] (!%p172_p2)  ;;  %v764_v24 = vpack.c.bf16 (!%p172_p2), %v569_v21, %v568_v20  ;;  %v570_v26 = vld [vmem:[%s1084_s1 + $0xc0] sm:$0xff] (!%p172_p2)  ;;  %v571_v27 = vld [vmem:[%s1084_s1 + $0xc8] sm:$0xff] (!%p172_p2) }
   0xb   : > { %v788_v25 = vpack.c.bf16 (!%p172_p2), %v221_v23, %v220_v22  ;;  %v222_v28 = vld [vmem:[%s1084_s1 + $0x40] sm:$0xff] (!%p172_p2)  ;;  %v223_v29 = vld [vmem:[%s1084_s1 + $0x48] sm:$0xff] (!%p172_p2)  ;;  %v767_v30 = vpack.c.bf16 (!%p172_p2), %v571_v27, %v570_v26  ;;  %v572_v32 = vld [vmem:[%s1084_s1 + $0xd0] sm:$0xff] (!%p172_p2) }
   0xc   : > { %759 = vmatpush3.bf16.msra.mxu0 (!%p172_p2), %v758_v12  ;;  %v791_v31 = vpack.c.bf16 (!%p172_p2), %v223_v29, %v222_v28  ;;  %v573_v33 = vld [vmem:[%s1084_s1 + $0xd8] sm:$0xff] (!%p172_p2)  ;;  %v224_v34 = vld [vmem:[%s1084_s1 + $0x50] sm:$0xff] (!%p172_p2)  ;;  %v574_v38 = vld [vmem:[%s1084_s1 + $0xe0] sm:$0xff] (!%p172_p2) }
   0xd   : > { %783 = vmatpush3.bf16.msra.mxu1 %v782_v13  ;;  %760 = vmatprep.subr.bf16.mxu0 %v845_v3  ;;  %v225_v35 = vld [vmem:[%s1084_s1 + $0x58] sm:$0xff]  ;;  %v770_v36 = vpack.c.bf16 %v573_v33, %v572_v32  ;;  %v575_v39 = vld [vmem:[%s1084_s1 + $0xe8] sm:$0xff]  ;;  %v226_v40 = vld [vmem:[%s1084_s1 + $0x60] sm:$0xff]  ;;  %s1089_s16 = smov (!%p200_p3, %s553_s16), 1 }
   0xe   : > { %784 = vmatprep.subr.bf16.mxu1 %v845_v3  ;;  %v794_v37 = vpack.c.bf16 %v225_v35, %v224_v34  ;;  %v227_v41 = vld [vmem:[%s1084_s1 + $0x68] sm:$0xff]  ;;  %v773_v42 = vpack.c.bf16 %v575_v39, %v574_v38  ;;  %v576_v44 = vld [vmem:[%s1084_s1 + $0xf0] sm:$0xff]  ;;  %v577_v45 = vld [vmem:[%s1084_s1 + $0xf8] sm:$0xff]  ;;  %s597_s7 = sshll.u32 %s1089_s16, 4  ;;  %s560_s22 = sshll.u32 %s1089_s16, 3 }
   0xf   : > { %v797_v43 = vpack.c.bf16 %v227_v41, %v226_v40  ;;  %v228_v46 = vld [vmem:[%s1084_s1 + $0x70] sm:$0xff]  ;;  %v229_v47 = vld [vmem:[%s1084_s1 + $0x78] sm:$0xff]  ;;  %v776_v48 = vpack.c.bf16 %v577_v45, %v576_v44  ;;  %s1006_s10 = scalar_lea.vmem %s1083_s0, %s597_s7  ;;  %v578_v50 = vld [vmem:[%s1084_s1 + $0x100] sm:$0xff]  ;;  %s208_s25 = scalar_lea.vmem %s1086_s3, %s560_s22 }
  0x10   : > { %762 = vmatpush3.bf16.msra.mxu0 %v761_v18  ;;  %v800_v49 = vpack.c.bf16 %v229_v47, %v228_v46  ;;  %v579_v51 = vld [vmem:[%s1084_s1 + $0x108] sm:$0xff]  ;;  %v213_v54 = vld [vmem:[%s1006_s10] sm:$0xff]  ;;  %v580_v55 = vld [vmem:[%s1084_s1 + $0x110] sm:$0xff]  ;;  %s212_s29 = scalar_lea.vmem %s1087_s4, %s560_s22 }
  0x11   : > { %786 = vmatpush3.bf16.msra.mxu1 %v785_v19  ;;  %763 = vmatprep.subr.bf16.mxu0 %v845_v3  ;;  %v230_v52 = vld [vmem:[%s1006_s10 + $0x1] sm:$0xff]  ;;  %v803_v53 = vpack.c.bf16 %v579_v51, %v578_v50  ;;  %v581_v56 = vld [vmem:[%s1084_s1 + $0x118] sm:$0xff]  ;;  %v584_v61 = vld [vmem:[%s1084_s1 + $0x130] sm:$0xff] }
  0x12   : > { %787 = vmatprep.subr.bf16.mxu1 %v845_v3  ;;  %v806_v57 = vpack.c.bf16 %v581_v56, %v580_v55  ;;  %v582_v58 = vld [vmem:[%s1084_s1 + $0x120] sm:$0xff]  ;;  %v583_v59 = vld [vmem:[%s1084_s1 + $0x128] sm:$0xff]  ;;  %v585_v62 = vld [vmem:[%s1084_s1 + $0x138] sm:$0xff] }
  0x13   : > { %v809_v60 = vpack.c.bf16 %v583_v59, %v582_v58  ;;  %v812_v63 = vpack.c.bf16 %v585_v62, %v584_v61  ;;  %v586_v0 = vld [vmem:[%s1084_s1 + $0x140] sm:$0xff]  ;;  %v587_v1 = vld [vmem:[%s1084_s1 + $0x148] sm:$0xff]  ;;  %v588_v4 = vld [vmem:[%s1084_s1 + $0x150] sm:$0xff] }
  0x14   : > { %765 = vmatpush3.bf16.msra.mxu0 %v764_v24  ;;  %v815_v2 = vpack.c.bf16 %v587_v1, %v586_v0  ;;  %v589_v5 = vld [vmem:[%s1084_s1 + $0x158] sm:$0xff]  ;;  %v590_v7 = vld [vmem:[%s1084_s1 + $0x160] sm:$0xff]  ;;  %v591_v8 = vld [vmem:[%s1084_s1 + $0x168] sm:$0xff] }
  0x15   : > { %789 = vmatpush3.bf16.msra.mxu1 %v788_v25  ;;  %766 = vmatprep.subr.bf16.mxu0 %v845_v3  ;;  %v818_v6 = vpack.c.bf16 %v589_v5, %v588_v4  ;;  %v821_v9 = vpack.c.bf16 %v591_v8, %v590_v7  ;;  %v592_v10 = vld [vmem:[%s1084_s1 + $0x170] sm:$0xff]  ;;  %v388_v13 = vld [vmem:[%s1006_s10 + $0x2] sm:$0xff]  ;;  %v594_v20 = vld [vmem:[%s1085_s2] ss:$0 sm:$0xff] }
  0x16   : > { %790 = vmatprep.subr.bf16.mxu1 %v845_v3  ;;  %v485_v22 = vld [vmem:[%s208_s25] sm:$0xff] }
  0x18   : > { %768 = vmatpush3.bf16.msra.mxu0 %v767_v30 }
  0x19   : > { %792 = vmatpush3.bf16.msra.mxu1 %v791_v31  ;;  %769 = vmatprep.subr.bf16.mxu0 %v845_v3 }
  0x1a   : > { %793 = vmatprep.subr.bf16.mxu1 %v845_v3 }
  0x1c   : > { %771 = vmatpush3.bf16.msra.mxu0 %v770_v36 }
  0x1d   : > { %795 = vmatpush3.bf16.msra.mxu1 %v794_v37  ;;  %772 = vmatprep.subr.bf16.mxu0 %v845_v3 }
  0x1e   : > { %796 = vmatprep.subr.bf16.mxu1 %v845_v3 }
  0x20   : > { %774 = vmatpush3.bf16.msra.mxu0 %v773_v42 }
  0x21   : > { %798 = vmatpush3.bf16.msra.mxu1 %v797_v43  ;;  %775 = vmatprep.subr.bf16.mxu0 %v845_v3 }
  0x22   : > { %799 = vmatprep.subr.bf16.mxu1 %v845_v3 }
  0x24   : > { %777 = vmatpush3.bf16.msra.mxu0 %v776_v48 }
  0x25   : > { %801 = vmatpush3.bf16.msra.mxu1 %v800_v49  ;;  %802 = vmatprep.subr.bf16.mxu0 %v845_v3 }
  0x27   : > { %682 = vmatmul.mubr.f32.vlgmr.msra.gmra.mrb[0].mxu0 %v230_v52 }
  0x28   : > { %717 = vmatmul.mubr.f32.vlgmr.msra.gmra.mrb[0].mxu1 %v213_v54  ;;  %804 = vmatpush3.bf16.msra.mxu0 %v803_v53 }
  0x29   : > { %805 = vmatprep.subr.bf16.mxu0 %v845_v3  ;;  %751 = vmatprep.mubr.msk.f32.mxu0 %vm846_vm0, %v847_v11  ;;  %v593_v11 = vld [vmem:[%s1084_s1 + $0x178] sm:$0xff] }
  0x2a   : > { %v824_v12 = vpack.c.bf16 %v593_v11, %v592_v10 }
  0x2c   : > { %807 = vmatpush3.bf16.msra.mxu0 %v806_v57 }
  0x2d   : > { %808 = vmatprep.subr.bf16.mxu0 %v845_v3 }
  0x30   : > { %810 = vmatpush3.bf16.msra.mxu0 %v809_v60 }
  0x31   : > { %811 = vmatprep.subr.bf16.mxu0 %v845_v3 }
  0x34   : > { %813 = vmatpush3.bf16.msra.mxu0 %v812_v63 }
  0x35   : > { %814 = vmatprep.subr.bf16.mxu0 %v845_v3 }
  0x38   : > { %816 = vmatpush3.bf16.msra.mxu0 %v815_v2 }
  0x39   : > { %817 = vmatprep.subr.bf16.mxu0 %v845_v3 }
  0x3c   : > { %819 = vmatpush3.bf16.msra.mxu0 %v818_v6 }
  0x3d   : > { %820 = vmatprep.subr.bf16.mxu0 %v845_v3 }
  0x40   : > { %822 = vmatpush3.bf16.msra.mxu0 %v821_v9 }
  0x41   : > { %823 = vmatprep.subr.bf16.mxu0 %v845_v3 }
  0x44   : > { %825 = vmatpush3.bf16.msra.mxu0 %v824_v12 }
  0x47   : > { %752 = vmatmul.mubr.f32.vlgmr.msra.gmra.mrb[2].mxu0 %v388_v13 }
  0xfa   : > { %v314_v14 = vpop.f32.mrb[0].mxu0 }
  0xfb   : > { %v683_v15 = vpop.f32.mrb[1].mxu0  ;;  %v384_v16 = vpop.f32.mrb[0].mxu1 }
  0xfc   : > { %v385_v17 = vadd.f32 %v384_v16, %v314_v14  ;;  %v718_v18 = vpop.f32.mrb[1].mxu1 }
 0x11a   : > { %v472_v19 = vpop.f32.mrb[2].mxu0 }
 0x11b   : > { %v476_v21 = vadd.f32 %v472_v19, %v385_v17  ;;  %v753_v3 = vpop.f32.mrb[3].mxu0 }
 0x11d   : > { %v484_v23 = vadd.f32 %v594_v20, %v476_v21 }
 0x11f   : > { %v486_v24 = vadd.f32 %v485_v22, %v484_v23 }
 0x121   : > { %487 = vst [vmem:[%s212_s29] sm:$0xff] %v486_v24 }
 0x122 PF: > { %s14_s15 = sadd.s32 1, %s843_s15  }
 0x123   : > { %p11_p4 = scmp.ge.s32.totalorder %s14_s15, 4  }
 0x125   :  { %13 = sbr.rel (!%p11_p4) target bundleno = 1 (0x1), region = 71 }

// kernel: _lambda_.17
= control target key start
LH: loop header
LB: loop body
LE: loop exit
PB: predicated region body
PF: predicated region fallthrough
CT: control target
= control target key end

     0   :  { %s923_s18 = smov 0   ;;  %s1152_s0 = inlined_call_operand.vmem [shape: f32[2,9,128], index: 0, kind: input, shape index: {}]   ;;  %s1153_s1 = inlined_call_operand.vmem [shape: f32[3,128,128], index: 1, kind: input, shape index: {}]   ;;  %s1154_s2 = inlined_call_operand.vmem [shape: f32[1,128], index: 2, kind: input, shape index: {}]   ;;  %s1155_s3 = inlined_call_operand.vmem [shape: f32[1,128], index: 3, kind: input, shape index: {}]   ;;  %s1156_s4 = inlined_call_operand.vmem [shape: f32[1,128], index: 4, kind: input, shape index: {}]   ;;  %s1157_s5 = inlined_call_operand.vmem [shape: f32[2,4,128], index: 5, kind: output, shape index: {}]  }
   0x1 LB: > { %s592_s19 = sadd.s32 4294967295, %s888_s18   ;;  %p596_p0 = scmp.ge.s32.totalorder %s888_s18, 1  ;;  %s888_s18 = sphi %s923_s18, %s15_s18  }
   0x2   : > { %p187_p1 = scmp.lt.s32.totalorder %s888_s18, 3 }
   0x4   : > { %p188_p2 = pnand %p596_p0, %p187_p1 }
   0x5   : > { %v603_v0 = vld [vmem:[%s1153_s1 + $0x80] sm:$0xff] (!%p188_p2)  ;;  %v604_v1 = vld [vmem:[%s1153_s1 + $0x88] sm:$0xff] (!%p188_p2)  ;;  %v890_v3 = vmov (!%p188_p2), 0.0|0.0   ;;  %v605_v6 = vld [vmem:[%s1153_s1 + $0x90] sm:$0xff] (!%p188_p2)  ;;  %vm891_vm0 = vmmov (!%p188_p2), 0   ;;  %v892_v11 = vmov (!%p188_p2), 0.0   ;;  %v225_v28 = vlaneseq (!%p188_p2) }
   0x6   : > { %191 = sbr.rel (%p188_p2) target bundleno = 290 (0x122), region = 40  ;;  %v248_v2 = vld [vmem:[%s1153_s1] sm:$0xff] (!%p188_p2)  ;;  %799 = vmatprep.subr.bf16.mxu0 (!%p188_p2), %v890_v3  ;;  %v800_v4 = vpack.c.bf16 (!%p188_p2), %v604_v1, %v603_v0  ;;  %823 = vmatprep.subr.bf16.mxu1 (!%p188_p2), %v890_v3  ;;  %v249_v5 = vld [vmem:[%s1153_s1 + $0x8] sm:$0xff] (!%p188_p2)  ;;  %v606_v7 = vld [vmem:[%s1153_s1 + $0x98] sm:$0xff] (!%p188_p2)  ;;  %p214_p3 = scmp.lt.s32.totalorder (!%p188_p2), %s592_s19, 1 }
   0x7   : > { %v824_v8 = vpack.c.bf16 (!%p188_p2), %v249_v5, %v248_v2  ;;  %v250_v9 = vld [vmem:[%s1153_s1 + $0x10] sm:$0xff] (!%p188_p2)  ;;  %v251_v10 = vld [vmem:[%s1153_s1 + $0x18] sm:$0xff] (!%p188_p2)  ;;  %726 = vmatprep.mubr.msk.f32.mxu0 (!%p188_p2), %vm891_vm0, %v892_v11  ;;  %761 = vmatprep.mubr.msk.f32.mxu1 (!%p188_p2), %vm891_vm0, %v892_v11  ;;  %v803_v12 = vpack.c.bf16 (!%p188_p2), %v606_v7, %v605_v6  ;;  %v607_v14 = vld [vmem:[%s1153_s1 + $0xa0] sm:$0xff] (!%p188_p2)  ;;  %v226_v35 = vshrl.u32 (!%p188_p2), %v225_v28, 7 }
   0x8   : > { %801 = vmatpush3.bf16.msra.mxu0 (!%p188_p2), %v800_v4  ;;  %v827_v13 = vpack.c.bf16 (!%p188_p2), %v251_v10, %v250_v9  ;;  %v608_v15 = vld [vmem:[%s1153_s1 + $0xa8] sm:$0xff] (!%p188_p2)  ;;  %v252_v16 = vld [vmem:[%s1153_s1 + $0x20] sm:$0xff] (!%p188_p2)  ;;  %v609_v20 = vld [vmem:[%s1153_s1 + $0xb0] sm:$0xff] (!%p188_p2) }
   0x9   : > { %825 = vmatpush3.bf16.msra.mxu1 (!%p188_p2), %v824_v8  ;;  %802 = vmatprep.subr.bf16.mxu0 (!%p188_p2), %v890_v3  ;;  %v253_v17 = vld [vmem:[%s1153_s1 + $0x28] sm:$0xff] (!%p188_p2)  ;;  %v806_v18 = vpack.c.bf16 (!%p188_p2), %v608_v15, %v607_v14  ;;  %v610_v21 = vld [vmem:[%s1153_s1 + $0xb8] sm:$0xff] (!%p188_p2)  ;;  %v254_v22 = vld [vmem:[%s1153_s1 + $0x30] sm:$0xff] (!%p188_p2)  ;;  %v1042_v44 = vmul.u32 (!%p188_p2), 2, %v226_v35 }
   0xa   : > { %826 = vmatprep.subr.bf16.mxu1 (!%p188_p2), %v890_v3  ;;  %v830_v19 = vpack.c.bf16 (!%p188_p2), %v253_v17, %v252_v16  ;;  %v255_v23 = vld [vmem:[%s1153_s1 + $0x38] sm:$0xff] (!%p188_p2)  ;;  %v809_v24 = vpack.c.bf16 (!%p188_p2), %v610_v21, %v609_v20  ;;  %v611_v26 = vld [vmem:[%s1153_s1 + $0xc0] sm:$0xff] (!%p188_p2)  ;;  %v612_v27 = vld [vmem:[%s1153_s1 + $0xc8] sm:$0xff] (!%p188_p2) }
   0xb   : > { %v833_v25 = vpack.c.bf16 (!%p188_p2), %v255_v23, %v254_v22  ;;  %v256_v29 = vld [vmem:[%s1153_s1 + $0x40] sm:$0xff] (!%p188_p2)  ;;  %v257_v30 = vld [vmem:[%s1153_s1 + $0x48] sm:$0xff] (!%p188_p2)  ;;  %v812_v31 = vpack.c.bf16 (!%p188_p2), %v612_v27, %v611_v26  ;;  %v613_v33 = vld [vmem:[%s1153_s1 + $0xd0] sm:$0xff] (!%p188_p2)  ;;  %v269_v55 = vadd.s32 (!%p188_p2), 1, %v1042_v44  ;;  %vm244_vm3 = vcmp.ge.s32.totalorder (!%p188_p2), %v1042_v44, 0 }
   0xc   : > { %804 = vmatpush3.bf16.msra.mxu0 (!%p188_p2), %v803_v12  ;;  %v836_v32 = vpack.c.bf16 (!%p188_p2), %v257_v30, %v256_v29  ;;  %v614_v34 = vld [vmem:[%s1153_s1 + $0xd8] sm:$0xff] (!%p188_p2)  ;;  %v258_v36 = vld [vmem:[%s1153_s1 + $0x50] sm:$0xff] (!%p188_p2)  ;;  %v1032_v39 = vld [vmem:[%s1155_s3] ss:$0 sm:$0xff] (!%p188_p2)  ;;  %vm245_vm4 = vcmp.lt.s32.totalorder (!%p188_p2), %v1042_v44, 8  ;;  %v436_v26 = vadd.s32 (!%p188_p2), 2, %v1042_v44 }
   0xd   : > { %828 = vmatpush3.bf16.msra.mxu1 %v827_v13  ;;  %805 = vmatprep.subr.bf16.mxu0 %v890_v3  ;;  %s1159_s19 = smov (!%p214_p3, %s592_s19), 1  ;;  %v259_v37 = vld [vmem:[%s1153_s1 + $0x58] sm:$0xff]  ;;  %v815_v38 = vpack.c.bf16 %v614_v34, %v613_v33  ;;  %v615_v42 = vld [vmem:[%s1153_s1 + $0xe0] sm:$0xff]  ;;  %v616_v43 = vld [vmem:[%s1153_s1 + $0xe8] sm:$0xff]  ;;  %vm270_vm1 = vcmp.ge.s32.totalorder %v269_v55, 0  ;;  %vm271_vm2 = vcmp.lt.s32.totalorder %v269_v55, 8 }
   0xe   : > { %829 = vmatprep.subr.bf16.mxu1 %v890_v3  ;;  %s642_s12 = sshll.u32 %s1159_s19, 4  ;;  %v839_v41 = vpack.c.bf16 %v259_v37, %v258_v36  ;;  %v260_v46 = vld [vmem:[%s1153_s1 + $0x60] sm:$0xff]  ;;  %v261_v47 = vld [vmem:[%s1153_s1 + $0x68] sm:$0xff]  ;;  %v818_v49 = vpack.c.bf16 %v616_v43, %v615_v42  ;;  %v617_v53 = vld [vmem:[%s1153_s1 + $0xf0] sm:$0xff]  ;;  %vm437_vm7 = vcmp.ge.s32.totalorder %v436_v26, 0  ;;  %vm438_vm8 = vcmp.lt.s32.totalorder %v436_v26, 8 }
   0xf   : > { %s1020_s21 = scalar_lea.vmem %s1152_s0, %s642_s12  ;;  %v1056_v50 = vld [vmem:[%s1156_s4] ss:$0 sm:$0xff]  ;;  %v842_v52 = vpack.c.bf16 %v261_v47, %v260_v46  ;;  %v618_v54 = vld [vmem:[%s1153_s1 + $0xf8] sm:$0xff]  ;;  %v262_v56 = vld [vmem:[%s1153_s1 + $0x70] sm:$0xff]  ;;  %s599_s10 = sshll.u32 %s1159_s19, 2 }
  0x10   : > { %807 = vmatpush3.bf16.msra.mxu0 %v806_v18  ;;  %v602_v40 = vld [vmem:[%s1020_s21 + $0x1] ss:$2 sm:$0xf]  ;;  %v228_v45 = vld [vmem:[%s1020_s21] ss:$2 sm:$0xf]  ;;  %v821_v59 = vpack.c.bf16 %v618_v54, %v617_v53  ;;  %vm272_vm5 = vmand %vm270_vm1, %vm271_vm2  ;;  %s222_s13 = scalar_lea.vmem %s1157_s5, %s599_s10 }
  0x11   : > { %831 = vmatpush3.bf16.msra.mxu1 %v830_v19  ;;  %808 = vmatprep.subr.bf16.mxu0 %v890_v3  ;;  %v266_v48 = vmul.f32 %v602_v40, %v1032_v39  ;;  %v235_v51 = vmul.f32 %v1032_v39, %v228_v45  ;;  %v263_v57 = vld [vmem:[%s1153_s1 + $0x78] sm:$0xff]  ;;  %v622_v62 = vld [vmem:[%s1153_s1 + $0x100] sm:$0xff]  ;;  %v623_v63 = vld [vmem:[%s1153_s1 + $0x108] sm:$0xff] }
  0x12   : > { %832 = vmatprep.subr.bf16.mxu1 %v890_v3  ;;  %v845_v61 = vpack.c.bf16 %v263_v57, %v262_v56  ;;  %v848_v2 = vpack.c.bf16 %v623_v63, %v622_v62  ;;  %vm246_vm6 = vmand %vm244_vm3, %vm245_vm4  ;;  %v624_v4 = vld [vmem:[%s1153_s1 + $0x110] sm:$0xff]  ;;  %v625_v5 = vld [vmem:[%s1153_s1 + $0x118] sm:$0xff] }
  0x13   : > { %v267_v58 = vadd.f32 %v1056_v50, %v266_v48  ;;  %v242_v60 = vadd.f32 %v1056_v50, %v235_v51  ;;  %v851_v6 = vpack.c.bf16 %v625_v5, %v624_v4  ;;  %v626_v7 = vld [vmem:[%s1153_s1 + $0x120] sm:$0xff]  ;;  %v627_v8 = vld [vmem:[%s1153_s1 + $0x128] sm:$0xff]  ;;  %v628_v10 = vld [vmem:[%s1153_s1 + $0x130] sm:$0xff] }
  0x14   : > { %810 = vmatpush3.bf16.msra.mxu0 %v809_v24  ;;  %v854_v9 = vpack.c.bf16 %v627_v8, %v626_v7  ;;  %v629_v12 = vld [vmem:[%s1153_s1 + $0x138] sm:$0xff]  ;;  %v631_v14 = vld [vmem:[%s1153_s1 + $0x148] sm:$0xff]  ;;  %v632_v16 = vld [vmem:[%s1153_s1 + $0x150] sm:$0xff] }
  0x15   : > { %834 = vmatpush3.bf16.msra.mxu1 %v833_v25  ;;  %811 = vmatprep.subr.bf16.mxu0 %v890_v3  ;;  %v268_v0 = vmax.f32 %v267_v58, 0.0  ;;  %v243_v1 = vmax.f32 %v242_v60, 0.0  ;;  %v857_v13 = vpack.c.bf16 %v629_v12, %v628_v10  ;;  %v633_v17 = vld [vmem:[%s1153_s1 + $0x158] sm:$0xff]  ;;  %v621_v19 = vld [vmem:[%s1020_s21 + $0x2] ss:$2 sm:$0xf]  ;;  %vm439_vm9 = vmand %vm437_vm7, %vm438_vm8 }
  0x16   : > { %835 = vmatprep.subr.bf16.mxu1 %v890_v3  ;;  %v863_v18 = vpack.c.bf16 %v633_v17, %v632_v16  ;;  %v634_v20 = vld [vmem:[%s1153_s1 + $0x160] sm:$0xff]  ;;  %v635_v21 = vld [vmem:[%s1153_s1 + $0x168] sm:$0xff]  ;;  %v433_v22 = vmul.f32 %v621_v19, %v1032_v39  ;;  %v636_v24 = vld [vmem:[%s1153_s1 + $0x170] sm:$0xff] }
  0x17   : > { %v866_v23 = vpack.c.bf16 %v635_v21, %v634_v20  ;;  %v637_v25 = vld [vmem:[%s1153_s1 + $0x178] sm:$0xff]  ;;  %v639_v36 = vld [vmem:[%s1154_s2] ss:$0 sm:$0xff] }
  0x18   : > { %813 = vmatpush3.bf16.msra.mxu0 %v812_v31  ;;  %v434_v27 = vadd.f32 %v1056_v50, %v433_v22  ;;  %v869_v28 = vpack.c.bf16 %v637_v25, %v636_v24 }
  0x19   : > { %837 = vmatpush3.bf16.msra.mxu1 %v836_v32  ;;  %814 = vmatprep.subr.bf16.mxu0 %v890_v3 }
  0x1a   : > { %838 = vmatprep.subr.bf16.mxu1 %v890_v3  ;;  %v435_v29 = vmax.f32 %v434_v27, 0.0 }
  0x1c   : > { %816 = vmatpush3.bf16.msra.mxu0 %v815_v38 }
  0x1d   : > { %840 = vmatpush3.bf16.msra.mxu1 %v839_v41  ;;  %817 = vmatprep.subr.bf16.mxu0 %v890_v3 }
  0x1e   : > { %841 = vmatprep.subr.bf16.mxu1 %v890_v3 }
  0x20   : > { %819 = vmatpush3.bf16.msra.mxu0 %v818_v49 }
  0x21   : > { %843 = vmatpush3.bf16.msra.mxu1 %v842_v52  ;;  %820 = vmatprep.subr.bf16.mxu0 %v890_v3 }
  0x22   : > { %844 = vmatprep.subr.bf16.mxu1 %v890_v3 }
  0x24   : > { %822 = vmatpush3.bf16.msra.mxu0 %v821_v59 }
  0x25   : > { %846 = vmatpush3.bf16.msra.mxu1 %v845_v61  ;;  %847 = vmatprep.subr.bf16.mxu0 %v890_v3 }
  0x27   : > { %727 = vmatmul.mubr.msk.f32.vlgmr.msra.gmra.mrb[0].mxu0 %vm272_vm5, %v268_v0 }
  0x28   : > { %762 = vmatmul.mubr.msk.f32.vlgmr.msra.gmra.mrb[0].mxu1 %vm246_vm6, %v243_v1  ;;  %849 = vmatpush3.bf16.msra.mxu0 %v848_v2 }
  0x29   : > { %850 = vmatprep.subr.bf16.mxu0 %v890_v3  ;;  %796 = vmatprep.mubr.msk.f32.mxu0 %vm891_vm0, %v892_v11  ;;  %v630_v11 = vld [vmem:[%s1153_s1 + $0x140] sm:$0xff] }
  0x2a   : > { %v860_v15 = vpack.c.bf16 %v631_v14, %v630_v11 }
  0x2c   : > { %852 = vmatpush3.bf16.msra.mxu0 %v851_v6 }
  0x2d   : > { %853 = vmatprep.subr.bf16.mxu0 %v890_v3 }
  0x30   : > { %855 = vmatpush3.bf16.msra.mxu0 %v854_v9 }
  0x31   : > { %856 = vmatprep.subr.bf16.mxu0 %v890_v3 }
  0x34   : > { %858 = vmatpush3.bf16.msra.mxu0 %v857_v13 }
  0x35   : > { %859 = vmatprep.subr.bf16.mxu0 %v890_v3 }
  0x38   : > { %861 = vmatpush3.bf16.msra.mxu0 %v860_v15 }
  0x39   : > { %862 = vmatprep.subr.bf16.mxu0 %v890_v3 }
  0x3c   : > { %864 = vmatpush3.bf16.msra.mxu0 %v863_v18 }
  0x3d   : > { %865 = vmatprep.subr.bf16.mxu0 %v890_v3 }
  0x40   : > { %867 = vmatpush3.bf16.msra.mxu0 %v866_v23 }
  0x41   : > { %868 = vmatprep.subr.bf16.mxu0 %v890_v3 }
  0x44   : > { %870 = vmatpush3.bf16.msra.mxu0 %v869_v28 }
  0x47   : > { %797 = vmatmul.mubr.msk.f32.vlgmr.msra.gmra.mrb[2].mxu0 %vm439_vm9, %v435_v29 }
  0xfa   : > { %v357_v30 = vpop.f32.mrb[0].mxu0 }
  0xfb   : > { %v728_v31 = vpop.f32.mrb[1].mxu0  ;;  %v427_v32 = vpop.f32.mrb[0].mxu1 }
  0xfc   : > { %v428_v33 = vadd.f32 %v427_v32, %v357_v30  ;;  %v763_v34 = vpop.f32.mrb[1].mxu1 }
 0x11a   : > { %v524_v35 = vpop.f32.mrb[2].mxu0 }
 0x11b   : > { %v528_v37 = vadd.f32 %v524_v35, %v428_v33  ;;  %v798_v38 = vpop.f32.mrb[3].mxu0 }
 0x11d   : > { %v536_v3 = vadd.f32 %v639_v36, %v528_v37 }
 0x11f   : > { %v537_v39 = vmax.f32 %v536_v3, 0.0 }
 0x121   : > { %538 = vst [vmem:[%s222_s13] sm:$0xf] %v537_v39 }
 0x122 PF: > { %s15_s18 = sadd.s32 1, %s888_s18  }
 0x123   : > { %p12_p4 = scmp.ge.s32.totalorder %s15_s18, 4  }
 0x125   :  { %14 = sbr.rel (!%p12_p4) target bundleno = 1 (0x1), region = 74 }

// kernel: _lambda_.18
= control target key start
LH: loop header
LB: loop body
LE: loop exit
PB: predicated region body
PF: predicated region fallthrough
CT: control target
= control target key end

     0   :  { %s872_s15 = smov 0   ;;  %s1086_s0 = inlined_call_operand.vmem [shape: f32[2,6,128], index: 0, kind: input, shape index: {}]   ;;  %s1087_s1 = inlined_call_operand.vmem [shape: f32[3,128,128], index: 1, kind: input, shape index: {}]   ;;  %s1088_s2 = inlined_call_operand.vmem [shape: f32[1,128], index: 2, kind: input, shape index: {}]   ;;  %s1089_s3 = inlined_call_operand.vmem [shape: f32[2,8,128], index: 3, kind: input, shape index: {}]   ;;  %s1090_s4 = inlined_call_operand.vmem [shape: f32[2,4,128], index: 4, kind: output, shape index: {}]  }
   0x1 LB: > { %s553_s16 = sadd.s32 4294967295, %s842_s15   ;;  %p557_p0 = scmp.ge.s32.totalorder %s842_s15, 1  ;;  %s842_s15 = sphi %s872_s15, %s14_s15  }
   0x2   : > { %p170_p1 = scmp.lt.s32.totalorder %s842_s15, 3 }
   0x4   : > { %p171_p2 = pnand %p557_p0, %p170_p1 }
   0x5   : > { %v561_v0 = vld [vmem:[%s1087_s1 + $0x80] sm:$0xff] (!%p171_p2)  ;;  %v562_v1 = vld [vmem:[%s1087_s1 + $0x88] sm:$0xff] (!%p171_p2)  ;;  %v844_v3 = vmov (!%p171_p2), 0.0|0.0   ;;  %v563_v6 = vld [vmem:[%s1087_s1 + $0x90] sm:$0xff] (!%p171_p2)  ;;  %vm845_vm0 = vmmov (!%p171_p2), 0   ;;  %v846_v11 = vmov (!%p171_p2), 0.0  }
   0x6   : > { %174 = sbr.rel (%p171_p2) target bundleno = 290 (0x122), region = 36  ;;  %v211_v2 = vld [vmem:[%s1087_s1] sm:$0xff] (!%p171_p2)  ;;  %753 = vmatprep.subr.bf16.mxu0 (!%p171_p2), %v844_v3  ;;  %v754_v4 = vpack.c.bf16 (!%p171_p2), %v562_v1, %v561_v0  ;;  %777 = vmatprep.subr.bf16.mxu1 (!%p171_p2), %v844_v3  ;;  %v212_v5 = vld [vmem:[%s1087_s1 + $0x8] sm:$0xff] (!%p171_p2)  ;;  %v564_v7 = vld [vmem:[%s1087_s1 + $0x98] sm:$0xff] (!%p171_p2)  ;;  %p198_p3 = scmp.lt.s32.totalorder (!%p171_p2), %s553_s16, 1 }
   0x7   : > { %v778_v8 = vpack.c.bf16 (!%p171_p2), %v212_v5, %v211_v2  ;;  %v213_v9 = vld [vmem:[%s1087_s1 + $0x10] sm:$0xff] (!%p171_p2)  ;;  %v214_v10 = vld [vmem:[%s1087_s1 + $0x18] sm:$0xff] (!%p171_p2)  ;;  %680 = vmatprep.mubr.msk.f32.mxu0 (!%p171_p2), %vm845_vm0, %v846_v11  ;;  %715 = vmatprep.mubr.msk.f32.mxu1 (!%p171_p2), %vm845_vm0, %v846_v11  ;;  %v757_v12 = vpack.c.bf16 (!%p171_p2), %v564_v7, %v563_v6  ;;  %v565_v14 = vld [vmem:[%s1087_s1 + $0xa0] sm:$0xff] (!%p171_p2) }
   0x8   : > { %755 = vmatpush3.bf16.msra.mxu0 (!%p171_p2), %v754_v4  ;;  %v781_v13 = vpack.c.bf16 (!%p171_p2), %v214_v10, %v213_v9  ;;  %v566_v15 = vld [vmem:[%s1087_s1 + $0xa8] sm:$0xff] (!%p171_p2)  ;;  %v215_v16 = vld [vmem:[%s1087_s1 + $0x20] sm:$0xff] (!%p171_p2)  ;;  %v567_v20 = vld [vmem:[%s1087_s1 + $0xb0] sm:$0xff] (!%p171_p2) }
   0x9   : > { %779 = vmatpush3.bf16.msra.mxu1 (!%p171_p2), %v778_v8  ;;  %756 = vmatprep.subr.bf16.mxu0 (!%p171_p2), %v844_v3  ;;  %v216_v17 = vld [vmem:[%s1087_s1 + $0x28] sm:$0xff] (!%p171_p2)  ;;  %v760_v18 = vpack.c.bf16 (!%p171_p2), %v566_v15, %v565_v14  ;;  %v568_v21 = vld [vmem:[%s1087_s1 + $0xb8] sm:$0xff] (!%p171_p2)  ;;  %v217_v22 = vld [vmem:[%s1087_s1 + $0x30] sm:$0xff] (!%p171_p2) }
   0xa   : > { %780 = vmatprep.subr.bf16.mxu1 (!%p171_p2), %v844_v3  ;;  %v784_v19 = vpack.c.bf16 (!%p171_p2), %v216_v17, %v215_v16  ;;  %v218_v23 = vld [vmem:[%s1087_s1 + $0x38] sm:$0xff] (!%p171_p2)  ;;  %v763_v24 = vpack.c.bf16 (!%p171_p2), %v568_v21, %v567_v20  ;;  %v569_v26 = vld [vmem:[%s1087_s1 + $0xc0] sm:$0xff] (!%p171_p2)  ;;  %v570_v27 = vld [vmem:[%s1087_s1 + $0xc8] sm:$0xff] (!%p171_p2) }
   0xb   : > { %v787_v25 = vpack.c.bf16 (!%p171_p2), %v218_v23, %v217_v22  ;;  %v219_v28 = vld [vmem:[%s1087_s1 + $0x40] sm:$0xff] (!%p171_p2)  ;;  %v220_v29 = vld [vmem:[%s1087_s1 + $0x48] sm:$0xff] (!%p171_p2)  ;;  %v766_v30 = vpack.c.bf16 (!%p171_p2), %v570_v27, %v569_v26  ;;  %v571_v32 = vld [vmem:[%s1087_s1 + $0xd0] sm:$0xff] (!%p171_p2) }
   0xc   : > { %758 = vmatpush3.bf16.msra.mxu0 (!%p171_p2), %v757_v12  ;;  %v790_v31 = vpack.c.bf16 (!%p171_p2), %v220_v29, %v219_v28  ;;  %v572_v33 = vld [vmem:[%s1087_s1 + $0xd8] sm:$0xff] (!%p171_p2)  ;;  %v221_v34 = vld [vmem:[%s1087_s1 + $0x50] sm:$0xff] (!%p171_p2)  ;;  %v573_v38 = vld [vmem:[%s1087_s1 + $0xe0] sm:$0xff] (!%p171_p2) }
   0xd   : > { %782 = vmatpush3.bf16.msra.mxu1 %v781_v13  ;;  %759 = vmatprep.subr.bf16.mxu0 %v844_v3  ;;  %v222_v35 = vld [vmem:[%s1087_s1 + $0x58] sm:$0xff]  ;;  %v769_v36 = vpack.c.bf16 %v572_v33, %v571_v32  ;;  %v574_v39 = vld [vmem:[%s1087_s1 + $0xe8] sm:$0xff]  ;;  %v223_v40 = vld [vmem:[%s1087_s1 + $0x60] sm:$0xff]  ;;  %s1092_s16 = smov (!%p198_p3, %s553_s16), 1 }
   0xe   : > { %783 = vmatprep.subr.bf16.mxu1 %v844_v3  ;;  %v793_v37 = vpack.c.bf16 %v222_v35, %v221_v34  ;;  %v224_v41 = vld [vmem:[%s1087_s1 + $0x68] sm:$0xff]  ;;  %v772_v42 = vpack.c.bf16 %v574_v39, %v573_v38  ;;  %v575_v44 = vld [vmem:[%s1087_s1 + $0xf0] sm:$0xff]  ;;  %v576_v45 = vld [vmem:[%s1087_s1 + $0xf8] sm:$0xff]  ;;  %s558_s7 = sshll.u32 %s1092_s16, 3  ;;  %s560_s28 = sshll.u32 %s1092_s16, 2 }
   0xf   : > { %v796_v43 = vpack.c.bf16 %v224_v41, %v223_v40  ;;  %v225_v46 = vld [vmem:[%s1087_s1 + $0x70] sm:$0xff]  ;;  %v226_v47 = vld [vmem:[%s1087_s1 + $0x78] sm:$0xff]  ;;  %v775_v48 = vpack.c.bf16 %v576_v45, %v575_v44  ;;  %s1007_s10 = scalar_lea.vmem %s1086_s0, %s558_s7  ;;  %v577_v50 = vld [vmem:[%s1087_s1 + $0x100] sm:$0xff]  ;;  %s205_s25 = scalar_lea.vmem %s1089_s3, %s558_s7 }
  0x10   : > { %761 = vmatpush3.bf16.msra.mxu0 %v760_v18  ;;  %v799_v49 = vpack.c.bf16 %v226_v47, %v225_v46  ;;  %v578_v51 = vld [vmem:[%s1087_s1 + $0x108] sm:$0xff]  ;;  %v227_v52 = vld [vmem:[%s1007_s10 + $0x1] sm:$0xf]  ;;  %v579_v55 = vld [vmem:[%s1087_s1 + $0x110] sm:$0xff]  ;;  %s209_s30 = scalar_lea.vmem %s1090_s4, %s560_s28 }
  0x11   : > { %785 = vmatpush3.bf16.msra.mxu1 %v784_v19  ;;  %762 = vmatprep.subr.bf16.mxu0 %v844_v3  ;;  %v802_v53 = vpack.c.bf16 %v578_v51, %v577_v50  ;;  %v210_v54 = vld [vmem:[%s1007_s10] sm:$0xf]  ;;  %v580_v56 = vld [vmem:[%s1087_s1 + $0x118] sm:$0xff]  ;;  %v582_v59 = vld [vmem:[%s1087_s1 + $0x128] sm:$0xff] }
  0x12   : > { %786 = vmatprep.subr.bf16.mxu1 %v844_v3  ;;  %v805_v57 = vpack.c.bf16 %v580_v56, %v579_v55  ;;  %v581_v58 = vld [vmem:[%s1087_s1 + $0x120] sm:$0xff]  ;;  %v583_v61 = vld [vmem:[%s1087_s1 + $0x130] sm:$0xff]  ;;  %v584_v62 = vld [vmem:[%s1087_s1 + $0x138] sm:$0xff] }
  0x13   : > { %v808_v60 = vpack.c.bf16 %v582_v59, %v581_v58  ;;  %v811_v63 = vpack.c.bf16 %v584_v62, %v583_v61  ;;  %v585_v0 = vld [vmem:[%s1087_s1 + $0x140] sm:$0xff]  ;;  %v586_v1 = vld [vmem:[%s1087_s1 + $0x148] sm:$0xff]  ;;  %v587_v4 = vld [vmem:[%s1087_s1 + $0x150] sm:$0xff] }
  0x14   : > { %764 = vmatpush3.bf16.msra.mxu0 %v763_v24  ;;  %v814_v2 = vpack.c.bf16 %v586_v1, %v585_v0  ;;  %v588_v5 = vld [vmem:[%s1087_s1 + $0x158] sm:$0xff]  ;;  %v589_v7 = vld [vmem:[%s1087_s1 + $0x160] sm:$0xff]  ;;  %v590_v8 = vld [vmem:[%s1087_s1 + $0x168] sm:$0xff] }
  0x15   : > { %788 = vmatpush3.bf16.msra.mxu1 %v787_v25  ;;  %765 = vmatprep.subr.bf16.mxu0 %v844_v3  ;;  %v817_v6 = vpack.c.bf16 %v588_v5, %v587_v4  ;;  %v820_v9 = vpack.c.bf16 %v590_v8, %v589_v7  ;;  %v591_v10 = vld [vmem:[%s1087_s1 + $0x170] sm:$0xff]  ;;  %v385_v13 = vld [vmem:[%s1007_s10 + $0x2] sm:$0xf] }
  0x16   : > { %789 = vmatprep.subr.bf16.mxu1 %v844_v3  ;;  %v482_v19 = vld [vmem:[%s205_s25] ss:$2 sm:$0xf]  ;;  %v594_v20 = vld [vmem:[%s205_s25 + $0x1] ss:$2 sm:$0xf] }
  0x17   : > { %v485_v23 = vmax.f32 %v482_v19, %v594_v20 }
  0x18   : > { %767 = vmatpush3.bf16.msra.mxu0 %v766_v30 }
  0x19   : > { %791 = vmatpush3.bf16.msra.mxu1 %v790_v31  ;;  %768 = vmatprep.subr.bf16.mxu0 %v844_v3 }
  0x1a   : > { %792 = vmatprep.subr.bf16.mxu1 %v844_v3 }
  0x1c   : > { %770 = vmatpush3.bf16.msra.mxu0 %v769_v36 }
  0x1d   : > { %794 = vmatpush3.bf16.msra.mxu1 %v793_v37  ;;  %771 = vmatprep.subr.bf16.mxu0 %v844_v3 }
  0x1e   : > { %795 = vmatprep.subr.bf16.mxu1 %v844_v3 }
  0x20   : > { %773 = vmatpush3.bf16.msra.mxu0 %v772_v42 }
  0x21   : > { %797 = vmatpush3.bf16.msra.mxu1 %v796_v43  ;;  %774 = vmatprep.subr.bf16.mxu0 %v844_v3 }
  0x22   : > { %798 = vmatprep.subr.bf16.mxu1 %v844_v3 }
  0x24   : > { %776 = vmatpush3.bf16.msra.mxu0 %v775_v48 }
  0x25   : > { %800 = vmatpush3.bf16.msra.mxu1 %v799_v49  ;;  %801 = vmatprep.subr.bf16.mxu0 %v844_v3 }
  0x27   : > { %681 = vmatmul.mubr.f32.vlgmr.msra.gmra.mrb[0].mxu0 %v227_v52 }
  0x28   : > { %716 = vmatmul.mubr.f32.vlgmr.msra.gmra.mrb[0].mxu1 %v210_v54  ;;  %803 = vmatpush3.bf16.msra.mxu0 %v802_v53 }
  0x29   : > { %804 = vmatprep.subr.bf16.mxu0 %v844_v3  ;;  %750 = vmatprep.mubr.msk.f32.mxu0 %vm845_vm0, %v846_v11  ;;  %v592_v11 = vld [vmem:[%s1087_s1 + $0x178] sm:$0xff] }
  0x2a   : > { %v823_v12 = vpack.c.bf16 %v592_v11, %v591_v10 }
  0x2c   : > { %806 = vmatpush3.bf16.msra.mxu0 %v805_v57 }
  0x2d   : > { %807 = vmatprep.subr.bf16.mxu0 %v844_v3 }
  0x30   : > { %809 = vmatpush3.bf16.msra.mxu0 %v808_v60 }
  0x31   : > { %810 = vmatprep.subr.bf16.mxu0 %v844_v3 }
  0x34   : > { %812 = vmatpush3.bf16.msra.mxu0 %v811_v63 }
  0x35   : > { %813 = vmatprep.subr.bf16.mxu0 %v844_v3 }
  0x38   : > { %815 = vmatpush3.bf16.msra.mxu0 %v814_v2 }
  0x39   : > { %816 = vmatprep.subr.bf16.mxu0 %v844_v3 }
  0x3c   : > { %818 = vmatpush3.bf16.msra.mxu0 %v817_v6 }
  0x3d   : > { %819 = vmatprep.subr.bf16.mxu0 %v844_v3 }
  0x40   : > { %821 = vmatpush3.bf16.msra.mxu0 %v820_v9 }
  0x41   : > { %822 = vmatprep.subr.bf16.mxu0 %v844_v3  ;;  %v593_v3 = vld [vmem:[%s1088_s2] ss:$0 sm:$0xff] }
  0x44   : > { %824 = vmatpush3.bf16.msra.mxu0 %v823_v12 }
  0x47   : > { %751 = vmatmul.mubr.f32.vlgmr.msra.gmra.mrb[2].mxu0 %v385_v13 }
  0xfa   : > { %v311_v14 = vpop.f32.mrb[0].mxu0 }
  0xfb   : > { %v682_v15 = vpop.f32.mrb[1].mxu0  ;;  %v381_v16 = vpop.f32.mrb[0].mxu1 }
  0xfc   : > { %v382_v17 = vadd.f32 %v381_v16, %v311_v14  ;;  %v717_v18 = vpop.f32.mrb[1].mxu1 }
 0x11a   : > { %v469_v21 = vpop.f32.mrb[2].mxu0 }
 0x11b   : > { %v473_v22 = vadd.f32 %v469_v21, %v382_v17  ;;  %v752_v24 = vpop.f32.mrb[3].mxu0 }
 0x11d   : > { %v481_v25 = vadd.f32 %v593_v3, %v473_v22 }
 0x11f   : > { %v486_v26 = vadd.f32 %v485_v23, %v481_v25 }
 0x121   : > { %487 = vst [vmem:[%s209_s30] sm:$0xf] %v486_v26 }
 0x122 PF: > { %s14_s15 = sadd.s32 1, %s842_s15  }
 0x123   : > { %p11_p4 = scmp.ge.s32.totalorder %s14_s15, 4  }
 0x125   :  { %13 = sbr.rel (!%p11_p4) target bundleno = 1 (0x1), region = 72 }

// kernel: _lambda_.19
= control target key start
LH: loop header
LB: loop body
LE: loop exit
PB: predicated region body
PF: predicated region fallthrough
CT: control target
= control target key end

     0   :  { %12 = vsyncpa [#allocation3], 0  ;;  %s1110_s0 = inlined_call_operand.vmem [shape: f32[2,4,128], index: 0, kind: input, shape index: {}]   ;;  %s1111_s1 = inlined_call_operand.vmem [shape: f32[1,128], index: 1, kind: input, shape index: {}]   ;;  %s1112_s2 = inlined_call_operand.vmem [shape: f32[1,128], index: 2, kind: input, shape index: {}]   ;;  %s1113_s3 = inlined_call_operand.vmem [shape: f32[128,128], index: 3, kind: input, shape index: {}]   ;;  %s1114_s4 = inlined_call_operand.vmem [shape: f32[1,128], index: 4, kind: input, shape index: {}]   ;;  %s1115_s5 = inlined_call_operand.vmem [shape: f32[128,128], index: 5, kind: input, shape index: {}]   ;;  %s1116_s6 = inlined_call_operand.vmem [shape: f32[1,128], index: 6, kind: input, shape index: {}]   ;;  %s1117_s7 = inlined_call_operand.hbm [shape: f32[2,1,128], index: 7, kind: output, shape index: {}]  }
   0x1   :  { %14 = vsyncpa [#allocation3 + $0x1], 0  ;;  %s886_s24 = smov 0   ;;  %s888_s25 = smov 0  }
   0x2   :  { %s890_s26 = smov 0   ;;  %s892_s27 = smov 0  }
   0x3 LB: > { %s907_s28 = sadd.s32 4294967295, %s840_s27   ;;  %s565_s29 = sadd.s32 4294967294, %s840_s27   ;;  %s840_s27 = sphi %s892_s27, %s1123_s27   ;;  %s836_s26 = sphi %s890_s26, %s1122_s26   ;;  %s832_s25 = sphi %s888_s25, %s1121_s25   ;;  %s828_s24 = sphi %s886_s24, %s1120_s24  }
   0x4   : > { %s911_s30 = sadd.s32 1, %s840_s27   ;;  %s179_s8 = sadd.s32 1, %s836_s26 }
   0x5   : > { %s176_s9 = ssub.s32 %s840_s27, %s911_s30  ;;  %p189_p0 = scmp.ne.s32.totalorder %s836_s26, %s832_s25 }
   0x6   : > { %p177_p1 = scmp.eq.s32.totalorder %s176_s9, 0  ;;  %p190_p2 = scmp.eq.s32.totalorder %s907_s28, 1 }
   0x7   : > { %p195_p3 = scmp.ne.s32.totalorder %s832_s25, %s828_s24  ;;  %p196_p4 = scmp.eq.s32.totalorder %s565_s29, 1 }
   0x8   : > { %s922_s10 = scalar_select %p177_p1, %s836_s26, %s179_s8  }
   0x9   : > { %p924_p5 = por %p190_p2, %p189_p0  ;;  %p928_p6 = por %p196_p4, %p195_p3 }
   0xa   : > { %p568_p7 = scmp.ge.s32.totalorder %s840_s27, 1  ;;  %p239_p8 = scmp.lt.s32.totalorder %s840_s27, 3 }
   0xc   : > { %p240_p9 = pnand %p568_p7, %p239_p8 }
   0xd   : > { %v300_v0 = vld [vmem:[%s1113_s3] sm:$0xff] (!%p240_p9)  ;;  %v301_v1 = vld [vmem:[%s1113_s3 + $0x8] sm:$0xff] (!%p240_p9)  ;;  %v302_v2 = vld [vmem:[%s1113_s3 + $0x10] sm:$0xff] (!%p240_p9)  ;;  %v842_v3 = vmov (!%p240_p9), 0.0|0.0   ;;  %vm843_vm0 = vmmov (!%p240_p9), 0   ;;  %v844_v6 = vmov (!%p240_p9), 0.0  }
   0xe   : > { %243 = sbr.rel (%p240_p9) target bundleno = 830 (0x33e), region = 48  ;;  %680 = vmatprep.subr.bf16.mxu0 (!%p240_p9), %v842_v3  ;;  %v681_v4 = vpack.c.bf16 (!%p240_p9), %v301_v1, %v300_v0  ;;  %v303_v5 = vld [vmem:[%s1113_s3 + $0x18] sm:$0xff] (!%p240_p9)  ;;  %642 = vmatprep.mubr.msk.f32.mxu0 (!%p240_p9), %vm843_vm0, %v844_v6  ;;  %p269_p10 = scmp.lt.s32.totalorder (!%p240_p9), %s907_s28, 1  ;;  %v304_v8 = vld [vmem:[%s1113_s3 + $0x20] sm:$0xff] (!%p240_p9)  ;;  %v305_v9 = vld [vmem:[%s1113_s3 + $0x28] sm:$0xff] (!%p240_p9)  ;;  %vm291_vm1 = vcmask (!%p240_p9), 1043456  }
   0xf   : > { %704 = vmatprep.subr.bf16.mxu1 (!%p240_p9), %v842_v3  ;;  %677 = vmatprep.mubr.msk.f32.mxu1 (!%p240_p9), %vm843_vm0, %v844_v6  ;;  %v684_v7 = vpack.c.bf16 (!%p240_p9), %v303_v5, %v302_v2  ;;  %v570_v10 = vld [vmem:[%s1111_s1] ss:$0 sm:$0xff] (!%p240_p9)  ;;  %v394_v12 = vld [vmem:[%s1115_s5 + $0x8] sm:$0xff] (!%p240_p9)  ;;  %v687_v13 = vpack.c.bf16 (!%p240_p9), %v305_v9, %v304_v8  ;;  %v306_v17 = vld [vmem:[%s1113_s3 + $0x30] sm:$0xff] (!%p240_p9)  ;;  %v480_v9 = vlaneseq (!%p240_p9)  ;;  %vm484_vm3 = vcmask (!%p240_p9), 1040384   ;;  %s267_s20 = sand.u32 (!%p240_p9), 1, %s832_s25  }
  0x10   : > { %682 = vmatpush3.bf16.msra.mxu0 (!%p240_p9), %v681_v4  ;;  %v393_v11 = vld [vmem:[%s1115_s5] sm:$0xff] (!%p240_p9)  ;;  %v307_v18 = vld [vmem:[%s1113_s3 + $0x38] sm:$0xff] (!%p240_p9)  ;;  %v309_v23 = vld [vmem:[%s1113_s3 + $0x48] sm:$0xff] (!%p240_p9)  ;;  %s573_s22 = sshll.u32 (!%p240_p9), %s907_s28, 4  ;;  %s498_s13 = scalar_lea.sflag (!%p240_p9), [#allocation3], %s267_s20 }
  0x11   : > { %683 = vmatprep.subr.bf16.mxu0 (!%p240_p9), %v842_v3  ;;  %v571_v15 = vld [vmem:[%s1112_s2] ss:$0 sm:$0xff] (!%p240_p9)  ;;  %v705_v16 = vpack.c.bf16 (!%p240_p9), %v394_v12, %v393_v11  ;;  %v690_v21 = vpack.c.bf16 (!%p240_p9), %v307_v18, %v306_v17  ;;  %v310_v28 = vld [vmem:[%s1113_s3 + $0x50] sm:$0xff] (!%p240_p9)  ;;  %v311_v29 = vld [vmem:[%s1113_s3 + $0x58] sm:$0xff] (!%p240_p9) }
  0x12   : > { %v308_v22 = vld [vmem:[%s1113_s3 + $0x40] sm:$0xff] (!%p240_p9)  ;;  %v696_v31 = vpack.c.bf16 (!%p240_p9), %v311_v29, %v310_v28  ;;  %v313_v34 = vld [vmem:[%s1113_s3 + $0x68] sm:$0xff] (!%p240_p9)  ;;  %v314_v38 = vld [vmem:[%s1113_s3 + $0x70] sm:$0xff] (!%p240_p9) }
  0x13   : > { %706 = vmatpush3.bf16.msra.mxu1 (!%p240_p9), %v705_v16  ;;  %v693_v26 = vpack.c.bf16 (!%p240_p9), %v309_v23, %v308_v22  ;;  %v312_v33 = vld [vmem:[%s1113_s3 + $0x60] sm:$0xff] (!%p240_p9)  ;;  %v315_v39 = vld [vmem:[%s1113_s3 + $0x78] sm:$0xff] (!%p240_p9)  ;;  %v395_v43 = vld [vmem:[%s1115_s5 + $0x10] sm:$0xff] (!%p240_p9) }
  0x14   : > { %685 = vmatpush3.bf16.msra.mxu0 (!%p240_p9), %v684_v7  ;;  %707 = vmatprep.subr.bf16.mxu1 (!%p240_p9), %v842_v3  ;;  %v699_v36 = vpack.c.bf16 (!%p240_p9), %v313_v34, %v312_v33  ;;  %v702_v41 = vpack.c.bf16 (!%p240_p9), %v315_v39, %v314_v38  ;;  %v396_v44 = vld [vmem:[%s1115_s5 + $0x18] sm:$0xff] (!%p240_p9)  ;;  %v397_v46 = vld [vmem:[%s1115_s5 + $0x20] sm:$0xff] (!%p240_p9)  ;;  %v398_v47 = vld [vmem:[%s1115_s5 + $0x28] sm:$0xff] (!%p240_p9) }
  0x15   : > { %s270_s21 = scalar_select %p269_p10, %s907_s28, 1  ;;  %686 = vmatprep.subr.bf16.mxu0 %v842_v3  ;;  %v708_v45 = vpack.c.bf16 %v396_v44, %v395_v43  ;;  %v711_v48 = vpack.c.bf16 %v398_v47, %v397_v46  ;;  %v399_v49 = vld [vmem:[%s1115_s5 + $0x30] sm:$0xff]  ;;  %v400_v50 = vld [vmem:[%s1115_s5 + $0x38] sm:$0xff]  ;;  %v401_v52 = vld [vmem:[%s1115_s5 + $0x40] sm:$0xff] }
  0x16   : > { %v714_v51 = vpack.c.bf16 %v400_v50, %v399_v49  ;;  %v402_v53 = vld [vmem:[%s1115_s5 + $0x48] sm:$0xff]  ;;  %v403_v55 = vld [vmem:[%s1115_s5 + $0x50] sm:$0xff]  ;;  %v404_v56 = vld [vmem:[%s1115_s5 + $0x58] sm:$0xff]  ;;  %s845_s28 = smov [#allocation2]  }
  0x17   : > { %s569_s9 = sshll.u32 %s270_s21, 2  ;;  %709 = vmatpush3.bf16.msra.mxu1 %v708_v45  ;;  %v717_v54 = vpack.c.bf16 %v402_v53, %v401_v52  ;;  %v720_v57 = vpack.c.bf16 %v404_v56, %v403_v55  ;;  %v405_v58 = vld [vmem:[%s1115_s5 + $0x60] sm:$0xff]  ;;  %v406_v59 = vld [vmem:[%s1115_s5 + $0x68] sm:$0xff]  ;;  %v407_v61 = vld [vmem:[%s1115_s5 + $0x70] sm:$0xff]  ;;  %s268_s21 = scalar_lea.vmem [#allocation2], %s267_s20 }
  0x18   : > { %s272_s17 = scalar_lea.vmem %s1110_s0, %s569_s9  ;;  %688 = vmatpush3.bf16.msra.mxu0 %v687_v13  ;;  %710 = vmatprep.subr.bf16.mxu1 %v842_v3  ;;  %v723_v60 = vpack.c.bf16 %v406_v59, %v405_v58  ;;  %v408_v62 = vld [vmem:[%s1115_s5 + $0x78] sm:$0xff]  ;;  %v316_v0 = vld [vmem:[%s1114_s4] sm:$0x1]  ;;  %s510_s23 = sshll.u32 %s268_s21, 4  ;;  %s1070_s23 = int_to_ptr.vmem [resolvable:$true] %s510_s23 }
  0x19   : > { %v273_v14 = vld [vmem:[%s272_s17] sm:$0xf]  ;;  %689 = vmatprep.subr.bf16.mxu0 %v842_v3  ;;  %v726_v63 = vpack.c.bf16 %v408_v62, %v407_v61  ;;  %s1068_s9 = scalar_lea.hbm %s1117_s7, %s573_s22  ;;  %s778_s14 = scalar_lea.vmem %s1070_s23, 16 }
  0x1a   : > { %v281_v19 = vmul.f32 %v570_v10, %v273_v14  ;;  %v481_v10 = vand.u32 127, %v480_v9  ;;  %p779_p11 = scmp.ne.s32.totalorder %s1070_s23, %s778_s14  ;;  %s782_s15 = sshll.u32 %s845_s28, 4  ;;  %s783_s15 = int_to_ptr.vmem [resolvable:$false] %s782_s15 }
  0x1b   : > { %712 = vmatpush3.bf16.msra.mxu1 %v711_v48  ;;  %s784_s16 = scalar_lea.vmem %s783_s15, 32  ;;  %p785_p0 = scmp.lt.s32.totalorder %s1070_s23, %s783_s15 }
  0x1c   : > { %v289_v20 = vadd.f32 %v571_v15, %v281_v19  ;;  %691 = vmatpush3.bf16.msra.mxu0 %v690_v21  ;;  %713 = vmatprep.subr.bf16.mxu1 %v842_v3  ;;  %vm482_vm2 = vcmp.lt.s32.totalorder %v481_v10, 4  ;;  %p780_p12 = pnand %p779_p11, %p924_p5  ;;  %p786_p1 = scmp.lt.s32.totalorder %s784_s16, %s778_s14 }
  0x1d   : > { %692 = vmatprep.subr.bf16.mxu0 %v842_v3 }
  0x1e   : > { %v290_v24 = vmax.f32 %v289_v20, 0.0  ;;  %p781_p13 = pneg %p780_p12  ;;  %p787_p2 = por %p786_p1, %p785_p0 }
  0x1f   : > { %715 = vmatpush3.bf16.msra.mxu1 %v714_v51 }
  0x20   : > { %v292_v25 = vsel %vm291_vm1, %v290_v24, 0.0  ;;  %694 = vmatpush3.bf16.msra.mxu0 %v693_v26  ;;  %716 = vmatprep.subr.bf16.mxu1 %v842_v3  ;;  %p788_p3 = pnand %p787_p2, %p781_p13 }
  0x21   : > { %v293_v27 = vrot.slane %v292_v25, 4  ;;  %695 = vmatprep.subr.bf16.mxu0 %v842_v3 }
  0x23   : > { %v294_v30 = vadd.f32 %v293_v27, %v292_v25  ;;  %718 = vmatpush3.bf16.msra.mxu1 %v717_v54 }
  0x24   : > { %697 = vmatpush3.bf16.msra.mxu0 %v696_v31  ;;  %719 = vmatprep.subr.bf16.mxu1 %v842_v3 }
  0x25   : > { %v295_v32 = vrot.slane %v294_v30, 2  ;;  %698 = vmatprep.subr.bf16.mxu0 %v842_v3 }
  0x27   : > { %v296_v35 = vadd.f32 %v295_v32, %v294_v30  ;;  %721 = vmatpush3.bf16.msra.mxu1 %v720_v57 }
  0x28   : > { %700 = vmatpush3.bf16.msra.mxu0 %v699_v36  ;;  %722 = vmatprep.subr.bf16.mxu1 %v842_v3 }
  0x29   : > { %v297_v37 = vrot.slane %v296_v35, 1  ;;  %701 = vmatprep.subr.bf16.mxu0 %v842_v3 }
  0x2b   : > { %v298_v40 = vadd.f32 %v297_v37, %v296_v35  ;;  %724 = vmatpush3.bf16.msra.mxu1 %v723_v60 }
  0x2c   : > { %703 = vmatpush3.bf16.msra.mxu0 %v702_v41  ;;  %725 = vmatprep.subr.bf16.mxu1 %v842_v3  ;;  %v409_v3 = vld [vmem:[%s1116_s6] sm:$0x1] }
  0x2d   : > { %v299_v42 = vmul.f32 0.25, %v298_v40 }
  0x2f   : > { %643 = vmatmul.mubr.f32.vlgmr.msra.gmra.mrb[0].mxu0 %v299_v42  ;;  %727 = vmatpush3.bf16.msra.mxu1 %v726_v63 }
 0x102   : > { %v383_v1 = vpop.f32.mrb[0].mxu0 }
 0x103   : > { %v384_v2 = vadd.f32 %v383_v1, %v316_v0  ;;  %v644_v4 = vpop.f32.mrb[1].mxu0 }
 0x105   : > { %v572_v5 = vmul.f32 -1.442695, %v384_v2 }
 0x107   : > { %770 = vpow2.f32 %v572_v5 }
 0x111   : > { %v771_v6 = vpop.eup %770 }
 0x112   : > { %v390_v7 = vadd.f32 1.0, %v771_v6 }
 0x114   : > { %772 = vrcp.f32 %v390_v7 }
 0x11e   : > { %v773_v8 = vpop.eup %772 }
 0x11f   : > { %678 = vmatmul.mubr.f32.vlgmr.msra.gmra.mrb[0].mxu1 %v773_v8 }
 0x1f2   : > { %v476_v11 = vpop.f32.mrb[0].mxu1 }
 0x1f3   : > { %v477_v12 = vadd.f32 %v476_v11, %v409_v3  ;;  %v679_v13 = vpop.f32.mrb[1].mxu1 }
 0x1f5   : > { %v483_v14 = vsel %vm482_vm2, %v477_v12, -1e+30 }
 0x1f6   : > { %v485_v15 = vsel %vm484_vm3, %v483_v14, -inf }
 0x1f7   : > { %486 = vmax.xlane.f32.xlu0 %v485_v15 }
 0x284   : > { %v487_v16 = vpop.xlane.xlu0 %486 }
 0x285   : > { %v488_v17 = vsub.f32 %v483_v14, %v487_v16 }
 0x287   : > { %v489_v18 = vmul.f32 1.442695, %v488_v17 }
 0x289   : > { %774 = vpow2.f32 %v489_v18 }
 0x293   : > { %v775_v19 = vpop.eup %774 }
 0x294   : > { %v491_v20 = vsel %vm484_vm3, %v775_v19, 0.0 }
 0x295   : > { %492 = vadd.xlane.f32.xlu0 %v491_v20 }
 0x322   : > { %v493_v21 = vpop.xlane.xlu0 %492 }
 0x323   : > { %776 = vrcp.f32 %v493_v21 }
 0x32d   : > { %v777_v22 = vpop.eup %776 }
 0x32e   : > { %v495_v23 = vmul.f32 %v777_v22, %v775_v19 }
 0x330   : > { %496 = vst [vmem:[%s268_s21] sm:$0x1] %v495_v23 }
 0x331   : > { %791 = shalt.err (!%p788_p3)
}
 0x332   : > { %s792_s17 = scalar_lea.hbm %s1068_s9, 16  ;;  %s796_s20 = scalar_lea.hbm %s1117_s7, 32 }
 0x333   : > { %p793_p4 = scmp.ne.s32.totalorder %s1068_s9, %s792_s17  ;;  %p797_p9 = scmp.lt.u32.totalorder %s1068_s9, %s1117_s7 }
 0x334   : > { %p798_p10 = scmp.lt.u32.totalorder %s796_s20, %s792_s17  ;;  %p800_p12 = scmp.lt.u32.totalorder %s792_s17, %s1068_s9 }
 0x335   : > { %p794_p7 = pnand %p793_p4, %p924_p5 }
 0x336   : > { %p799_p11 = por %p798_p10, %p797_p9 }
 0x337   : > { %p795_p8 = pneg %p794_p7 }
 0x338   : > { %p801_p13 = por %p800_p12, %p799_p11 }
 0x33a   : > { %p802_p0 = pnand %p801_p13, %p795_p8 }
 0x33c   : > { %805 = shalt.err (!%p802_p0)
}
 0x33d   : > { %728 = dma.vmem_to_hbm [thread:$0]  (%p924_p5), %s1070_s23, 16, %s1068_s9, %s498_s13  }
 0x33e PF: > { %p734_p1 = scmp.ge.s32.totalorder %s840_s27, 2  ;;  %s522_s29 = sand.u32 1, %s828_s24  }
 0x33f   : > { %s523_s8 = scalar_lea.sflag [#allocation3], %s522_s29 }
 0x340   : > { %p731_p2 = pnand %p734_p1, %p928_p6 }
 0x342   : > { %823 = dma.done.wait (!%p731_p2), %s523_s8, 16  }
 0x343   : > { %825 = vsyncadd (!%p731_p2), %s523_s8, 4294967280  ;;  %p17_p3 = scmp.ge.s32.totalorder %s911_s30, 4   ;;  %s1120_s24 = smov %s832_s25 }
 0x344   : > { %s1121_s25 = smov %s836_s26  ;;  %s1122_s26 = smov %s922_s10 }
 0x345   : > { %s1123_s27 = smov %s911_s30  ;;  %19 = sbr.rel (!%p17_p3) target bundleno = 3 (0x3), region = 83 }
 0x34c   :  { %527 = vsyncpa [#allocation3], 1 }
 0x34d   :  { %529 = vsyncpa [#allocation3 + $0x1], 1 }

</bundles_post_ra>
